<compile_context>
chip_gen: v5e
topology: v5e:2x2
jax: 0.10.0
libtpu: 0.0.40
codegen_flags: <defaults>
</compile_context>

<pallas_src>
import functools
import math

import jax
import jax.numpy as jnp
from jax.experimental import pallas as pl
from jax.experimental.pallas import tpu as pltpu


LEAKY_SLOPE = 0.01          # nn.LeakyReLU() default
LANE = 128
VMEM_LIMIT = 32 * 1024 * 1024   # explicit scoped-VMEM budget (safe on v5e/v6e/v7x)


def _round_up(x, m):
    return (x + m - 1) // m * m


# ----------------- fused Conv2d(k=3, s=2, p=1) + LeakyReLU ------------------

def _conv3x3_s2_kernel(xee_ref, xeo_ref, xoe_ref, xoo_ref, w_ref, b_ref,
                       o_ref, *, Ho, We, slope):
    """One (batch, Cout-tile) block of conv3x3/s2/p1 + bias + LeakyReLU.

    x??_ref : (He_s*We, Ci) bf16 parity slabs of the zero-padded input,
              ?? = (row parity, col parity), flattened row-major.
    w_ref   : (9, Ci, tco)  bf16, tap-major (kh*3+kw).
    b_ref   : (1, tco)      f32.
    o_ref   : (Ho*We, tco)  bf16; column index Wo of each row group is a wrap
              column that the wrapper slices off.
    """
    slabs = (xee_ref, xeo_ref, xoe_ref, xoo_ref)
    mp = Ho * We
    tco = o_ref.shape[-1]
    acc = jnp.zeros((mp, tco), jnp.float32)
    # K reduction (9 taps x Cin), fully unrolled: pure MXU accumulation.
    for kh in range(3):
        for kw in range(3):
            slab = slabs[(kh % 2) * 2 + (kw % 2)]
            off = (kh // 2) * We + (kw // 2)          # static offset
            lhs = slab[pl.ds(off, mp), :]             # (mp, Ci) bf16
            acc += jnp.dot(lhs, w_ref[kh * 3 + kw],
                           preferred_element_type=jnp.float32)
    # Epilogue (once, not per K-step): bias + LeakyReLU in f32, then downcast.
    acc = acc + b_ref[...]
    acc = jnp.where(acc >= 0, acc, slope * acc)
    o_ref[...] = acc.astype(o_ref.dtype)


def conv3x3_s2_lrelu(x, w_taps, bias2, *, slope=LEAKY_SLOPE):
    """Conv2d(k=3, s=2, p=1) + LeakyReLU.  x: (B, H, W, Ci) bf16 NHWC."""
    B, H, W, Ci = x.shape
    assert w_taps.shape[:2] == (9, Ci), (w_taps.shape, Ci)
    Cop = w_taps.shape[-1]
    Ho, Wo = (H + 1) // 2, (W + 1) // 2               # matches PyTorch output size
    He_s, We = Ho + 2, Wo + 1                         # oversized parity slabs

    # Conv zero-padding (1 each side) plus extra bottom/right zeros so each
    # parity slab is exactly (He_s, We).
    pad_b = max(0, 2 * He_s - (H + 2))
    pad_r = max(0, 2 * We - (W + 2))
    xp = jnp.pad(x, ((0, 0), (1, 1 + pad_b), (1, 1 + pad_r), (0, 0)))

    # Parity split: slab[dh*2+dw][b, r, c, :] == xp[b, 2r+dh, 2c+dw, :].
    # This is ~1x HBM traffic (vs 9x for a materialized im2col) and moves the
    # stride-2 access pattern out of the kernel.
    slabs = [
        xp[:, dh:dh + 2 * He_s:2, dw:dw + 2 * We:2, :].reshape(B, He_s * We, Ci)
        for dh in range(2) for dw in range(2)
    ]
    mp = Ho * We
    tco = 256 if Cop % 256 == 0 else LANE             # lane-dense Cout tile
    n_co = Cop // tco

    out = pl.pallas_call(
        functools.partial(_conv3x3_s2_kernel, Ho=Ho, We=We, slope=slope),
        out_shape=jax.ShapeDtypeStruct((B, mp, Cop), x.dtype),
        grid=(B, n_co),
        in_specs=[pl.BlockSpec((None, He_s * We, Ci), lambda b, c: (b, 0, 0))
                  for _ in range(4)]
                 + [pl.BlockSpec((9, Ci, tco), lambda b, c: (0, 0, c)),
                    pl.BlockSpec((1, tco), lambda b, c: (0, c))],
        out_specs=pl.BlockSpec((None, mp, tco), lambda b, c: (b, 0, c)),
        compiler_params=pltpu.CompilerParams(
            dimension_semantics=("parallel", "parallel"),
            vmem_limit_bytes=VMEM_LIMIT),
    )(*slabs, w_taps, bias2)

    # Drop the wrap column (flat position wo == Wo of each output row group).
    return out.reshape(B, Ho, We, Cop)[:, :, :Wo, :]   # (B, Ho, Wo, Cop) bf16


# --------------------- fused adaptive pool + EqualLinear --------------------

def _pool_linear_kernel(x_ref, w_ref, b_ref, o_ref, *, use_max):
    # x: (B, S, Cp) bf16 -> pool over S -> (B, Cp) -> EqualLinear head.
    x = x_ref[...].astype(jnp.float32)
    pooled = jnp.max(x, axis=1) if use_max else jnp.mean(x, axis=1)
    y = jnp.dot(pooled.astype(w_ref.dtype), w_ref[...],
                preferred_element_type=jnp.float32)
    o_ref[...] = (y + b_ref[...]).astype(o_ref.dtype)


def pool_linear(x3, w_lin, b_lin, *, use_max=False):
    B, S, Cp = x3.shape
    Cop = w_lin.shape[-1]
    return pl.pallas_call(
        functools.partial(_pool_linear_kernel, use_max=use_max),
        out_shape=jax.ShapeDtypeStruct((B, Cop), jnp.float32),
        grid=(1,),
        in_specs=[pl.BlockSpec((B, S, Cp), lambda i: (0, 0, 0)),
                  pl.BlockSpec((Cp, Cop), lambda i: (0, 0)),
                  pl.BlockSpec((1, Cop), lambda i: (0, 0))],
        out_specs=pl.BlockSpec((B, Cop), lambda i: (0, 0)),
        compiler_params=pltpu.CompilerParams(
            dimension_semantics=("arbitrary",),
            vmem_limit_bytes=VMEM_LIMIT),
    )(x3, w_lin, b_lin)


# ------------------------- parameters & forward pass ------------------------

def init_gradual_style_block(key, in_c, out_c, spatial):
    """Raw (PyTorch-layout) parameters, matching GradualStyleBlock.__init__."""
    num_pools = int(math.log2(spatial))
    convs = []
    cin = in_c
    for _ in range(num_pools):
        key, kw, kb = jax.random.split(key, 3)
        fan_in = cin * 9
        w = jax.random.normal(kw, (out_c, cin, 3, 3), jnp.float32) / math.sqrt(fan_in)
        b = jax.random.normal(kb, (out_c,), jnp.float32) * 0.1
        convs.append((w, b))
        cin = out_c
    key, kl = jax.random.split(key)
    # EqualLinear(out_c, out_c, lr_mul=1): weight ~ randn(out, in), bias = 0;
    # effective weight at forward time is weight / sqrt(in).
    lin_w = jax.random.normal(kl, (out_c, out_c), jnp.float32)
    lin_b = jnp.zeros((out_c,), jnp.float32)
    return {"convs": convs, "linear": (lin_w, lin_b)}


def prepare_params(raw, in_c, out_c):
    """One-time (hoisted) weight re-layout for the TPU kernels.

    Conv weights -> tap-major (9, Cin_pad, Cout_pad) bf16, biases (1, Cout_pad)
    f32; EqualLinear -> pre-scaled, transposed (Cin_pad, Cout_pad) bf16.
    Cout is padded to a multiple of 128 for lane-dense MXU tiles/stores.
    """
    cop = _round_up(out_c, LANE)
    convs = []
    cin, cin_p = in_c, in_c               # first conv consumes the unpadded input
    for (w, b) in raw["convs"]:
        wt = jnp.transpose(w, (2, 3, 1, 0)).reshape(9, cin, out_c)
        wt = jnp.pad(wt, ((0, 0), (0, cin_p - cin), (0, cop - out_c)))
        bt = jnp.pad(b, (0, cop - out_c)).reshape(1, cop).astype(jnp.float32)
        convs.append((wt.astype(jnp.bfloat16), bt))
        cin, cin_p = out_c, cop
    lin_w, lin_b = raw["linear"]
    scale = 1.0 / math.sqrt(out_c)        # EqualLinear, lr_mul=1
    wl = jnp.zeros((cop, cop), jnp.float32).at[:out_c, :out_c].set((lin_w * scale).T)
    bl = jnp.pad(lin_b, (0, cop - out_c)).reshape(1, cop).astype(jnp.float32)
    return {"convs": convs, "linear": (wl.astype(jnp.bfloat16), bl)}


def gradual_style_block_forward(x_nchw, prepared, out_c, max_pooling=False):
    # layout: NCHW (PyTorch) -> NHWC, bf16 activations (f32 accumulation in-kernel).
    x = jnp.transpose(x_nchw, (0, 2, 3, 1)).astype(jnp.bfloat16)
    for (wt, bt) in prepared["convs"]:
        x = conv3x3_s2_lrelu(x, wt, bt)
    B, Ho, Wo, Cp = x.shape
    w_lin, b_lin = prepared["linear"]
    y = pool_linear(x.reshape(B, Ho * Wo, Cp), w_lin, b_lin, use_max=max_pooling)
    return y[:, :out_c]                   # drop lane padding -> (B, out_c)


# ----------------------------- pure-JAX reference ---------------------------

def reference_forward(x_nchw, raw, out_c, max_pooling=False):
    """Reference with matching bf16 rounding of inputs/weights/activations."""
    f32, bf16 = jnp.float32, jnp.bfloat16
    x = jnp.transpose(x_nchw, (0, 2, 3, 1)).astype(bf16).astype(f32)
    for (w, b) in raw["convs"]:
        w_hwio = jnp.transpose(w, (2, 3, 1, 0)).astype(bf16).astype(f32)
        y = jax.lax.conv_general_dilated(
            x, w_hwio, window_strides=(2, 2), padding=((1, 1), (1, 1)),
            dimension_numbers=("NHWC", "HWIO", "NHWC"))
        y = y + b.reshape(1, 1, 1, -1)
        y = jnp.where(y >= 0, y, LEAKY_SLOPE * y)
        x = y.astype(bf16).astype(f32)
    pooled = (jnp.max(x, axis=(1, 2)) if max_pooling
              else jnp.mean(x, axis=(1, 2)))
    lin_w, lin_b = raw["linear"]
    w_eff = (lin_w / math.sqrt(lin_w.shape[1])).astype(bf16).astype(f32)
    pooled = pooled.astype(bf16).astype(f32)
    return pooled @ w_eff.T + lin_b.reshape(1, -1)


# ----------------------------------- main -----------------------------------

if __name__ == "__main__":
    batch, in_c, out_c, spatial = 2, 4, 32, 16   # 4 stride-2 convs: 16->8->4->2->1

    key = jax.random.PRNGKey(0)
    key, kx, kp = jax.random.split(key, 3)
    x = jax.random.normal(kx, (batch, in_c, spatial, spatial), jnp.float32)

    raw = init_gradual_style_block(kp, in_c, out_c, spatial)
    prepared = prepare_params(raw, in_c, out_c)   # hoisted weight re-layout

    fwd = jax.jit(functools.partial(gradual_style_block_forward,
                                    out_c=out_c, max_pooling=False))
    out = jax.block_until_ready(fwd(x, prepared))
    assert out.shape == (batch, out_c), out.shape

    ref = reference_forward(x, raw, out_c, max_pooling=False)
    err = float(jnp.max(jnp.abs(out - ref)))
    assert err < 5e-2, f"mismatch vs reference: max abs err = {err}"

    print("KERNEL_OK")
</pallas_src>

<mosaic_0001>
module attributes {stable_mosaic.version = 11 : i64} {
  func.func @_conv3x3_s2_kernel(%arg0: i32, %arg1: i32, %arg2: memref<1x90x4xbf16, #tpu.memory_space<vmem>>, %arg3: memref<1x90x4xbf16, #tpu.memory_space<vmem>>, %arg4: memref<1x90x4xbf16, #tpu.memory_space<vmem>>, %arg5: memref<1x90x4xbf16, #tpu.memory_space<vmem>>, %arg6: memref<9x4x128xbf16, #tpu.memory_space<vmem>>, %arg7: memref<1x128xf32, #tpu.memory_space<vmem>>, %arg8: memref<1x72x128xbf16, #tpu.memory_space<vmem>>) attributes {dimension_semantics = [#tpu.dimension_semantics<parallel>, #tpu.dimension_semantics<parallel>], iteration_bounds = array<i64: 2, 1>, scalar_prefetch = 0 : i64, scratch_operands = 0 : i64, tpu.core_type = #tpu.core_type<tc>, window_params = [{transform_indices = @transform_0, window_bounds = array<i64: 1, 90, 4>}, {transform_indices = @transform_1, window_bounds = array<i64: 1, 90, 4>}, {transform_indices = @transform_2, window_bounds = array<i64: 1, 90, 4>}, {transform_indices = @transform_3, window_bounds = array<i64: 1, 90, 4>}, {transform_indices = @transform_4, window_bounds = array<i64: 9, 4, 128>}, {transform_indices = @transform_5, window_bounds = array<i64: 1, 128>}, {transform_indices = @transform_6, window_bounds = array<i64: 1, 72, 128>}]} {
    %cst = arith.constant 0.000000e+00 : f32
    %0 = vector.broadcast %cst : f32 to vector<72x128xf32>
    %c0 = arith.constant 0 : index
    %c0_0 = arith.constant 0 : index
    %c0_1 = arith.constant 0 : index
    %1 = vector.load %arg2[%c0, %c0_0, %c0_1] : memref<1x90x4xbf16, #tpu.memory_space<vmem>>, vector<1x72x4xbf16>
    %2 = vector.shape_cast %1 : vector<1x72x4xbf16> to vector<72x4xbf16>
    %c0_2 = arith.constant 0 : index
    %c0_3 = arith.constant 0 : index
    %c0_4 = arith.constant 0 : index
    %3 = vector.load %arg6[%c0_2, %c0_3, %c0_4] : memref<9x4x128xbf16, #tpu.memory_space<vmem>>, vector<1x4x128xbf16>
    %4 = vector.shape_cast %3 : vector<1x4x128xbf16> to vector<4x128xbf16>
    %cst_5 = arith.constant dense<0.000000e+00> : vector<72x128xf32>
    %5 = tpu.matmul %2, %4, %cst_5 {dimension_numbers = #tpu.dot_dimension_numbers<[1], [0], [0], [1], [0, 0, 1, 1], [], []>} : vector<72x4xbf16>, vector<4x128xbf16>, vector<72x128xf32> -> vector<72x128xf32>
    %6 = arith.addf %0, %5 : vector<72x128xf32>
    %c0_6 = arith.constant 0 : index
    %c0_7 = arith.constant 0 : index
    %c0_8 = arith.constant 0 : index
    %7 = vector.load %arg3[%c0_6, %c0_7, %c0_8] : memref<1x90x4xbf16, #tpu.memory_space<vmem>>, vector<1x72x4xbf16>
    %8 = vector.shape_cast %7 : vector<1x72x4xbf16> to vector<72x4xbf16>
    %c1 = arith.constant 1 : index
    %c0_9 = arith.constant 0 : index
    %c0_10 = arith.constant 0 : index
    %9 = vector.load %arg6[%c1, %c0_9, %c0_10] : memref<9x4x128xbf16, #tpu.memory_space<vmem>>, vector<1x4x128xbf16>
    %10 = vector.shape_cast %9 : vector<1x4x128xbf16> to vector<4x128xbf16>
    %cst_11 = arith.constant dense<0.000000e+00> : vector<72x128xf32>
    %11 = tpu.matmul %8, %10, %cst_11 {dimension_numbers = #tpu.dot_dimension_numbers<[1], [0], [0], [1], [0, 0, 1, 1], [], []>} : vector<72x4xbf16>, vector<4x128xbf16>, vector<72x128xf32> -> vector<72x128xf32>
    %12 = arith.addf %6, %11 : vector<72x128xf32>
    %c0_12 = arith.constant 0 : index
    %c1_13 = arith.constant 1 : index
    %c0_14 = arith.constant 0 : index
    %13 = vector.load %arg2[%c0_12, %c1_13, %c0_14] : memref<1x90x4xbf16, #tpu.memory_space<vmem>>, vector<1x72x4xbf16>
    %14 = vector.shape_cast %13 : vector<1x72x4xbf16> to vector<72x4xbf16>
    %c2 = arith.constant 2 : index
    %c0_15 = arith.constant 0 : index
    %c0_16 = arith.constant 0 : index
    %15 = vector.load %arg6[%c2, %c0_15, %c0_16] : memref<9x4x128xbf16, #tpu.memory_space<vmem>>, vector<1x4x128xbf16>
    %16 = vector.shape_cast %15 : vector<1x4x128xbf16> to vector<4x128xbf16>
    %cst_17 = arith.constant dense<0.000000e+00> : vector<72x128xf32>
    %17 = tpu.matmul %14, %16, %cst_17 {dimension_numbers = #tpu.dot_dimension_numbers<[1], [0], [0], [1], [0, 0, 1, 1], [], []>} : vector<72x4xbf16>, vector<4x128xbf16>, vector<72x128xf32> -> vector<72x128xf32>
    %18 = arith.addf %12, %17 : vector<72x128xf32>
    %c0_18 = arith.constant 0 : index
    %c0_19 = arith.constant 0 : index
    %c0_20 = arith.constant 0 : index
    %19 = vector.load %arg4[%c0_18, %c0_19, %c0_20] : memref<1x90x4xbf16, #tpu.memory_space<vmem>>, vector<1x72x4xbf16>
    %20 = vector.shape_cast %19 : vector<1x72x4xbf16> to vector<72x4xbf16>
    %c3 = arith.constant 3 : index
    %c0_21 = arith.constant 0 : index
    %c0_22 = arith.constant 0 : index
    %21 = vector.load %arg6[%c3, %c0_21, %c0_22] : memref<9x4x128xbf16, #tpu.memory_space<vmem>>, vector<1x4x128xbf16>
    %22 = vector.shape_cast %21 : vector<1x4x128xbf16> to vector<4x128xbf16>
    %cst_23 = arith.constant dense<0.000000e+00> : vector<72x128xf32>
    %23 = tpu.matmul %20, %22, %cst_23 {dimension_numbers = #tpu.dot_dimension_numbers<[1], [0], [0], [1], [0, 0, 1, 1], [], []>} : vector<72x4xbf16>, vector<4x128xbf16>, vector<72x128xf32> -> vector<72x128xf32>
    %24 = arith.addf %18, %23 : vector<72x128xf32>
    %c0_24 = arith.constant 0 : index
    %c0_25 = arith.constant 0 : index
    %c0_26 = arith.constant 0 : index
    %25 = vector.load %arg5[%c0_24, %c0_25, %c0_26] : memref<1x90x4xbf16, #tpu.memory_space<vmem>>, vector<1x72x4xbf16>
    %26 = vector.shape_cast %25 : vector<1x72x4xbf16> to vector<72x4xbf16>
    %c4 = arith.constant 4 : index
    %c0_27 = arith.constant 0 : index
    %c0_28 = arith.constant 0 : index
    %27 = vector.load %arg6[%c4, %c0_27, %c0_28] : memref<9x4x128xbf16, #tpu.memory_space<vmem>>, vector<1x4x128xbf16>
    %28 = vector.shape_cast %27 : vector<1x4x128xbf16> to vector<4x128xbf16>
    %cst_29 = arith.constant dense<0.000000e+00> : vector<72x128xf32>
    %29 = tpu.matmul %26, %28, %cst_29 {dimension_numbers = #tpu.dot_dimension_numbers<[1], [0], [0], [1], [0, 0, 1, 1], [], []>} : vector<72x4xbf16>, vector<4x128xbf16>, vector<72x128xf32> -> vector<72x128xf32>
    %30 = arith.addf %24, %29 : vector<72x128xf32>
    %c0_30 = arith.constant 0 : index
    %c1_31 = arith.constant 1 : index
    %c0_32 = arith.constant 0 : index
    %31 = vector.load %arg4[%c0_30, %c1_31, %c0_32] : memref<1x90x4xbf16, #tpu.memory_space<vmem>>, vector<1x72x4xbf16>
    %32 = vector.shape_cast %31 : vector<1x72x4xbf16> to vector<72x4xbf16>
    %c5 = arith.constant 5 : index
    %c0_33 = arith.constant 0 : index
    %c0_34 = arith.constant 0 : index
    %33 = vector.load %arg6[%c5, %c0_33, %c0_34] : memref<9x4x128xbf16, #tpu.memory_space<vmem>>, vector<1x4x128xbf16>
    %34 = vector.shape_cast %33 : vector<1x4x128xbf16> to vector<4x128xbf16>
    %cst_35 = arith.constant dense<0.000000e+00> : vector<72x128xf32>
    %35 = tpu.matmul %32, %34, %cst_35 {dimension_numbers = #tpu.dot_dimension_numbers<[1], [0], [0], [1], [0, 0, 1, 1], [], []>} : vector<72x4xbf16>, vector<4x128xbf16>, vector<72x128xf32> -> vector<72x128xf32>
    %36 = arith.addf %30, %35 : vector<72x128xf32>
    %c0_36 = arith.constant 0 : index
    %c9 = arith.constant 9 : index
    %c0_37 = arith.constant 0 : index
    %37 = vector.load %arg2[%c0_36, %c9, %c0_37] : memref<1x90x4xbf16, #tpu.memory_space<vmem>>, vector<1x72x4xbf16>
    %38 = vector.shape_cast %37 : vector<1x72x4xbf16> to vector<72x4xbf16>
    %c6 = arith.constant 6 : index
    %c0_38 = arith.constant 0 : index
    %c0_39 = arith.constant 0 : index
    %39 = vector.load %arg6[%c6, %c0_38, %c0_39] : memref<9x4x128xbf16, #tpu.memory_space<vmem>>, vector<1x4x128xbf16>
    %40 = vector.shape_cast %39 : vector<1x4x128xbf16> to vector<4x128xbf16>
    %cst_40 = arith.constant dense<0.000000e+00> : vector<72x128xf32>
    %41 = tpu.matmul %38, %40, %cst_40 {dimension_numbers = #tpu.dot_dimension_numbers<[1], [0], [0], [1], [0, 0, 1, 1], [], []>} : vector<72x4xbf16>, vector<4x128xbf16>, vector<72x128xf32> -> vector<72x128xf32>
    %42 = arith.addf %36, %41 : vector<72x128xf32>
    %c0_41 = arith.constant 0 : index
    %c9_42 = arith.constant 9 : index
    %c0_43 = arith.constant 0 : index
    %43 = vector.load %arg3[%c0_41, %c9_42, %c0_43] : memref<1x90x4xbf16, #tpu.memory_space<vmem>>, vector<1x72x4xbf16>
    %44 = vector.shape_cast %43 : vector<1x72x4xbf16> to vector<72x4xbf16>
    %c7 = arith.constant 7 : index
    %c0_44 = arith.constant 0 : index
    %c0_45 = arith.constant 0 : index
    %45 = vector.load %arg6[%c7, %c0_44, %c0_45] : memref<9x4x128xbf16, #tpu.memory_space<vmem>>, vector<1x4x128xbf16>
    %46 = vector.shape_cast %45 : vector<1x4x128xbf16> to vector<4x128xbf16>
    %cst_46 = arith.constant dense<0.000000e+00> : vector<72x128xf32>
    %47 = tpu.matmul %44, %46, %cst_46 {dimension_numbers = #tpu.dot_dimension_numbers<[1], [0], [0], [1], [0, 0, 1, 1], [], []>} : vector<72x4xbf16>, vector<4x128xbf16>, vector<72x128xf32> -> vector<72x128xf32>
    %48 = arith.addf %42, %47 : vector<72x128xf32>
    %c0_47 = arith.constant 0 : index
    %c10 = arith.constant 10 : index
    %c0_48 = arith.constant 0 : index
    %49 = vector.load %arg2[%c0_47, %c10, %c0_48] : memref<1x90x4xbf16, #tpu.memory_space<vmem>>, vector<1x72x4xbf16>
    %50 = vector.shape_cast %49 : vector<1x72x4xbf16> to vector<72x4xbf16>
    %c8 = arith.constant 8 : index
    %c0_49 = arith.constant 0 : index
    %c0_50 = arith.constant 0 : index
    %51 = vector.load %arg6[%c8, %c0_49, %c0_50] : memref<9x4x128xbf16, #tpu.memory_space<vmem>>, vector<1x4x128xbf16>
    %52 = vector.shape_cast %51 : vector<1x4x128xbf16> to vector<4x128xbf16>
    %cst_51 = arith.constant dense<0.000000e+00> : vector<72x128xf32>
    %53 = tpu.matmul %50, %52, %cst_51 {dimension_numbers = #tpu.dot_dimension_numbers<[1], [0], [0], [1], [0, 0, 1, 1], [], []>} : vector<72x4xbf16>, vector<4x128xbf16>, vector<72x128xf32> -> vector<72x128xf32>
    %54 = arith.addf %48, %53 : vector<72x128xf32>
    %c0_52 = arith.constant 0 : index
    %c0_53 = arith.constant 0 : index
    %55 = vector.load %arg7[%c0_52, %c0_53] : memref<1x128xf32, #tpu.memory_space<vmem>>, vector<1x128xf32>
    %56 = vector.broadcast %55 : vector<1x128xf32> to vector<72x128xf32>
    %57 = arith.addf %54, %56 : vector<72x128xf32>
    %cst_54 = arith.constant 0.000000e+00 : f32
    %58 = vector.broadcast %cst_54 : f32 to vector<72x128xf32>
    %59 = arith.cmpf oge, %57, %58 : vector<72x128xf32>
    %cst_55 = arith.constant 0.00999999977 : f32
    %60 = vector.broadcast %cst_55 : f32 to vector<72x128xf32>
    %61 = arith.mulf %60, %57 : vector<72x128xf32>
    %62 = arith.select %59, %57, %61 : vector<72x128xi1>, vector<72x128xf32>
    %63 = arith.truncf %62 : vector<72x128xf32> to vector<72x128xbf16>
    %c0_56 = arith.constant 0 : index
    %c0_57 = arith.constant 0 : index
    %c0_58 = arith.constant 0 : index
    %64 = vector.load %arg8[%c0_56, %c0_57, %c0_58] : memref<1x72x128xbf16, #tpu.memory_space<vmem>>, vector<1x72x128xbf16>
    %65 = vector.shape_cast %64 : vector<1x72x128xbf16> to vector<72x128xbf16>
    %66 = vector.shape_cast %63 : vector<72x128xbf16> to vector<1x72x128xbf16>
    tpu.vector_store %arg8[%c0_56, %c0_57, %c0_58], %66 {strides = array<i32>} : memref<1x72x128xbf16, #tpu.memory_space<vmem>>, vector<1x72x128xbf16>,
    return
  }
  func.func @transform_0(%arg0: i32, %arg1: i32) -> (i32, i32, i32) {
    %c0_i32 = arith.constant 0 : i32
    %c0_i32_0 = arith.constant 0 : i32
    %c0_i32_1 = arith.constant 0 : i32
    return %arg0, %c0_i32, %c0_i32_0 : i32, i32, i32
  }
  func.func @transform_1(%arg0: i32, %arg1: i32) -> (i32, i32, i32) {
    %c0_i32 = arith.constant 0 : i32
    %c0_i32_0 = arith.constant 0 : i32
    %c0_i32_1 = arith.constant 0 : i32
    return %arg0, %c0_i32, %c0_i32_0 : i32, i32, i32
  }
  func.func @transform_2(%arg0: i32, %arg1: i32) -> (i32, i32, i32) {
    %c0_i32 = arith.constant 0 : i32
    %c0_i32_0 = arith.constant 0 : i32
    %c0_i32_1 = arith.constant 0 : i32
    return %arg0, %c0_i32, %c0_i32_0 : i32, i32, i32
  }
  func.func @transform_3(%arg0: i32, %arg1: i32) -> (i32, i32, i32) {
    %c0_i32 = arith.constant 0 : i32
    %c0_i32_0 = arith.constant 0 : i32
    %c0_i32_1 = arith.constant 0 : i32
    return %arg0, %c0_i32, %c0_i32_0 : i32, i32, i32
  }
  func.func @transform_4(%arg0: i32, %arg1: i32) -> (i32, i32, i32) {
    %c0_i32 = arith.constant 0 : i32
    %c0_i32_0 = arith.constant 0 : i32
    %c0_i32_1 = arith.constant 0 : i32
    return %c0_i32, %c0_i32_0, %arg1 : i32, i32, i32
  }
  func.func @transform_5(%arg0: i32, %arg1: i32) -> (i32, i32) {
    %c0_i32 = arith.constant 0 : i32
    %c0_i32_0 = arith.constant 0 : i32
    return %c0_i32, %arg1 : i32, i32
  }
  func.func @transform_6(%arg0: i32, %arg1: i32) -> (i32, i32, i32) {
    %c0_i32 = arith.constant 0 : i32
    %c0_i32_0 = arith.constant 0 : i32
    return %arg0, %c0_i32, %arg1 : i32, i32, i32
  }
}

module attributes {stable_mosaic.version = 11 : i64} {
  func.func @_conv3x3_s2_kernel(%arg0: i32, %arg1: i32, %arg2: memref<1x30x128xbf16, #tpu.memory_space<vmem>>, %arg3: memref<1x30x128xbf16, #tpu.memory_space<vmem>>, %arg4: memref<1x30x128xbf16, #tpu.memory_space<vmem>>, %arg5: memref<1x30x128xbf16, #tpu.memory_space<vmem>>, %arg6: memref<9x128x128xbf16, #tpu.memory_space<vmem>>, %arg7: memref<1x128xf32, #tpu.memory_space<vmem>>, %arg8: memref<1x20x128xbf16, #tpu.memory_space<vmem>>) attributes {dimension_semantics = [#tpu.dimension_semantics<parallel>, #tpu.dimension_semantics<parallel>], iteration_bounds = array<i64: 2, 1>, scalar_prefetch = 0 : i64, scratch_operands = 0 : i64, tpu.core_type = #tpu.core_type<tc>, window_params = [{transform_indices = @transform_0, window_bounds = array<i64: 1, 30, 128>}, {transform_indices = @transform_1, window_bounds = array<i64: 1, 30, 128>}, {transform_indices = @transform_2, window_bounds = array<i64: 1, 30, 128>}, {transform_indices = @transform_3, window_bounds = array<i64: 1, 30, 128>}, {transform_indices = @transform_4, window_bounds = array<i64: 9, 128, 128>}, {transform_indices = @transform_5, window_bounds = array<i64: 1, 128>}, {transform_indices = @transform_6, window_bounds = array<i64: 1, 20, 128>}]} {
    %cst = arith.constant 0.000000e+00 : f32
    %0 = vector.broadcast %cst : f32 to vector<20x128xf32>
    %c0 = arith.constant 0 : index
    %c0_0 = arith.constant 0 : index
    %c0_1 = arith.constant 0 : index
    %1 = vector.load %arg2[%c0, %c0_0, %c0_1] : memref<1x30x128xbf16, #tpu.memory_space<vmem>>, vector<1x20x128xbf16>
    %2 = vector.shape_cast %1 : vector<1x20x128xbf16> to vector<20x128xbf16>
    %c0_2 = arith.constant 0 : index
    %c0_3 = arith.constant 0 : index
    %c0_4 = arith.constant 0 : index
    %3 = vector.load %arg6[%c0_2, %c0_3, %c0_4] : memref<9x128x128xbf16, #tpu.memory_space<vmem>>, vector<1x128x128xbf16>
    %4 = vector.shape_cast %3 : vector<1x128x128xbf16> to vector<128x128xbf16>
    %cst_5 = arith.constant dense<0.000000e+00> : vector<20x128xf32>
    %5 = tpu.matmul %2, %4, %cst_5 {dimension_numbers = #tpu.dot_dimension_numbers<[1], [0], [0], [1], [0, 0, 1, 1], [], []>} : vector<20x128xbf16>, vector<128x128xbf16>, vector<20x128xf32> -> vector<20x128xf32>
    %6 = arith.addf %0, %5 : vector<20x128xf32>
    %c0_6 = arith.constant 0 : index
    %c0_7 = arith.constant 0 : index
    %c0_8 = arith.constant 0 : index
    %7 = vector.load %arg3[%c0_6, %c0_7, %c0_8] : memref<1x30x128xbf16, #tpu.memory_space<vmem>>, vector<1x20x128xbf16>
    %8 = vector.shape_cast %7 : vector<1x20x128xbf16> to vector<20x128xbf16>
    %c1 = arith.constant 1 : index
    %c0_9 = arith.constant 0 : index
    %c0_10 = arith.constant 0 : index
    %9 = vector.load %arg6[%c1, %c0_9, %c0_10] : memref<9x128x128xbf16, #tpu.memory_space<vmem>>, vector<1x128x128xbf16>
    %10 = vector.shape_cast %9 : vector<1x128x128xbf16> to vector<128x128xbf16>
    %cst_11 = arith.constant dense<0.000000e+00> : vector<20x128xf32>
    %11 = tpu.matmul %8, %10, %cst_11 {dimension_numbers = #tpu.dot_dimension_numbers<[1], [0], [0], [1], [0, 0, 1, 1], [], []>} : vector<20x128xbf16>, vector<128x128xbf16>, vector<20x128xf32> -> vector<20x128xf32>
    %12 = arith.addf %6, %11 : vector<20x128xf32>
    %c0_12 = arith.constant 0 : index
    %c1_13 = arith.constant 1 : index
    %c0_14 = arith.constant 0 : index
    %13 = vector.load %arg2[%c0_12, %c1_13, %c0_14] : memref<1x30x128xbf16, #tpu.memory_space<vmem>>, vector<1x20x128xbf16>
    %14 = vector.shape_cast %13 : vector<1x20x128xbf16> to vector<20x128xbf16>
    %c2 = arith.constant 2 : index
    %c0_15 = arith.constant 0 : index
    %c0_16 = arith.constant 0 : index
    %15 = vector.load %arg6[%c2, %c0_15, %c0_16] : memref<9x128x128xbf16, #tpu.memory_space<vmem>>, vector<1x128x128xbf16>
    %16 = vector.shape_cast %15 : vector<1x128x128xbf16> to vector<128x128xbf16>
    %cst_17 = arith.constant dense<0.000000e+00> : vector<20x128xf32>
    %17 = tpu.matmul %14, %16, %cst_17 {dimension_numbers = #tpu.dot_dimension_numbers<[1], [0], [0], [1], [0, 0, 1, 1], [], []>} : vector<20x128xbf16>, vector<128x128xbf16>, vector<20x128xf32> -> vector<20x128xf32>
    %18 = arith.addf %12, %17 : vector<20x128xf32>
    %c0_18 = arith.constant 0 : index
    %c0_19 = arith.constant 0 : index
    %c0_20 = arith.constant 0 : index
    %19 = vector.load %arg4[%c0_18, %c0_19, %c0_20] : memref<1x30x128xbf16, #tpu.memory_space<vmem>>, vector<1x20x128xbf16>
    %20 = vector.shape_cast %19 : vector<1x20x128xbf16> to vector<20x128xbf16>
    %c3 = arith.constant 3 : index
    %c0_21 = arith.constant 0 : index
    %c0_22 = arith.constant 0 : index
    %21 = vector.load %arg6[%c3, %c0_21, %c0_22] : memref<9x128x128xbf16, #tpu.memory_space<vmem>>, vector<1x128x128xbf16>
    %22 = vector.shape_cast %21 : vector<1x128x128xbf16> to vector<128x128xbf16>
    %cst_23 = arith.constant dense<0.000000e+00> : vector<20x128xf32>
    %23 = tpu.matmul %20, %22, %cst_23 {dimension_numbers = #tpu.dot_dimension_numbers<[1], [0], [0], [1], [0, 0, 1, 1], [], []>} : vector<20x128xbf16>, vector<128x128xbf16>, vector<20x128xf32> -> vector<20x128xf32>
    %24 = arith.addf %18, %23 : vector<20x128xf32>
    %c0_24 = arith.constant 0 : index
    %c0_25 = arith.constant 0 : index
    %c0_26 = arith.constant 0 : index
    %25 = vector.load %arg5[%c0_24, %c0_25, %c0_26] : memref<1x30x128xbf16, #tpu.memory_space<vmem>>, vector<1x20x128xbf16>
    %26 = vector.shape_cast %25 : vector<1x20x128xbf16> to vector<20x128xbf16>
    %c4 = arith.constant 4 : index
    %c0_27 = arith.constant 0 : index
    %c0_28 = arith.constant 0 : index
    %27 = vector.load %arg6[%c4, %c0_27, %c0_28] : memref<9x128x128xbf16, #tpu.memory_space<vmem>>, vector<1x128x128xbf16>
    %28 = vector.shape_cast %27 : vector<1x128x128xbf16> to vector<128x128xbf16>
    %cst_29 = arith.constant dense<0.000000e+00> : vector<20x128xf32>
    %29 = tpu.matmul %26, %28, %cst_29 {dimension_numbers = #tpu.dot_dimension_numbers<[1], [0], [0], [1], [0, 0, 1, 1], [], []>} : vector<20x128xbf16>, vector<128x128xbf16>, vector<20x128xf32> -> vector<20x128xf32>
    %30 = arith.addf %24, %29 : vector<20x128xf32>
    %c0_30 = arith.constant 0 : index
    %c1_31 = arith.constant 1 : index
    %c0_32 = arith.constant 0 : index
    %31 = vector.load %arg4[%c0_30, %c1_31, %c0_32] : memref<1x30x128xbf16, #tpu.memory_space<vmem>>, vector<1x20x128xbf16>
    %32 = vector.shape_cast %31 : vector<1x20x128xbf16> to vector<20x128xbf16>
    %c5 = arith.constant 5 : index
    %c0_33 = arith.constant 0 : index
    %c0_34 = arith.constant 0 : index
    %33 = vector.load %arg6[%c5, %c0_33, %c0_34] : memref<9x128x128xbf16, #tpu.memory_space<vmem>>, vector<1x128x128xbf16>
    %34 = vector.shape_cast %33 : vector<1x128x128xbf16> to vector<128x128xbf16>
    %cst_35 = arith.constant dense<0.000000e+00> : vector<20x128xf32>
    %35 = tpu.matmul %32, %34, %cst_35 {dimension_numbers = #tpu.dot_dimension_numbers<[1], [0], [0], [1], [0, 0, 1, 1], [], []>} : vector<20x128xbf16>, vector<128x128xbf16>, vector<20x128xf32> -> vector<20x128xf32>
    %36 = arith.addf %30, %35 : vector<20x128xf32>
    %c0_36 = arith.constant 0 : index
    %c5_37 = arith.constant 5 : index
    %c0_38 = arith.constant 0 : index
    %37 = vector.load %arg2[%c0_36, %c5_37, %c0_38] : memref<1x30x128xbf16, #tpu.memory_space<vmem>>, vector<1x20x128xbf16>
    %38 = vector.shape_cast %37 : vector<1x20x128xbf16> to vector<20x128xbf16>
    %c6 = arith.constant 6 : index
    %c0_39 = arith.constant 0 : index
    %c0_40 = arith.constant 0 : index
    %39 = vector.load %arg6[%c6, %c0_39, %c0_40] : memref<9x128x128xbf16, #tpu.memory_space<vmem>>, vector<1x128x128xbf16>
    %40 = vector.shape_cast %39 : vector<1x128x128xbf16> to vector<128x128xbf16>
    %cst_41 = arith.constant dense<0.000000e+00> : vector<20x128xf32>
    %41 = tpu.matmul %38, %40, %cst_41 {dimension_numbers = #tpu.dot_dimension_numbers<[1], [0], [0], [1], [0, 0, 1, 1], [], []>} : vector<20x128xbf16>, vector<128x128xbf16>, vector<20x128xf32> -> vector<20x128xf32>
    %42 = arith.addf %36, %41 : vector<20x128xf32>
    %c0_42 = arith.constant 0 : index
    %c5_43 = arith.constant 5 : index
    %c0_44 = arith.constant 0 : index
    %43 = vector.load %arg3[%c0_42, %c5_43, %c0_44] : memref<1x30x128xbf16, #tpu.memory_space<vmem>>, vector<1x20x128xbf16>
    %44 = vector.shape_cast %43 : vector<1x20x128xbf16> to vector<20x128xbf16>
    %c7 = arith.constant 7 : index
    %c0_45 = arith.constant 0 : index
    %c0_46 = arith.constant 0 : index
    %45 = vector.load %arg6[%c7, %c0_45, %c0_46] : memref<9x128x128xbf16, #tpu.memory_space<vmem>>, vector<1x128x128xbf16>
    %46 = vector.shape_cast %45 : vector<1x128x128xbf16> to vector<128x128xbf16>
    %cst_47 = arith.constant dense<0.000000e+00> : vector<20x128xf32>
    %47 = tpu.matmul %44, %46, %cst_47 {dimension_numbers = #tpu.dot_dimension_numbers<[1], [0], [0], [1], [0, 0, 1, 1], [], []>} : vector<20x128xbf16>, vector<128x128xbf16>, vector<20x128xf32> -> vector<20x128xf32>
    %48 = arith.addf %42, %47 : vector<20x128xf32>
    %c0_48 = arith.constant 0 : index
    %c6_49 = arith.constant 6 : index
    %c0_50 = arith.constant 0 : index
    %49 = vector.load %arg2[%c0_48, %c6_49, %c0_50] : memref<1x30x128xbf16, #tpu.memory_space<vmem>>, vector<1x20x128xbf16>
    %50 = vector.shape_cast %49 : vector<1x20x128xbf16> to vector<20x128xbf16>
    %c8 = arith.constant 8 : index
    %c0_51 = arith.constant 0 : index
    %c0_52 = arith.constant 0 : index
    %51 = vector.load %arg6[%c8, %c0_51, %c0_52] : memref<9x128x128xbf16, #tpu.memory_space<vmem>>, vector<1x128x128xbf16>
    %52 = vector.shape_cast %51 : vector<1x128x128xbf16> to vector<128x128xbf16>
    %cst_53 = arith.constant dense<0.000000e+00> : vector<20x128xf32>
    %53 = tpu.matmul %50, %52, %cst_53 {dimension_numbers = #tpu.dot_dimension_numbers<[1], [0], [0], [1], [0, 0, 1, 1], [], []>} : vector<20x128xbf16>, vector<128x128xbf16>, vector<20x128xf32> -> vector<20x128xf32>
    %54 = arith.addf %48, %53 : vector<20x128xf32>
    %c0_54 = arith.constant 0 : index
    %c0_55 = arith.constant 0 : index
    %55 = vector.load %arg7[%c0_54, %c0_55] : memref<1x128xf32, #tpu.memory_space<vmem>>, vector<1x128xf32>
    %56 = vector.broadcast %55 : vector<1x128xf32> to vector<20x128xf32>
    %57 = arith.addf %54, %56 : vector<20x128xf32>
    %cst_56 = arith.constant 0.000000e+00 : f32
    %58 = vector.broadcast %cst_56 : f32 to vector<20x128xf32>
    %59 = arith.cmpf oge, %57, %58 : vector<20x128xf32>
    %cst_57 = arith.constant 0.00999999977 : f32
    %60 = vector.broadcast %cst_57 : f32 to vector<20x128xf32>
    %61 = arith.mulf %60, %57 : vector<20x128xf32>
    %62 = arith.select %59, %57, %61 : vector<20x128xi1>, vector<20x128xf32>
    %63 = arith.truncf %62 : vector<20x128xf32> to vector<20x128xbf16>
    %c0_58 = arith.constant 0 : index
    %c0_59 = arith.constant 0 : index
    %c0_60 = arith.constant 0 : index
    %64 = vector.load %arg8[%c0_58, %c0_59, %c0_60] : memref<1x20x128xbf16, #tpu.memory_space<vmem>>, vector<1x20x128xbf16>
    %65 = vector.shape_cast %64 : vector<1x20x128xbf16> to vector<20x128xbf16>
    %66 = vector.shape_cast %63 : vector<20x128xbf16> to vector<1x20x128xbf16>
    tpu.vector_store %arg8[%c0_58, %c0_59, %c0_60], %66 {strides = array<i32>} : memref<1x20x128xbf16, #tpu.memory_space<vmem>>, vector<1x20x128xbf16>,
    return
  }
  func.func @transform_0(%arg0: i32, %arg1: i32) -> (i32, i32, i32) {
    %c0_i32 = arith.constant 0 : i32
    %c0_i32_0 = arith.constant 0 : i32
    %c0_i32_1 = arith.constant 0 : i32
    return %arg0, %c0_i32, %c0_i32_0 : i32, i32, i32
  }
  func.func @transform_1(%arg0: i32, %arg1: i32) -> (i32, i32, i32) {
    %c0_i32 = arith.constant 0 : i32
    %c0_i32_0 = arith.constant 0 : i32
    %c0_i32_1 = arith.constant 0 : i32
    return %arg0, %c0_i32, %c0_i32_0 : i32, i32, i32
  }
  func.func @transform_2(%arg0: i32, %arg1: i32) -> (i32, i32, i32) {
    %c0_i32 = arith.constant 0 : i32
    %c0_i32_0 = arith.constant 0 : i32
    %c0_i32_1 = arith.constant 0 : i32
    return %arg0, %c0_i32, %c0_i32_0 : i32, i32, i32
  }
  func.func @transform_3(%arg0: i32, %arg1: i32) -> (i32, i32, i32) {
    %c0_i32 = arith.constant 0 : i32
    %c0_i32_0 = arith.constant 0 : i32
    %c0_i32_1 = arith.constant 0 : i32
    return %arg0, %c0_i32, %c0_i32_0 : i32, i32, i32
  }
  func.func @transform_4(%arg0: i32, %arg1: i32) -> (i32, i32, i32) {
    %c0_i32 = arith.constant 0 : i32
    %c0_i32_0 = arith.constant 0 : i32
    %c0_i32_1 = arith.constant 0 : i32
    return %c0_i32, %c0_i32_0, %arg1 : i32, i32, i32
  }
  func.func @transform_5(%arg0: i32, %arg1: i32) -> (i32, i32) {
    %c0_i32 = arith.constant 0 : i32
    %c0_i32_0 = arith.constant 0 : i32
    return %c0_i32, %arg1 : i32, i32
  }
  func.func @transform_6(%arg0: i32, %arg1: i32) -> (i32, i32, i32) {
    %c0_i32 = arith.constant 0 : i32
    %c0_i32_0 = arith.constant 0 : i32
    return %arg0, %c0_i32, %arg1 : i32, i32, i32
  }
}

module attributes {stable_mosaic.version = 11 : i64} {
  func.func @_conv3x3_s2_kernel(%arg0: i32, %arg1: i32, %arg2: memref<1x12x128xbf16, #tpu.memory_space<vmem>>, %arg3: memref<1x12x128xbf16, #tpu.memory_space<vmem>>, %arg4: memref<1x12x128xbf16, #tpu.memory_space<vmem>>, %arg5: memref<1x12x128xbf16, #tpu.memory_space<vmem>>, %arg6: memref<9x128x128xbf16, #tpu.memory_space<vmem>>, %arg7: memref<1x128xf32, #tpu.memory_space<vmem>>, %arg8: memref<1x6x128xbf16, #tpu.memory_space<vmem>>) attributes {dimension_semantics = [#tpu.dimension_semantics<parallel>, #tpu.dimension_semantics<parallel>], iteration_bounds = array<i64: 2, 1>, scalar_prefetch = 0 : i64, scratch_operands = 0 : i64, tpu.core_type = #tpu.core_type<tc>, window_params = [{transform_indices = @transform_0, window_bounds = array<i64: 1, 12, 128>}, {transform_indices = @transform_1, window_bounds = array<i64: 1, 12, 128>}, {transform_indices = @transform_2, window_bounds = array<i64: 1, 12, 128>}, {transform_indices = @transform_3, window_bounds = array<i64: 1, 12, 128>}, {transform_indices = @transform_4, window_bounds = array<i64: 9, 128, 128>}, {transform_indices = @transform_5, window_bounds = array<i64: 1, 128>}, {transform_indices = @transform_6, window_bounds = array<i64: 1, 6, 128>}]} {
    %cst = arith.constant 0.000000e+00 : f32
    %0 = vector.broadcast %cst : f32 to vector<6x128xf32>
    %c0 = arith.constant 0 : index
    %c0_0 = arith.constant 0 : index
    %c0_1 = arith.constant 0 : index
    %1 = vector.load %arg2[%c0, %c0_0, %c0_1] : memref<1x12x128xbf16, #tpu.memory_space<vmem>>, vector<1x6x128xbf16>
    %2 = vector.shape_cast %1 : vector<1x6x128xbf16> to vector<6x128xbf16>
    %c0_2 = arith.constant 0 : index
    %c0_3 = arith.constant 0 : index
    %c0_4 = arith.constant 0 : index
    %3 = vector.load %arg6[%c0_2, %c0_3, %c0_4] : memref<9x128x128xbf16, #tpu.memory_space<vmem>>, vector<1x128x128xbf16>
    %4 = vector.shape_cast %3 : vector<1x128x128xbf16> to vector<128x128xbf16>
    %cst_5 = arith.constant dense<0.000000e+00> : vector<6x128xf32>
    %5 = tpu.matmul %2, %4, %cst_5 {dimension_numbers = #tpu.dot_dimension_numbers<[1], [0], [0], [1], [0, 0, 1, 1], [], []>} : vector<6x128xbf16>, vector<128x128xbf16>, vector<6x128xf32> -> vector<6x128xf32>
    %6 = arith.addf %0, %5 : vector<6x128xf32>
    %c0_6 = arith.constant 0 : index
    %c0_7 = arith.constant 0 : index
    %c0_8 = arith.constant 0 : index
    %7 = vector.load %arg3[%c0_6, %c0_7, %c0_8] : memref<1x12x128xbf16, #tpu.memory_space<vmem>>, vector<1x6x128xbf16>
    %8 = vector.shape_cast %7 : vector<1x6x128xbf16> to vector<6x128xbf16>
    %c1 = arith.constant 1 : index
    %c0_9 = arith.constant 0 : index
    %c0_10 = arith.constant 0 : index
    %9 = vector.load %arg6[%c1, %c0_9, %c0_10] : memref<9x128x128xbf16, #tpu.memory_space<vmem>>, vector<1x128x128xbf16>
    %10 = vector.shape_cast %9 : vector<1x128x128xbf16> to vector<128x128xbf16>
    %cst_11 = arith.constant dense<0.000000e+00> : vector<6x128xf32>
    %11 = tpu.matmul %8, %10, %cst_11 {dimension_numbers = #tpu.dot_dimension_numbers<[1], [0], [0], [1], [0, 0, 1, 1], [], []>} : vector<6x128xbf16>, vector<128x128xbf16>, vector<6x128xf32> -> vector<6x128xf32>
    %12 = arith.addf %6, %11 : vector<6x128xf32>
    %c0_12 = arith.constant 0 : index
    %c1_13 = arith.constant 1 : index
    %c0_14 = arith.constant 0 : index
    %13 = vector.load %arg2[%c0_12, %c1_13, %c0_14] : memref<1x12x128xbf16, #tpu.memory_space<vmem>>, vector<1x6x128xbf16>
    %14 = vector.shape_cast %13 : vector<1x6x128xbf16> to vector<6x128xbf16>
    %c2 = arith.constant 2 : index
    %c0_15 = arith.constant 0 : index
    %c0_16 = arith.constant 0 : index
    %15 = vector.load %arg6[%c2, %c0_15, %c0_16] : memref<9x128x128xbf16, #tpu.memory_space<vmem>>, vector<1x128x128xbf16>
    %16 = vector.shape_cast %15 : vector<1x128x128xbf16> to vector<128x128xbf16>
    %cst_17 = arith.constant dense<0.000000e+00> : vector<6x128xf32>
    %17 = tpu.matmul %14, %16, %cst_17 {dimension_numbers = #tpu.dot_dimension_numbers<[1], [0], [0], [1], [0, 0, 1, 1], [], []>} : vector<6x128xbf16>, vector<128x128xbf16>, vector<6x128xf32> -> vector<6x128xf32>
    %18 = arith.addf %12, %17 : vector<6x128xf32>
    %c0_18 = arith.constant 0 : index
    %c0_19 = arith.constant 0 : index
    %c0_20 = arith.constant 0 : index
    %19 = vector.load %arg4[%c0_18, %c0_19, %c0_20] : memref<1x12x128xbf16, #tpu.memory_space<vmem>>, vector<1x6x128xbf16>
    %20 = vector.shape_cast %19 : vector<1x6x128xbf16> to vector<6x128xbf16>
    %c3 = arith.constant 3 : index
    %c0_21 = arith.constant 0 : index
    %c0_22 = arith.constant 0 : index
    %21 = vector.load %arg6[%c3, %c0_21, %c0_22] : memref<9x128x128xbf16, #tpu.memory_space<vmem>>, vector<1x128x128xbf16>
    %22 = vector.shape_cast %21 : vector<1x128x128xbf16> to vector<128x128xbf16>
    %cst_23 = arith.constant dense<0.000000e+00> : vector<6x128xf32>
    %23 = tpu.matmul %20, %22, %cst_23 {dimension_numbers = #tpu.dot_dimension_numbers<[1], [0], [0], [1], [0, 0, 1, 1], [], []>} : vector<6x128xbf16>, vector<128x128xbf16>, vector<6x128xf32> -> vector<6x128xf32>
    %24 = arith.addf %18, %23 : vector<6x128xf32>
    %c0_24 = arith.constant 0 : index
    %c0_25 = arith.constant 0 : index
    %c0_26 = arith.constant 0 : index
    %25 = vector.load %arg5[%c0_24, %c0_25, %c0_26] : memref<1x12x128xbf16, #tpu.memory_space<vmem>>, vector<1x6x128xbf16>
    %26 = vector.shape_cast %25 : vector<1x6x128xbf16> to vector<6x128xbf16>
    %c4 = arith.constant 4 : index
    %c0_27 = arith.constant 0 : index
    %c0_28 = arith.constant 0 : index
    %27 = vector.load %arg6[%c4, %c0_27, %c0_28] : memref<9x128x128xbf16, #tpu.memory_space<vmem>>, vector<1x128x128xbf16>
    %28 = vector.shape_cast %27 : vector<1x128x128xbf16> to vector<128x128xbf16>
    %cst_29 = arith.constant dense<0.000000e+00> : vector<6x128xf32>
    %29 = tpu.matmul %26, %28, %cst_29 {dimension_numbers = #tpu.dot_dimension_numbers<[1], [0], [0], [1], [0, 0, 1, 1], [], []>} : vector<6x128xbf16>, vector<128x128xbf16>, vector<6x128xf32> -> vector<6x128xf32>
    %30 = arith.addf %24, %29 : vector<6x128xf32>
    %c0_30 = arith.constant 0 : index
    %c1_31 = arith.constant 1 : index
    %c0_32 = arith.constant 0 : index
    %31 = vector.load %arg4[%c0_30, %c1_31, %c0_32] : memref<1x12x128xbf16, #tpu.memory_space<vmem>>, vector<1x6x128xbf16>
    %32 = vector.shape_cast %31 : vector<1x6x128xbf16> to vector<6x128xbf16>
    %c5 = arith.constant 5 : index
    %c0_33 = arith.constant 0 : index
    %c0_34 = arith.constant 0 : index
    %33 = vector.load %arg6[%c5, %c0_33, %c0_34] : memref<9x128x128xbf16, #tpu.memory_space<vmem>>, vector<1x128x128xbf16>
    %34 = vector.shape_cast %33 : vector<1x128x128xbf16> to vector<128x128xbf16>
    %cst_35 = arith.constant dense<0.000000e+00> : vector<6x128xf32>
    %35 = tpu.matmul %32, %34, %cst_35 {dimension_numbers = #tpu.dot_dimension_numbers<[1], [0], [0], [1], [0, 0, 1, 1], [], []>} : vector<6x128xbf16>, vector<128x128xbf16>, vector<6x128xf32> -> vector<6x128xf32>
    %36 = arith.addf %30, %35 : vector<6x128xf32>
    %c0_36 = arith.constant 0 : index
    %c3_37 = arith.constant 3 : index
    %c0_38 = arith.constant 0 : index
    %37 = vector.load %arg2[%c0_36, %c3_37, %c0_38] : memref<1x12x128xbf16, #tpu.memory_space<vmem>>, vector<1x6x128xbf16>
    %38 = vector.shape_cast %37 : vector<1x6x128xbf16> to vector<6x128xbf16>
    %c6 = arith.constant 6 : index
    %c0_39 = arith.constant 0 : index
    %c0_40 = arith.constant 0 : index
    %39 = vector.load %arg6[%c6, %c0_39, %c0_40] : memref<9x128x128xbf16, #tpu.memory_space<vmem>>, vector<1x128x128xbf16>
    %40 = vector.shape_cast %39 : vector<1x128x128xbf16> to vector<128x128xbf16>
    %cst_41 = arith.constant dense<0.000000e+00> : vector<6x128xf32>
    %41 = tpu.matmul %38, %40, %cst_41 {dimension_numbers = #tpu.dot_dimension_numbers<[1], [0], [0], [1], [0, 0, 1, 1], [], []>} : vector<6x128xbf16>, vector<128x128xbf16>, vector<6x128xf32> -> vector<6x128xf32>
    %42 = arith.addf %36, %41 : vector<6x128xf32>
    %c0_42 = arith.constant 0 : index
    %c3_43 = arith.constant 3 : index
    %c0_44 = arith.constant 0 : index
    %43 = vector.load %arg3[%c0_42, %c3_43, %c0_44] : memref<1x12x128xbf16, #tpu.memory_space<vmem>>, vector<1x6x128xbf16>
    %44 = vector.shape_cast %43 : vector<1x6x128xbf16> to vector<6x128xbf16>
    %c7 = arith.constant 7 : index
    %c0_45 = arith.constant 0 : index
    %c0_46 = arith.constant 0 : index
    %45 = vector.load %arg6[%c7, %c0_45, %c0_46] : memref<9x128x128xbf16, #tpu.memory_space<vmem>>, vector<1x128x128xbf16>
    %46 = vector.shape_cast %45 : vector<1x128x128xbf16> to vector<128x128xbf16>
    %cst_47 = arith.constant dense<0.000000e+00> : vector<6x128xf32>
    %47 = tpu.matmul %44, %46, %cst_47 {dimension_numbers = #tpu.dot_dimension_numbers<[1], [0], [0], [1], [0, 0, 1, 1], [], []>} : vector<6x128xbf16>, vector<128x128xbf16>, vector<6x128xf32> -> vector<6x128xf32>
    %48 = arith.addf %42, %47 : vector<6x128xf32>
    %c0_48 = arith.constant 0 : index
    %c4_49 = arith.constant 4 : index
    %c0_50 = arith.constant 0 : index
    %49 = vector.load %arg2[%c0_48, %c4_49, %c0_50] : memref<1x12x128xbf16, #tpu.memory_space<vmem>>, vector<1x6x128xbf16>
    %50 = vector.shape_cast %49 : vector<1x6x128xbf16> to vector<6x128xbf16>
    %c8 = arith.constant 8 : index
    %c0_51 = arith.constant 0 : index
    %c0_52 = arith.constant 0 : index
    %51 = vector.load %arg6[%c8, %c0_51, %c0_52] : memref<9x128x128xbf16, #tpu.memory_space<vmem>>, vector<1x128x128xbf16>
    %52 = vector.shape_cast %51 : vector<1x128x128xbf16> to vector<128x128xbf16>
    %cst_53 = arith.constant dense<0.000000e+00> : vector<6x128xf32>
    %53 = tpu.matmul %50, %52, %cst_53 {dimension_numbers = #tpu.dot_dimension_numbers<[1], [0], [0], [1], [0, 0, 1, 1], [], []>} : vector<6x128xbf16>, vector<128x128xbf16>, vector<6x128xf32> -> vector<6x128xf32>
    %54 = arith.addf %48, %53 : vector<6x128xf32>
    %c0_54 = arith.constant 0 : index
    %c0_55 = arith.constant 0 : index
    %55 = vector.load %arg7[%c0_54, %c0_55] : memref<1x128xf32, #tpu.memory_space<vmem>>, vector<1x128xf32>
    %56 = vector.broadcast %55 : vector<1x128xf32> to vector<6x128xf32>
    %57 = arith.addf %54, %56 : vector<6x128xf32>
    %cst_56 = arith.constant 0.000000e+00 : f32
    %58 = vector.broadcast %cst_56 : f32 to vector<6x128xf32>
    %59 = arith.cmpf oge, %57, %58 : vector<6x128xf32>
    %cst_57 = arith.constant 0.00999999977 : f32
    %60 = vector.broadcast %cst_57 : f32 to vector<6x128xf32>
    %61 = arith.mulf %60, %57 : vector<6x128xf32>
    %62 = arith.select %59, %57, %61 : vector<6x128xi1>, vector<6x128xf32>
    %63 = arith.truncf %62 : vector<6x128xf32> to vector<6x128xbf16>
    %c0_58 = arith.constant 0 : index
    %c0_59 = arith.constant 0 : index
    %c0_60 = arith.constant 0 : index
    %64 = vector.load %arg8[%c0_58, %c0_59, %c0_60] : memref<1x6x128xbf16, #tpu.memory_space<vmem>>, vector<1x6x128xbf16>
    %65 = vector.shape_cast %64 : vector<1x6x128xbf16> to vector<6x128xbf16>
    %66 = vector.shape_cast %63 : vector<6x128xbf16> to vector<1x6x128xbf16>
    tpu.vector_store %arg8[%c0_58, %c0_59, %c0_60], %66 {strides = array<i32>} : memref<1x6x128xbf16, #tpu.memory_space<vmem>>, vector<1x6x128xbf16>,
    return
  }
  func.func @transform_0(%arg0: i32, %arg1: i32) -> (i32, i32, i32) {
    %c0_i32 = arith.constant 0 : i32
    %c0_i32_0 = arith.constant 0 : i32
    %c0_i32_1 = arith.constant 0 : i32
    return %arg0, %c0_i32, %c0_i32_0 : i32, i32, i32
  }
  func.func @transform_1(%arg0: i32, %arg1: i32) -> (i32, i32, i32) {
    %c0_i32 = arith.constant 0 : i32
    %c0_i32_0 = arith.constant 0 : i32
    %c0_i32_1 = arith.constant 0 : i32
    return %arg0, %c0_i32, %c0_i32_0 : i32, i32, i32
  }
  func.func @transform_2(%arg0: i32, %arg1: i32) -> (i32, i32, i32) {
    %c0_i32 = arith.constant 0 : i32
    %c0_i32_0 = arith.constant 0 : i32
    %c0_i32_1 = arith.constant 0 : i32
    return %arg0, %c0_i32, %c0_i32_0 : i32, i32, i32
  }
  func.func @transform_3(%arg0: i32, %arg1: i32) -> (i32, i32, i32) {
    %c0_i32 = arith.constant 0 : i32
    %c0_i32_0 = arith.constant 0 : i32
    %c0_i32_1 = arith.constant 0 : i32
    return %arg0, %c0_i32, %c0_i32_0 : i32, i32, i32
  }
  func.func @transform_4(%arg0: i32, %arg1: i32) -> (i32, i32, i32) {
    %c0_i32 = arith.constant 0 : i32
    %c0_i32_0 = arith.constant 0 : i32
    %c0_i32_1 = arith.constant 0 : i32
    return %c0_i32, %c0_i32_0, %arg1 : i32, i32, i32
  }
  func.func @transform_5(%arg0: i32, %arg1: i32) -> (i32, i32) {
    %c0_i32 = arith.constant 0 : i32
    %c0_i32_0 = arith.constant 0 : i32
    return %c0_i32, %arg1 : i32, i32
  }
  func.func @transform_6(%arg0: i32, %arg1: i32) -> (i32, i32, i32) {
    %c0_i32 = arith.constant 0 : i32
    %c0_i32_0 = arith.constant 0 : i32
    return %arg0, %c0_i32, %arg1 : i32, i32, i32
  }
}

module attributes {stable_mosaic.version = 11 : i64} {
  func.func @_conv3x3_s2_kernel(%arg0: i32, %arg1: i32, %arg2: memref<1x6x128xbf16, #tpu.memory_space<vmem>>, %arg3: memref<1x6x128xbf16, #tpu.memory_space<vmem>>, %arg4: memref<1x6x128xbf16, #tpu.memory_space<vmem>>, %arg5: memref<1x6x128xbf16, #tpu.memory_space<vmem>>, %arg6: memref<9x128x128xbf16, #tpu.memory_space<vmem>>, %arg7: memref<1x128xf32, #tpu.memory_space<vmem>>, %arg8: memref<1x2x128xbf16, #tpu.memory_space<vmem>>) attributes {dimension_semantics = [#tpu.dimension_semantics<parallel>, #tpu.dimension_semantics<parallel>], iteration_bounds = array<i64: 2, 1>, scalar_prefetch = 0 : i64, scratch_operands = 0 : i64, tpu.core_type = #tpu.core_type<tc>, window_params = [{transform_indices = @transform_0, window_bounds = array<i64: 1, 6, 128>}, {transform_indices = @transform_1, window_bounds = array<i64: 1, 6, 128>}, {transform_indices = @transform_2, window_bounds = array<i64: 1, 6, 128>}, {transform_indices = @transform_3, window_bounds = array<i64: 1, 6, 128>}, {transform_indices = @transform_4, window_bounds = array<i64: 9, 128, 128>}, {transform_indices = @transform_5, window_bounds = array<i64: 1, 128>}, {transform_indices = @transform_6, window_bounds = array<i64: 1, 2, 128>}]} {
    %cst = arith.constant 0.000000e+00 : f32
    %0 = vector.broadcast %cst : f32 to vector<2x128xf32>
    %c0 = arith.constant 0 : index
    %c0_0 = arith.constant 0 : index
    %c0_1 = arith.constant 0 : index
    %1 = vector.load %arg2[%c0, %c0_0, %c0_1] : memref<1x6x128xbf16, #tpu.memory_space<vmem>>, vector<1x2x128xbf16>
    %2 = vector.shape_cast %1 : vector<1x2x128xbf16> to vector<2x128xbf16>
    %c0_2 = arith.constant 0 : index
    %c0_3 = arith.constant 0 : index
    %c0_4 = arith.constant 0 : index
    %3 = vector.load %arg6[%c0_2, %c0_3, %c0_4] : memref<9x128x128xbf16, #tpu.memory_space<vmem>>, vector<1x128x128xbf16>
    %4 = vector.shape_cast %3 : vector<1x128x128xbf16> to vector<128x128xbf16>
    %cst_5 = arith.constant dense<0.000000e+00> : vector<2x128xf32>
    %5 = tpu.matmul %2, %4, %cst_5 {dimension_numbers = #tpu.dot_dimension_numbers<[1], [0], [0], [1], [0, 0, 1, 1], [], []>} : vector<2x128xbf16>, vector<128x128xbf16>, vector<2x128xf32> -> vector<2x128xf32>
    %6 = arith.addf %0, %5 : vector<2x128xf32>
    %c0_6 = arith.constant 0 : index
    %c0_7 = arith.constant 0 : index
    %c0_8 = arith.constant 0 : index
    %7 = vector.load %arg3[%c0_6, %c0_7, %c0_8] : memref<1x6x128xbf16, #tpu.memory_space<vmem>>, vector<1x2x128xbf16>
    %8 = vector.shape_cast %7 : vector<1x2x128xbf16> to vector<2x128xbf16>
    %c1 = arith.constant 1 : index
    %c0_9 = arith.constant 0 : index
    %c0_10 = arith.constant 0 : index
    %9 = vector.load %arg6[%c1, %c0_9, %c0_10] : memref<9x128x128xbf16, #tpu.memory_space<vmem>>, vector<1x128x128xbf16>
    %10 = vector.shape_cast %9 : vector<1x128x128xbf16> to vector<128x128xbf16>
    %cst_11 = arith.constant dense<0.000000e+00> : vector<2x128xf32>
    %11 = tpu.matmul %8, %10, %cst_11 {dimension_numbers = #tpu.dot_dimension_numbers<[1], [0], [0], [1], [0, 0, 1, 1], [], []>} : vector<2x128xbf16>, vector<128x128xbf16>, vector<2x128xf32> -> vector<2x128xf32>
    %12 = arith.addf %6, %11 : vector<2x128xf32>
    %c0_12 = arith.constant 0 : index
    %c1_13 = arith.constant 1 : index
    %c0_14 = arith.constant 0 : index
    %13 = vector.load %arg2[%c0_12, %c1_13, %c0_14] : memref<1x6x128xbf16, #tpu.memory_space<vmem>>, vector<1x2x128xbf16>
    %14 = vector.shape_cast %13 : vector<1x2x128xbf16> to vector<2x128xbf16>
    %c2 = arith.constant 2 : index
    %c0_15 = arith.constant 0 : index
    %c0_16 = arith.constant 0 : index
    %15 = vector.load %arg6[%c2, %c0_15, %c0_16] : memref<9x128x128xbf16, #tpu.memory_space<vmem>>, vector<1x128x128xbf16>
    %16 = vector.shape_cast %15 : vector<1x128x128xbf16> to vector<128x128xbf16>
    %cst_17 = arith.constant dense<0.000000e+00> : vector<2x128xf32>
    %17 = tpu.matmul %14, %16, %cst_17 {dimension_numbers = #tpu.dot_dimension_numbers<[1], [0], [0], [1], [0, 0, 1, 1], [], []>} : vector<2x128xbf16>, vector<128x128xbf16>, vector<2x128xf32> -> vector<2x128xf32>
    %18 = arith.addf %12, %17 : vector<2x128xf32>
    %c0_18 = arith.constant 0 : index
    %c0_19 = arith.constant 0 : index
    %c0_20 = arith.constant 0 : index
    %19 = vector.load %arg4[%c0_18, %c0_19, %c0_20] : memref<1x6x128xbf16, #tpu.memory_space<vmem>>, vector<1x2x128xbf16>
    %20 = vector.shape_cast %19 : vector<1x2x128xbf16> to vector<2x128xbf16>
    %c3 = arith.constant 3 : index
    %c0_21 = arith.constant 0 : index
    %c0_22 = arith.constant 0 : index
    %21 = vector.load %arg6[%c3, %c0_21, %c0_22] : memref<9x128x128xbf16, #tpu.memory_space<vmem>>, vector<1x128x128xbf16>
    %22 = vector.shape_cast %21 : vector<1x128x128xbf16> to vector<128x128xbf16>
    %cst_23 = arith.constant dense<0.000000e+00> : vector<2x128xf32>
    %23 = tpu.matmul %20, %22, %cst_23 {dimension_numbers = #tpu.dot_dimension_numbers<[1], [0], [0], [1], [0, 0, 1, 1], [], []>} : vector<2x128xbf16>, vector<128x128xbf16>, vector<2x128xf32> -> vector<2x128xf32>
    %24 = arith.addf %18, %23 : vector<2x128xf32>
    %c0_24 = arith.constant 0 : index
    %c0_25 = arith.constant 0 : index
    %c0_26 = arith.constant 0 : index
    %25 = vector.load %arg5[%c0_24, %c0_25, %c0_26] : memref<1x6x128xbf16, #tpu.memory_space<vmem>>, vector<1x2x128xbf16>
    %26 = vector.shape_cast %25 : vector<1x2x128xbf16> to vector<2x128xbf16>
    %c4 = arith.constant 4 : index
    %c0_27 = arith.constant 0 : index
    %c0_28 = arith.constant 0 : index
    %27 = vector.load %arg6[%c4, %c0_27, %c0_28] : memref<9x128x128xbf16, #tpu.memory_space<vmem>>, vector<1x128x128xbf16>
    %28 = vector.shape_cast %27 : vector<1x128x128xbf16> to vector<128x128xbf16>
    %cst_29 = arith.constant dense<0.000000e+00> : vector<2x128xf32>
    %29 = tpu.matmul %26, %28, %cst_29 {dimension_numbers = #tpu.dot_dimension_numbers<[1], [0], [0], [1], [0, 0, 1, 1], [], []>} : vector<2x128xbf16>, vector<128x128xbf16>, vector<2x128xf32> -> vector<2x128xf32>
    %30 = arith.addf %24, %29 : vector<2x128xf32>
    %c0_30 = arith.constant 0 : index
    %c1_31 = arith.constant 1 : index
    %c0_32 = arith.constant 0 : index
    %31 = vector.load %arg4[%c0_30, %c1_31, %c0_32] : memref<1x6x128xbf16, #tpu.memory_space<vmem>>, vector<1x2x128xbf16>
    %32 = vector.shape_cast %31 : vector<1x2x128xbf16> to vector<2x128xbf16>
    %c5 = arith.constant 5 : index
    %c0_33 = arith.constant 0 : index
    %c0_34 = arith.constant 0 : index
    %33 = vector.load %arg6[%c5, %c0_33, %c0_34] : memref<9x128x128xbf16, #tpu.memory_space<vmem>>, vector<1x128x128xbf16>
    %34 = vector.shape_cast %33 : vector<1x128x128xbf16> to vector<128x128xbf16>
    %cst_35 = arith.constant dense<0.000000e+00> : vector<2x128xf32>
    %35 = tpu.matmul %32, %34, %cst_35 {dimension_numbers = #tpu.dot_dimension_numbers<[1], [0], [0], [1], [0, 0, 1, 1], [], []>} : vector<2x128xbf16>, vector<128x128xbf16>, vector<2x128xf32> -> vector<2x128xf32>
    %36 = arith.addf %30, %35 : vector<2x128xf32>
    %c0_36 = arith.constant 0 : index
    %c2_37 = arith.constant 2 : index
    %c0_38 = arith.constant 0 : index
    %37 = vector.load %arg2[%c0_36, %c2_37, %c0_38] : memref<1x6x128xbf16, #tpu.memory_space<vmem>>, vector<1x2x128xbf16>
    %38 = vector.shape_cast %37 : vector<1x2x128xbf16> to vector<2x128xbf16>
    %c6 = arith.constant 6 : index
    %c0_39 = arith.constant 0 : index
    %c0_40 = arith.constant 0 : index
    %39 = vector.load %arg6[%c6, %c0_39, %c0_40] : memref<9x128x128xbf16, #tpu.memory_space<vmem>>, vector<1x128x128xbf16>
    %40 = vector.shape_cast %39 : vector<1x128x128xbf16> to vector<128x128xbf16>
    %cst_41 = arith.constant dense<0.000000e+00> : vector<2x128xf32>
    %41 = tpu.matmul %38, %40, %cst_41 {dimension_numbers = #tpu.dot_dimension_numbers<[1], [0], [0], [1], [0, 0, 1, 1], [], []>} : vector<2x128xbf16>, vector<128x128xbf16>, vector<2x128xf32> -> vector<2x128xf32>
    %42 = arith.addf %36, %41 : vector<2x128xf32>
    %c0_42 = arith.constant 0 : index
    %c2_43 = arith.constant 2 : index
    %c0_44 = arith.constant 0 : index
    %43 = vector.load %arg3[%c0_42, %c2_43, %c0_44] : memref<1x6x128xbf16, #tpu.memory_space<vmem>>, vector<1x2x128xbf16>
    %44 = vector.shape_cast %43 : vector<1x2x128xbf16> to vector<2x128xbf16>
    %c7 = arith.constant 7 : index
    %c0_45 = arith.constant 0 : index
    %c0_46 = arith.constant 0 : index
    %45 = vector.load %arg6[%c7, %c0_45, %c0_46] : memref<9x128x128xbf16, #tpu.memory_space<vmem>>, vector<1x128x128xbf16>
    %46 = vector.shape_cast %45 : vector<1x128x128xbf16> to vector<128x128xbf16>
    %cst_47 = arith.constant dense<0.000000e+00> : vector<2x128xf32>
    %47 = tpu.matmul %44, %46, %cst_47 {dimension_numbers = #tpu.dot_dimension_numbers<[1], [0], [0], [1], [0, 0, 1, 1], [], []>} : vector<2x128xbf16>, vector<128x128xbf16>, vector<2x128xf32> -> vector<2x128xf32>
    %48 = arith.addf %42, %47 : vector<2x128xf32>
    %c0_48 = arith.constant 0 : index
    %c3_49 = arith.constant 3 : index
    %c0_50 = arith.constant 0 : index
    %49 = vector.load %arg2[%c0_48, %c3_49, %c0_50] : memref<1x6x128xbf16, #tpu.memory_space<vmem>>, vector<1x2x128xbf16>
    %50 = vector.shape_cast %49 : vector<1x2x128xbf16> to vector<2x128xbf16>
    %c8 = arith.constant 8 : index
    %c0_51 = arith.constant 0 : index
    %c0_52 = arith.constant 0 : index
    %51 = vector.load %arg6[%c8, %c0_51, %c0_52] : memref<9x128x128xbf16, #tpu.memory_space<vmem>>, vector<1x128x128xbf16>
    %52 = vector.shape_cast %51 : vector<1x128x128xbf16> to vector<128x128xbf16>
    %cst_53 = arith.constant dense<0.000000e+00> : vector<2x128xf32>
    %53 = tpu.matmul %50, %52, %cst_53 {dimension_numbers = #tpu.dot_dimension_numbers<[1], [0], [0], [1], [0, 0, 1, 1], [], []>} : vector<2x128xbf16>, vector<128x128xbf16>, vector<2x128xf32> -> vector<2x128xf32>
    %54 = arith.addf %48, %53 : vector<2x128xf32>
    %c0_54 = arith.constant 0 : index
    %c0_55 = arith.constant 0 : index
    %55 = vector.load %arg7[%c0_54, %c0_55] : memref<1x128xf32, #tpu.memory_space<vmem>>, vector<1x128xf32>
    %56 = vector.broadcast %55 : vector<1x128xf32> to vector<2x128xf32>
    %57 = arith.addf %54, %56 : vector<2x128xf32>
    %cst_56 = arith.constant 0.000000e+00 : f32
    %58 = vector.broadcast %cst_56 : f32 to vector<2x128xf32>
    %59 = arith.cmpf oge, %57, %58 : vector<2x128xf32>
    %cst_57 = arith.constant 0.00999999977 : f32
    %60 = vector.broadcast %cst_57 : f32 to vector<2x128xf32>
    %61 = arith.mulf %60, %57 : vector<2x128xf32>
    %62 = arith.select %59, %57, %61 : vector<2x128xi1>, vector<2x128xf32>
    %63 = arith.truncf %62 : vector<2x128xf32> to vector<2x128xbf16>
    %c0_58 = arith.constant 0 : index
    %c0_59 = arith.constant 0 : index
    %c0_60 = arith.constant 0 : index
    %64 = vector.load %arg8[%c0_58, %c0_59, %c0_60] : memref<1x2x128xbf16, #tpu.memory_space<vmem>>, vector<1x2x128xbf16>
    %65 = vector.shape_cast %64 : vector<1x2x128xbf16> to vector<2x128xbf16>
    %66 = vector.shape_cast %63 : vector<2x128xbf16> to vector<1x2x128xbf16>
    tpu.vector_store %arg8[%c0_58, %c0_59, %c0_60], %66 {strides = array<i32>} : memref<1x2x128xbf16, #tpu.memory_space<vmem>>, vector<1x2x128xbf16>,
    return
  }
  func.func @transform_0(%arg0: i32, %arg1: i32) -> (i32, i32, i32) {
    %c0_i32 = arith.constant 0 : i32
    %c0_i32_0 = arith.constant 0 : i32
    %c0_i32_1 = arith.constant 0 : i32
    return %arg0, %c0_i32, %c0_i32_0 : i32, i32, i32
  }
  func.func @transform_1(%arg0: i32, %arg1: i32) -> (i32, i32, i32) {
    %c0_i32 = arith.constant 0 : i32
    %c0_i32_0 = arith.constant 0 : i32
    %c0_i32_1 = arith.constant 0 : i32
    return %arg0, %c0_i32, %c0_i32_0 : i32, i32, i32
  }
  func.func @transform_2(%arg0: i32, %arg1: i32) -> (i32, i32, i32) {
    %c0_i32 = arith.constant 0 : i32
    %c0_i32_0 = arith.constant 0 : i32
    %c0_i32_1 = arith.constant 0 : i32
    return %arg0, %c0_i32, %c0_i32_0 : i32, i32, i32
  }
  func.func @transform_3(%arg0: i32, %arg1: i32) -> (i32, i32, i32) {
    %c0_i32 = arith.constant 0 : i32
    %c0_i32_0 = arith.constant 0 : i32
    %c0_i32_1 = arith.constant 0 : i32
    return %arg0, %c0_i32, %c0_i32_0 : i32, i32, i32
  }
  func.func @transform_4(%arg0: i32, %arg1: i32) -> (i32, i32, i32) {
    %c0_i32 = arith.constant 0 : i32
    %c0_i32_0 = arith.constant 0 : i32
    %c0_i32_1 = arith.constant 0 : i32
    return %c0_i32, %c0_i32_0, %arg1 : i32, i32, i32
  }
  func.func @transform_5(%arg0: i32, %arg1: i32) -> (i32, i32) {
    %c0_i32 = arith.constant 0 : i32
    %c0_i32_0 = arith.constant 0 : i32
    return %c0_i32, %arg1 : i32, i32
  }
  func.func @transform_6(%arg0: i32, %arg1: i32) -> (i32, i32, i32) {
    %c0_i32 = arith.constant 0 : i32
    %c0_i32_0 = arith.constant 0 : i32
    return %arg0, %c0_i32, %arg1 : i32, i32, i32
  }
}

module attributes {stable_mosaic.version = 11 : i64} {
  func.func @_pool_linear_kernel(%arg0: i32, %arg1: memref<2x1x128xbf16, #tpu.memory_space<vmem>>, %arg2: memref<128x128xbf16, #tpu.memory_space<vmem>>, %arg3: memref<1x128xf32, #tpu.memory_space<vmem>>, %arg4: memref<2x128xf32, #tpu.memory_space<vmem>>) attributes {dimension_semantics = [#tpu.dimension_semantics<arbitrary>], iteration_bounds = array<i64: 1>, scalar_prefetch = 0 : i64, scratch_operands = 0 : i64, tpu.core_type = #tpu.core_type<tc>, window_params = [{pipeline_mode = #tpu.pipeline_mode<synchronous>, transform_indices = @transform_0, window_bounds = array<i64: 2, 1, 128>}, {pipeline_mode = #tpu.pipeline_mode<synchronous>, transform_indices = @transform_1, window_bounds = array<i64: 128, 128>}, {pipeline_mode = #tpu.pipeline_mode<synchronous>, transform_indices = @transform_2, window_bounds = array<i64: 1, 128>}, {pipeline_mode = #tpu.pipeline_mode<synchronous>, transform_indices = @transform_3, window_bounds = array<i64: 2, 128>}]} {
    %c0 = arith.constant 0 : index
    %c0_0 = arith.constant 0 : index
    %c0_1 = arith.constant 0 : index
    %0 = vector.load %arg1[%c0, %c0_0, %c0_1] : memref<2x1x128xbf16, #tpu.memory_space<vmem>>, vector<2x1x128xbf16>
    %1 = arith.extf %0 : vector<2x1x128xbf16> to vector<2x1x128xf32>
    %cst = arith.constant dense<0.000000e+00> : vector<2x128xf32>
    %2 = vector.multi_reduction <add>, %1, %cst [1] : vector<2x1x128xf32> to vector<2x128xf32>
    %cst_2 = arith.constant 1.000000e+00 : f32
    %3 = vector.broadcast %cst_2 : f32 to vector<2x128xf32>
    %4 = arith.divf %2, %3 : vector<2x128xf32>
    %5 = arith.truncf %4 : vector<2x128xf32> to vector<2x128xbf16>
    %c0_3 = arith.constant 0 : index
    %c0_4 = arith.constant 0 : index
    %6 = vector.load %arg2[%c0_3, %c0_4] : memref<128x128xbf16, #tpu.memory_space<vmem>>, vector<128x128xbf16>
    %cst_5 = arith.constant dense<0.000000e+00> : vector<2x128xf32>
    %7 = tpu.matmul %5, %6, %cst_5 {dimension_numbers = #tpu.dot_dimension_numbers<[1], [0], [0], [1], [0, 0, 1, 1], [], []>} : vector<2x128xbf16>, vector<128x128xbf16>, vector<2x128xf32> -> vector<2x128xf32>
    %c0_6 = arith.constant 0 : index
    %c0_7 = arith.constant 0 : index
    %8 = vector.load %arg3[%c0_6, %c0_7] : memref<1x128xf32, #tpu.memory_space<vmem>>, vector<1x128xf32>
    %9 = vector.broadcast %8 : vector<1x128xf32> to vector<2x128xf32>
    %10 = arith.addf %7, %9 : vector<2x128xf32>
    %c0_8 = arith.constant 0 : index
    %c0_9 = arith.constant 0 : index
    %11 = vector.load %arg4[%c0_8, %c0_9] : memref<2x128xf32, #tpu.memory_space<vmem>>, vector<2x128xf32>
    tpu.vector_store %arg4[%c0_8, %c0_9], %10 {strides = array<i32>} : memref<2x128xf32, #tpu.memory_space<vmem>>, vector<2x128xf32>,
    return
  }
  func.func @transform_0(%arg0: i32) -> (i32, i32, i32) {
    %c0_i32 = arith.constant 0 : i32
    %c0_i32_0 = arith.constant 0 : i32
    %c0_i32_1 = arith.constant 0 : i32
    %c0_i32_2 = arith.constant 0 : i32
    return %c0_i32, %c0_i32_0, %c0_i32_1 : i32, i32, i32
  }
  func.func @transform_1(%arg0: i32) -> (i32, i32) {
    %c0_i32 = arith.constant 0 : i32
    %c0_i32_0 = arith.constant 0 : i32
    %c0_i32_1 = arith.constant 0 : i32
    return %c0_i32, %c0_i32_0 : i32, i32
  }
  func.func @transform_2(%arg0: i32) -> (i32, i32) {
    %c0_i32 = arith.constant 0 : i32
    %c0_i32_0 = arith.constant 0 : i32
    %c0_i32_1 = arith.constant 0 : i32
    return %c0_i32, %c0_i32_0 : i32, i32
  }
  func.func @transform_3(%arg0: i32) -> (i32, i32) {
    %c0_i32 = arith.constant 0 : i32
    %c0_i32_0 = arith.constant 0 : i32
    %c0_i32_1 = arith.constant 0 : i32
    return %c0_i32, %c0_i32_0 : i32, i32
  }
}

</mosaic_0001>

<bundles_post_ra>
// kernel: gradual_style_block_forward.6
= control target key start
LH: loop header
LB: loop body
LE: loop exit
PB: predicated region body
PF: predicated region fallthrough
CT: control target
= control target key end

     0   :  { %s2108_s21 = smov 0   ;;  %s2110_s22 = smov 0   ;;  %s2437_s0 = inlined_call_operand.vmem [shape: bf16[2,30,128], index: 0, kind: input, shape index: {}]   ;;  %s2438_s1 = inlined_call_operand.vmem [shape: bf16[2,30,128], index: 1, kind: input, shape index: {}]   ;;  %s2439_s2 = inlined_call_operand.vmem [shape: bf16[2,30,128], index: 2, kind: input, shape index: {}]   ;;  %s2440_s3 = inlined_call_operand.vmem [shape: bf16[2,30,128], index: 3, kind: input, shape index: {}]   ;;  %s2441_s4 = inlined_call_operand.vmem [shape: bf16[9,128,128], index: 4, kind: input, shape index: {}]   ;;  %s2442_s5 = inlined_call_operand.vmem [shape: f32[1,128], index: 5, kind: input, shape index: {}]   ;;  %s2443_s6 = inlined_call_operand.vmem [shape: bf16[2,20,128], index: 6, kind: output, shape index: {}]  }
   0x1   :  { %s2112_s23 = smov 0  }
   0x2 LB: > { %s28_s24 = sadd.s32 1, %s2067_s22  ;;  %p1471_p0 = scmp.ge.s32.totalorder %s2071_s23, 1  ;;  %s2071_s23 = sphi %s2112_s23, %s16_s23   ;;  %s2067_s22 = sphi %s2110_s22, %s2445_s22   ;;  %s2063_s21 = sphi %s2108_s21, %s2444_s21  }
   0x3   : > { %p30_p1 = scmp.ge.s32.totalorder %s28_s24, 2  ;;  %p273_p2 = scmp.lt.s32.totalorder %s2071_s23, 3 }
   0x5   : > { %s2447_s24 = smov (%p30_p1, %s28_s24), 0  ;;  %p274_p3 = pnand %p1471_p0, %p273_p2 }
   0x6   : > { %p328_p4 = scmp.lt.s32.totalorder (!%p274_p3), %s2063_s21, 1 }
   0x7   : > { %277 = sbr.rel (%p274_p3) target bundleno = 252 (0xfc), region = 44 }
   0xc   : > { %v1948_v0 = vld [vmem:[%s2441_s4 + $0x78] sm:$0xff]  ;;  %v1947_v4 = vld [vmem:[%s2441_s4 + $0x70] sm:$0xff]  ;;  %s2449_s21 = smov (!%p328_p4, %s2063_s21), 1  ;;  %v1946_v8 = vld [vmem:[%s2441_s4 + $0x68] sm:$0xff]  ;;  %vm575_vm0 = vsmask.f32 7424 }
   0xd   : > { %v1939_v1 = vld [vmem:[%s2441_s4 + $0x38] sm:$0xff]  ;;  %460 = vmatpush.bf16.msra.mxu0 %v1948_v0  ;;  %v1938_v5 = vld [vmem:[%s2441_s4 + $0x30] sm:$0xff]  ;;  %v1937_v9 = vld [vmem:[%s2441_s4 + $0x28] sm:$0xff]  ;;  %s2159_s25 = sshll.u32 %s2449_s21, 4  ;;  %vm998_vm1 = vsmask.f32 5376 }
   0xe   : > { %v1956_v2 = vld [vmem:[%s2441_s4 + $0xb8] sm:$0xff]  ;;  %536 = vmatpush.bf16.msra.mxu1 %v1939_v1  ;;  %v1955_v6 = vld [vmem:[%s2441_s4 + $0xb0] sm:$0xff]  ;;  %v1954_v10 = vld [vmem:[%s2441_s4 + $0xa8] sm:$0xff]  ;;  %s2171_s8 = scalar_lea.vmem %s2437_s0, %s2159_s25  ;;  %s2236_s11 = scalar_lea.vmem %s2438_s1, %s2159_s25  ;;  %vm1227_vm2 = vcmask 1044480  }
   0xf   : > { %v1965_v3 = vld [vmem:[%s2441_s4 + $0xf8] sm:$0xff]  ;;  %641 = vmatpush.bf16.msra.mxu2 %v1956_v2  ;;  %v1964_v7 = vld [vmem:[%s2441_s4 + $0xf0] sm:$0xff]  ;;  %v1963_v11 = vld [vmem:[%s2441_s4 + $0xe8] sm:$0xff]  ;;  %s2250_s18 = scalar_lea.vmem %s2439_s2, %s2159_s25  ;;  %s2384_s14 = scalar_lea.vmem %s2440_s3, %s2159_s25 }
  0x10   : > { %740 = vmatpush.bf16.msra.mxu3 %v1965_v3  ;;  %v1945_v12 = vld [vmem:[%s2441_s4 + $0x60] sm:$0xff]  ;;  %v554_v16 = vld [vmem:[%s2171_s8 + $0x8] sm:$0x7]  ;;  %v1944_v17 = vld [vmem:[%s2441_s4 + $0x58] sm:$0xff]  ;;  %s2023_s15 = smul.u32 12, %s2449_s21 }
  0x11   : > { %461 = vmatpush.bf16.msra.mxu0 %v1947_v4  ;;  %v1936_v13 = vld [vmem:[%s2441_s4 + $0x20] sm:$0xff]  ;;  %v1935_v18 = vld [vmem:[%s2441_s4 + $0x18] sm:$0xff]  ;;  %v573_v22 = vunpack.c.l.b16 %v554_v16  ;;  %v1943_v23 = vld [vmem:[%s2441_s4 + $0x50] sm:$0xff] }
  0x12   : > { %537 = vmatpush.bf16.msra.mxu1 %v1938_v5  ;;  %v1953_v14 = vld [vmem:[%s2441_s4 + $0xa0] sm:$0xff]  ;;  %v1952_v19 = vld [vmem:[%s2441_s4 + $0x98] sm:$0xff]  ;;  %v1934_v24 = vld [vmem:[%s2441_s4 + $0x10] sm:$0xff]  ;;  %s362_s19 = scalar_lea.vmem %s2443_s6, %s2023_s15 }
  0x13   : > { %642 = vmatpush.bf16.msra.mxu2 %v1955_v6  ;;  %v1962_v15 = vld [vmem:[%s2441_s4 + $0xe0] sm:$0xff]  ;;  %v1961_v20 = vld [vmem:[%s2441_s4 + $0xd8] sm:$0xff]  ;;  %v1951_v25 = vld [vmem:[%s2441_s4 + $0x90] sm:$0xff]  ;;  %v2211_v27 = vpack.c.b16 %v573_v22, %v573_v22 }
  0x14   : > { %741 = vmatpush.bf16.msra.mxu3 %v1964_v7  ;;  %v1931_v21 = vld [vmem:[%s2171_s8] sm:$0xff]  ;;  %v1960_v26 = vld [vmem:[%s2441_s4 + $0xd0] sm:$0xff]  ;;  %v1942_v29 = vld [vmem:[%s2441_s4 + $0x48] sm:$0xff] }
  0x15   : > { %462 = vmatpush.bf16.msra.mxu0 %v1946_v8  ;;  %v579_v28 = vshll.u32 %v1931_v21, 16  ;;  %v1933_v30 = vld [vmem:[%s2441_s4 + $0x8] sm:$0xff]  ;;  %v577_v33 = vshrl.u32 %v1931_v21, 16  ;;  %v584_v35 = vshll.u32 %v2211_v27, 16  ;;  %v1941_v36 = vld [vmem:[%s2441_s4 + $0x40] sm:$0xff]  ;;  %v1974_v42 = vld [vmem:[%s2441_s4 + $0x138] sm:$0xff] }
  0x16   : > { %538 = vmatpush.bf16.msra.mxu1 %v1937_v9  ;;  %v1950_v31 = vld [vmem:[%s2441_s4 + $0x88] sm:$0xff]  ;;  %v1932_v37 = vld [vmem:[%s2441_s4] sm:$0xff]  ;;  %v1982_v43 = vld [vmem:[%s2441_s4 + $0x178] sm:$0xff]  ;;  %v588_v4 = vshrl.u32 %v2211_v27, 16 }
  0x17   : > { %643 = vmatpush.bf16.msra.mxu2 %v1954_v10  ;;  %v1959_v32 = vld [vmem:[%s2441_s4 + $0xc8] sm:$0xff]  ;;  %v581_v34 = vrot.slane %v579_v28, 1  ;;  %v1949_v38 = vld [vmem:[%s2441_s4 + $0x80] sm:$0xff]  ;;  %v2244_v41 = vrot.slane %v584_v35, 1  ;;  %v1991_v47 = vld [vmem:[%s2441_s4 + $0x1b8] sm:$0xff] }
  0x18   : > { %742 = vmatpush.bf16.msra.mxu3 %v1963_v11  ;;  %v1958_v39 = vld [vmem:[%s2441_s4 + $0xc0] sm:$0xff]  ;;  %v2001_v48 = vld [vmem:[%s2441_s4 + $0x1f8] sm:$0xff]  ;;  %v1973_v49 = vld [vmem:[%s2441_s4 + $0x130] sm:$0xff] }
  0x19   : > { %463 = vmatpush.bf16.msra.mxu0 %v1945_v12  ;;  %v582_v40 = vor.u32 %v581_v34, %v577_v33  ;;  %v1940_v44 = vld [vmem:[%s2236_s11] sm:$0xff]  ;;  %v1981_v50 = vld [vmem:[%s2441_s4 + $0x170] sm:$0xff]  ;;  %v1972_v53 = vld [vmem:[%s2441_s4 + $0x128] sm:$0xff] }
  0x1a   : > { %539 = vmatpush.bf16.msra.mxu1 %v1936_v13  ;;  %v2260_v45 = vld [vmem:[%s2250_s18] sm:$0xff]  ;;  %v1990_v51 = vld [vmem:[%s2441_s4 + $0x1b0] sm:$0xff]  ;;  %v1980_v54 = vld [vmem:[%s2441_s4 + $0x168] sm:$0xff] }
  0x1b   : > { %644 = vmatpush.bf16.msra.mxu2 %v1953_v14  ;;  %v587_v46 = vsel %vm575_vm0, %v582_v40, %v2244_v41  ;;  %v2000_v52 = vld [vmem:[%s2441_s4 + $0x1f0] sm:$0xff]  ;;  %v1989_v55 = vld [vmem:[%s2441_s4 + $0x1a8] sm:$0xff]  ;;  %v967_v60 = vld [vmem:[%s2171_s8] sm:$0xc] }
  0x1c   : > { %743 = vmatpush.bf16.msra.mxu3 %v1962_v15  ;;  %v1999_v56 = vld [vmem:[%s2441_s4 + $0x1e8] sm:$0xff]  ;;  %v2300_v61 = vld [vmem:[%s2171_s8 + $0x4] sm:$0xf]  ;;  %v1970_v5 = vld [vmem:[%s2441_s4 + $0x118] sm:$0xff]  ;;  %v992_v9 = vunpack.c.l.b16 %v967_v60 }
  0x1d   : > { %464 = vmatpush.bf16.msra.mxu0 %v1944_v17  ;;  %v384_v57 = vld [vmem:[%s2236_s11 + $0x8] sm:$0x3]  ;;  %v1971_v62 = vld [vmem:[%s2441_s4 + $0x120] sm:$0xff]  ;;  %v1978_v6 = vld [vmem:[%s2441_s4 + $0x158] sm:$0xff]  ;;  %v993_v10 = vunpack.c.l.b16 %v2300_v61 }
  0x1e   : > { %540 = vmatpush.bf16.msra.mxu1 %v1935_v18  ;;  %v365_v58 = vld [vmem:[%s2171_s8 + $0x8] sm:$0x3]  ;;  %v1979_v63 = vld [vmem:[%s2441_s4 + $0x160] sm:$0xff]  ;;  %v407_v2 = vunpack.c.l.b16 %v384_v57  ;;  %v1983_v12 = vld [vmem:[%s2171_s8 + $0x8] sm:$0x10] }
  0x1f   : > { %645 = vmatpush.bf16.msra.mxu2 %v1952_v19  ;;  %v664_v59 = vld [vmem:[%s2250_s18 + $0x8] sm:$0x3]  ;;  %v1988_v0 = vld [vmem:[%s2441_s4 + $0x1a0] sm:$0xff]  ;;  %v483_v3 = vunpack.c.l.b16 %v365_v58  ;;  %v1993_v16 = vld [vmem:[%s2236_s11 + $0x8] sm:$0x10]  ;;  %v996_v22 = vpack.c.b16 %v993_v10, %v992_v9 }
  0x20   : > { %744 = vmatpush.bf16.msra.mxu3 %v1961_v20  ;;  %v1998_v1 = vld [vmem:[%s2441_s4 + $0x1e0] sm:$0xff]  ;;  %v687_v7 = vunpack.c.l.b16 %v664_v59  ;;  %v860_v8 = vld [vmem:[%s2250_s18 + $0x8] sm:$0x7]  ;;  %v409_v17 = vpack.c.b16 %v407_v2, %v407_v2  ;;  %v590_v20 = vor.u32 %v588_v4, %v2244_v41  ;;  %v1969_v28 = vld [vmem:[%s2441_s4 + $0x110] sm:$0xff] }
  0x21   : > { %465 = vmatpush.bf16.msra.mxu0 %v1943_v23  ;;  %v1787_v11 = vld [vmem:[%s2171_s8 + $0x8] sm:$0xf]  ;;  %v1839_v13 = vld [vmem:[%s2236_s11] sm:$0xc]  ;;  %v1992_v14 = vld [vmem:[%s2236_s11] sm:$0xf0]  ;;  %v485_v18 = vpack.c.b16 %v483_v3, %v483_v3  ;;  %v879_v19 = vunpack.c.l.b16 %v860_v8 }
  0x22   : > { %541 = vmatpush.bf16.msra.mxu1 %v1934_v24  ;;  %v1843_v15 = vld [vmem:[%s2236_s11 + $0x8] sm:$0xf]  ;;  %v2332_v23 = vor.u32 %v1983_v12, %v1787_v11  ;;  %v1987_v24 = vld [vmem:[%s2441_s4 + $0x198] sm:$0xff]  ;;  %v1003_v33 = vshll.u32 %v996_v22, 16  ;;  %v1967_v57 = vld [vmem:[%s2441_s4 + $0x100] sm:$0xff] }
  0x23   : > { %646 = vmatpush.bf16.msra.mxu2 %v1951_v25  ;;  %v1997_v25 = vld [vmem:[%s2441_s4 + $0x1d8] sm:$0xff]  ;;  %v1844_v27 = vor.u32 %v1993_v16, %v1843_v15  ;;  %v1975_v58 = vld [vmem:[%s2441_s4 + $0x140] sm:$0xff]  ;;  %v2008_v9 = vld [vmem:[%s2441_s4 + $0x230] sm:$0xff] }
  0x24   : > { %745 = vmatpush.bf16.msra.mxu3 %v1960_v26  ;;  %v1840_v26 = vor.u32 %v1992_v14, %v1839_v13  ;;  %v1008_v34 = vshrl.u32 %v2332_v23, 16  ;;  %v1011_v35 = vshll.u32 %v2332_v23, 16  ;;  %v2009_v59 = vld [vmem:[%s2441_s4 + $0x238] sm:$0xff]  ;;  %v2007_v11 = vld [vmem:[%s2441_s4 + $0x228] sm:$0xff]  ;;  %v2006_v13 = vld [vmem:[%s2441_s4 + $0x220] sm:$0xff] }
  0x25   : > { %466 = vmatpush.bf16.msra.mxu0 %v1942_v29  ;;  %v1977_v29 = vld [vmem:[%s2441_s4 + $0x150] sm:$0xff]  ;;  %v1127_v40 = vshrl.u32 %v1844_v27, 16  ;;  %v1130_v41 = vshll.u32 %v1844_v27, 16  ;;  %v763_v12 = vld [vmem:[%s2384_s14 + $0x8] sm:$0x3]  ;;  %v2005_v16 = vld [vmem:[%s2441_s4 + $0x218] sm:$0xff] }
  0x26   : > { %542 = vmatpush.bf16.msra.mxu1 %v1933_v30  ;;  %v884_v30 = vshll.u32 %v2260_v45, 16  ;;  %v786_v14 = vunpack.c.l.b16 %v763_v12  ;;  %v1229_v27 = vrot.slane %v2332_v23, 3 }
  0x27   : > { %647 = vmatpush.bf16.msra.mxu2 %v1950_v31  ;;  %v2347_v31 = vpack.c.b16 %v879_v19, %v879_v19  ;;  %v2004_v19 = vld [vmem:[%s2441_s4 + $0x210] sm:$0xff] }
  0x28   : > { %746 = vmatpush.bf16.msra.mxu3 %v1959_v32  ;;  %v1000_v32 = vshrl.u32 %v996_v22, 16  ;;  %v2003_v22 = vld [vmem:[%s2441_s4 + $0x208] sm:$0xff] }
  0x29   : > { %467 = vmatpush.bf16.msra.mxu0 %v1941_v36  ;;  %v1986_v36 = vld [vmem:[%s2441_s4 + $0x190] sm:$0xff]  ;;  %v893_v15 = vshrl.u32 %v2347_v31, 16 }
  0x2a   : > { %543 = vmatpush.bf16.msra.mxu1 %v1932_v37  ;;  %v1996_v37 = vld [vmem:[%s2441_s4 + $0x1d0] sm:$0xff] }
  0x2b   : > { %648 = vmatpush.bf16.msra.mxu2 %v1949_v38  ;;  %v1119_v38 = vshrl.u32 %v1840_v26, 16 }
  0x2c   : > { %747 = vmatpush.bf16.msra.mxu3 %v1958_v39  ;;  %468 = vmatmul.bf16.vlgmr.msra.gmra.mxu0 %v1940_v44  ;;  %v1122_v39 = vshll.u32 %v1840_v26, 16  ;;  %v882_v44 = vshrl.u32 %v2260_v45, 16 }
  0x2d   : > { %839 = vmatpush.bf16.msrb.mxu0 %v1974_v42  ;;  %544 = vmatmul.bf16.vlgmr.msra.gmra.mxu1 %v1931_v21  ;;  %v689_v21 = vpack.c.b16 %v687_v7, %v687_v7  ;;  %v1968_v42 = vld [vmem:[%s2441_s4 + $0x108] sm:$0xff] }
  0x2e   : > { %946 = vmatpush.bf16.msrb.mxu1 %v1982_v43  ;;  %649 = vmatmul.bf16.vlgmr.msra.gmra.mxu2 %v587_v46  ;;  %v1976_v43 = vld [vmem:[%s2441_s4 + $0x148] sm:$0xff]  ;;  %v886_v46 = vrot.slane %v884_v30, 1 }
  0x2f   : > { %748 = vmatmul.bf16.vlgmr.msra.gmra.mxu3 %v2260_v45  ;;  %1066 = vmatpush.bf16.msrb.mxu2 %v1991_v47  ;;  %v889_v47 = vshll.u32 %v2347_v31, 16  ;;  %v1124_v45 = vrot.slane %v1122_v39, 3 }
  0x30   : > { %1185 = vmatpush.bf16.msrb.mxu3 %v2001_v48  ;;  %v1002_v48 = vrot.slane %v1000_v32, 2  ;;  %v887_v60 = vor.u32 %v886_v46, %v882_v44 }
  0x31   : > { %840 = vmatpush.bf16.msrb.mxu0 %v1973_v49  ;;  %v1005_v49 = vrot.slane %v1003_v33, 3 }
  0x32   : > { %947 = vmatpush.bf16.msrb.mxu1 %v1981_v50  ;;  %v1010_v50 = vrot.slane %v1008_v34, 2 }
  0x33   : > { %1067 = vmatpush.bf16.msrb.mxu2 %v1990_v51  ;;  %v1013_v51 = vrot.slane %v1011_v35, 3 }
  0x34   : > { %1186 = vmatpush.bf16.msrb.mxu3 %v2000_v52  ;;  %v1985_v52 = vld [vmem:[%s2441_s4 + $0x188] sm:$0xff] }
  0x35   : > { %841 = vmatpush.bf16.msrb.mxu0 %v1972_v53  ;;  %v1995_v53 = vld [vmem:[%s2441_s4 + $0x1c8] sm:$0xff]  ;;  %v1014_v2 = vor.u32 %v1013_v51, %v1010_v50 }
  0x36   : > { %948 = vmatpush.bf16.msrb.mxu1 %v1980_v54  ;;  %v1121_v54 = vrot.slane %v1119_v38, 2 }
  0x37   : > { %1068 = vmatpush.bf16.msrb.mxu2 %v1989_v55  ;;  %v1129_v55 = vrot.slane %v1127_v40, 2 }
  0x38   : > { %1187 = vmatpush.bf16.msrb.mxu3 %v1999_v56  ;;  %v1132_v56 = vrot.slane %v1130_v41, 3  ;;  %v1125_v3 = vor.u32 %v1124_v45, %v1121_v54 }
  0x39   : > { %842 = vmatpush.bf16.msrb.mxu0 %v1971_v62  ;;  %v891_v62 = vrot.slane %v889_v47, 1 }
  0x3a   : > { %949 = vmatpush.bf16.msrb.mxu1 %v1979_v63  ;;  %v1006_v63 = vor.u32 %v1005_v49, %v1002_v48  ;;  %v1133_v4 = vor.u32 %v1132_v56, %v1129_v55 }
  0x3b   : > { %1069 = vmatpush.bf16.msrb.mxu2 %v1988_v0  ;;  %v1984_v0 = vld [vmem:[%s2441_s4 + $0x180] sm:$0xff] }
  0x3c   : > { %1188 = vmatpush.bf16.msrb.mxu3 %v1998_v1  ;;  %473 = vmatmul.bf16.gmra.mxu0 %v409_v17  ;;  %v1994_v1 = vld [vmem:[%s2441_s4 + $0x1c0] sm:$0xff]  ;;  %v1015_v7 = vsel %vm998_vm1, %v1006_v63, %v1014_v2  ;;  %v1134_v8 = vsel %vm998_vm1, %v1125_v3, %v1133_v4  ;;  %v788_v17 = vpack.c.b16 %v786_v14, %v786_v14 }
  0x3d   : > { %843 = vmatpush.bf16.msrb.mxu0 %v1970_v5  ;;  %549 = vmatmul.bf16.gmra.mxu1 %v485_v18  ;;  %v1966_v5 = vld [vmem:[%s2384_s14] sm:$0xff]  ;;  %v895_v18 = vor.u32 %v893_v15, %v891_v62 }
  0x3e   : > { %950 = vmatpush.bf16.msrb.mxu1 %v1978_v6  ;;  %654 = vmatmul.bf16.gmra.mxu2 %v590_v20  ;;  %v892_v6 = vsel %vm575_vm0, %v887_v60, %v891_v62  ;;  %v1206_v20 = vld [vmem:[%s2171_s8] sm:$0x8] }
  0x3f   : > { %753 = vmatmul.bf16.gmra.mxu3 %v689_v21  ;;  %1070 = vmatpush.bf16.msrb.mxu2 %v1987_v24  ;;  %v1225_v21 = vunpack.c.l.b16 %v1206_v20 }
  0x40   : > { %1189 = vmatpush.bf16.msrb.mxu3 %v1997_v25  ;;  %v2002_v25 = vld [vmem:[%s2441_s4 + $0x200] sm:$0xff] }
  0x41   : > { %844 = vmatpush.bf16.msrb.mxu0 %v1969_v28  ;;  %v1226_v24 = vpack.c.b16 %v993_v10, %v1225_v21 }
  0x42   : > { %951 = vmatpush.bf16.msrb.mxu1 %v1977_v29 }
  0x43   : > { %1071 = vmatpush.bf16.msrb.mxu2 %v1986_v36  ;;  %v1228_v26 = vrot.slane %v1226_v24, 3 }
  0x44   : > { %1190 = vmatpush.bf16.msrb.mxu3 %v1996_v37 }
  0x45   : > { %845 = vmatpush.bf16.msrb.mxu0 %v1968_v42  ;;  %v1230_v28 = vsel %vm1227_vm2, %v1228_v26, %v1229_v27 }
  0x46   : > { %952 = vmatpush.bf16.msrb.mxu1 %v1976_v43 }
  0x47   : > { %1072 = vmatpush.bf16.msrb.mxu2 %v1985_v52 }
  0x48   : > { %1191 = vmatpush.bf16.msrb.mxu3 %v1995_v53 }
  0x49   : > { %846 = vmatpush.bf16.msrb.mxu0 %v1967_v57 }
  0x4a   : > { %953 = vmatpush.bf16.msrb.mxu1 %v1975_v58 }
  0x4b   : > { %1073 = vmatpush.bf16.msrb.mxu2 %v1984_v0 }
  0x4c   : > { %1192 = vmatpush.bf16.msrb.mxu3 %v1994_v1  ;;  %847 = vmatmul.bf16.vlgmr.msrb.gmra.mxu0 %v1966_v5 }
  0x4d   : > { %1281 = vmatpush.bf16.msra.mxu0 %v2009_v59  ;;  %954 = vmatmul.bf16.vlgmr.msrb.gmra.mxu1 %v892_v6 }
  0x4e   : > { %2015 = vmatpush.bf16.msra.mxu1 %v2009_v59  ;;  %1074 = vmatmul.bf16.vlgmr.msrb.gmra.mxu2 %v1015_v7 }
  0x4f   : > { %1193 = vmatmul.bf16.vlgmr.msrb.gmra.mxu3 %v1134_v8 }
  0x51   : > { %1282 = vmatpush.bf16.msra.mxu0 %v2008_v9 }
  0x52   : > { %2016 = vmatpush.bf16.msra.mxu1 %v2008_v9 }
  0x55   : > { %1283 = vmatpush.bf16.msra.mxu0 %v2007_v11 }
  0x56   : > { %2017 = vmatpush.bf16.msra.mxu1 %v2007_v11  ;;  %v2048_v11 = vld [vmem:[%s2442_s5] ss:$0 sm:$0xff] }
  0x59   : > { %1284 = vmatpush.bf16.msra.mxu0 %v2006_v13 }
  0x5a   : > { %2018 = vmatpush.bf16.msra.mxu1 %v2006_v13 }
  0x5c   : > { %852 = vmatmul.bf16.gmra.mxu0 %v788_v17 }
  0x5d   : > { %1285 = vmatpush.bf16.msra.mxu0 %v2005_v16  ;;  %959 = vmatmul.bf16.gmra.mxu1 %v895_v18 }
  0x5e   : > { %2019 = vmatpush.bf16.msra.mxu1 %v2005_v16  ;;  %1079 = vmatmul.bf16.gmra.mxu2 %v1014_v2 }
  0x5f   : > { %1198 = vmatmul.bf16.gmra.mxu3 %v1133_v4 }
  0x61   : > { %1286 = vmatpush.bf16.msra.mxu0 %v2004_v19 }
  0x62   : > { %2020 = vmatpush.bf16.msra.mxu1 %v2004_v19 }
  0x65   : > { %1287 = vmatpush.bf16.msra.mxu0 %v2003_v22 }
  0x66   : > { %2021 = vmatpush.bf16.msra.mxu1 %v2003_v22 }
  0x69   : > { %1288 = vmatpush.bf16.msra.mxu0 %v2002_v25 }
  0x6a   : > { %2022 = vmatpush.bf16.msra.mxu1 %v2002_v25 }
  0x6c   : > { %1289 = vmatmul.bf16.vlgmr.msra.gmra.mxu0 %v1230_v28 }
  0x6d   : > { %1294 = vmatmul.bf16.vlgmr.msra.gmra.mxu1 %v1229_v27 }
  0xa9   : > { %v469_v29 = vpop.f32.mrf.mxu0 }
  0xaa   : > { %v545_v30 = vpop.f32.mrf.mxu1 }
  0xab   : > { %v546_v50 = vadd.f32 %v545_v30, %v469_v29 }
  0xb1   : > { %v650_v31 = vpop.f32.mrf.mxu2  ;;  %v471_v10 = vpop.f32.mrf.mxu0 }
  0xb2   : > { %v749_v61 = vpop.f32.mrf.mxu3  ;;  %v547_v32 = vpop.f32.mrf.mxu1  ;;  %v659_v55 = vadd.f32 %v650_v31, %v546_v50 }
  0xb3   : > { %v548_v57 = vadd.f32 %v547_v32, %v471_v10 }
  0xb4   : > { %v758_v58 = vadd.f32 %v749_v61, %v659_v55 }
  0xb9   : > { %v652_v33 = vpop.f32.mrf.mxu2  ;;  %v474_v35 = vpop.f32.mrf.mxu0 }
  0xba   : > { %v751_v34 = vpop.f32.mrf.mxu3  ;;  %v550_v36 = vpop.f32.mrf.mxu1  ;;  %v660_v60 = vadd.f32 %v652_v33, %v548_v57 }
  0xbb   : > { %v551_v49 = vadd.f32 %v550_v36, %v474_v35 }
  0xbc   : > { %v759_v4 = vadd.f32 %v751_v34, %v660_v60 }
  0xc1   : > { %v655_v37 = vpop.f32.mrf.mxu2  ;;  %v476_v39 = vpop.f32.mrf.mxu0 }
  0xc2   : > { %v754_v38 = vpop.f32.mrf.mxu3  ;;  %v552_v23 = vpop.f32.mrf.mxu1  ;;  %v661_v51 = vadd.f32 %v655_v37, %v551_v49 }
  0xc4   : > { %v760_v56 = vadd.f32 %v754_v38, %v661_v51 }
  0xc9   : > { %v657_v40 = vpop.f32.mrf.mxu2  ;;  %v848_v42 = vpop.f32.mrf.mxu0 }
  0xca   : > { %v756_v41 = vpop.f32.mrf.mxu3  ;;  %v955_v43 = vpop.f32.mrf.mxu1  ;;  %v857_v62 = vadd.f32 %v848_v42, %v758_v58 }
  0xcc   : > { %v964_v5 = vadd.f32 %v955_v43, %v857_v62 }
  0xd1   : > { %v1075_v44 = vpop.f32.mrf.mxu2  ;;  %v850_v47 = vpop.f32.mrf.mxu0 }
  0xd2   : > { %v1194_v46 = vpop.f32.mrf.mxu3  ;;  %v957_v48 = vpop.f32.mrf.mxu1  ;;  %v1084_v7 = vadd.f32 %v1075_v44, %v964_v5  ;;  %v858_v8 = vadd.f32 %v850_v47, %v759_v4 }
  0xd4   : > { %v965_v16 = vadd.f32 %v957_v48, %v858_v8  ;;  %v1203_v17 = vadd.f32 %v1194_v46, %v1084_v7 }
  0xd9   : > { %v1077_v52 = vpop.f32.mrf.mxu2  ;;  %v853_v54 = vpop.f32.mrf.mxu0 }
  0xda   : > { %v1196_v53 = vpop.f32.mrf.mxu3  ;;  %v960_v45 = vpop.f32.mrf.mxu1  ;;  %v859_v59 = vadd.f32 %v853_v54, %v760_v56  ;;  %v1085_v19 = vadd.f32 %v1077_v52, %v965_v16 }
  0xdc   : > { %v966_v3 = vadd.f32 %v960_v45, %v859_v59  ;;  %v1204_v24 = vadd.f32 %v1196_v53, %v1085_v19 }
  0xe1   : > { %v1080_v63 = vpop.f32.mrf.mxu2  ;;  %v855_v1 = vpop.f32.mrf.mxu0 }
  0xe2   : > { %v1199_v0 = vpop.f32.mrf.mxu3  ;;  %v962_v2 = vpop.f32.mrf.mxu1  ;;  %v1086_v6 = vadd.f32 %v1080_v63, %v966_v3 }
  0xe4   : > { %v1205_v9 = vadd.f32 %v1199_v0, %v1086_v6 }
  0xe9   : > { %v1082_v12 = vpop.f32.mrf.mxu2  ;;  %v1290_v14 = vpop.f32.mrf.mxu0 }
  0xea   : > { %v1201_v13 = vpop.f32.mrf.mxu3  ;;  %v1295_v15 = vpop.f32.mrf.mxu1  ;;  %v1299_v20 = vadd.f32 %v1290_v14, %v1203_v17 }
  0xeb   : > { %v1301_v18 = vadd.f32 %v1295_v15, %v1205_v9 }
  0xec   : > { %v1306_v25 = vadd.f32 %v2048_v11, %v1299_v20 }
  0xed   : > { %v1308_v21 = vadd.f32 %v2048_v11, %v1301_v18 }
  0xee   : > { %v1312_v31 = vmul.f32 0.01, %v1306_v25  ;;  %vm1309_vm4 = vcmp.ge.f32.partialorder %v1306_v25, 0.0 }
  0xef   : > { %vm1311_vm3 = vcmp.ge.f32.partialorder %v1308_v21, 0.0  ;;  %v1314_v22 = vmul.f32 0.01, %v1308_v21 }
  0xf0   : > { %v1315_v32 = vsel %vm1309_vm4, %v1306_v25, %v1312_v31 }
  0xf1   : > { %v1317_v26 = vsel %vm1311_vm3, %v1308_v21, %v1314_v22  ;;  %v1292_v28 = vpop.f32.mrf.mxu0 }
  0xf2   : > { %v1320_v27 = vpack.c.bf16 %v1317_v26, %v1317_v26  ;;  %v1297_v29 = vpop.f32.mrf.mxu1  ;;  %v1300_v30 = vadd.f32 %v1292_v28, %v1204_v24 }
  0xf4   : > { %1323 = vst [vmem:[%s362_s19 + $0x8] sm:$0x3] %v1320_v27  ;;  %v1307_v61 = vadd.f32 %v2048_v11, %v1300_v30 }
  0xf6   : > { %vm1310_vm5 = vcmp.ge.f32.partialorder %v1307_v61, 0.0  ;;  %v1313_v10 = vmul.f32 0.01, %v1307_v61 }
  0xf8   : > { %v1316_v33 = vsel %vm1310_vm5, %v1307_v61, %v1313_v10 }
  0xf9   : > { %v2013_v34 = vpack.c.bf16 %v1316_v33, %v1315_v32 }
  0xfb   : > { %2014 = vst [vmem:[%s362_s19] sm:$0xff] %v2013_v34  }
  0xfc PF: > { %s16_s23 = sadd.s32 1, %s2071_s23   ;;  %s2444_s21 = smov %s2067_s22 }
  0xfd   : > { %p13_p5 = scmp.ge.s32.totalorder %s16_s23, 4   ;;  %s2445_s22 = smov %s2447_s24 }
  0xff   :  { %15 = sbr.rel (!%p13_p5) target bundleno = 2 (0x2), region = 97 }

// kernel: gradual_style_block_forward.5
= control target key start
LH: loop header
LB: loop body
LE: loop exit
PB: predicated region body
PF: predicated region fallthrough
CT: control target
= control target key end

     0   :  { %s1900_s21 = smov 0   ;;  %s1902_s22 = smov 0   ;;  %s2174_s0 = inlined_call_operand.vmem [shape: bf16[2,90,4], index: 0, kind: input, shape index: {}]   ;;  %s2175_s1 = inlined_call_operand.vmem [shape: bf16[2,90,4], index: 1, kind: input, shape index: {}]   ;;  %s2176_s2 = inlined_call_operand.vmem [shape: bf16[2,90,4], index: 2, kind: input, shape index: {}]   ;;  %s2177_s3 = inlined_call_operand.vmem [shape: bf16[2,90,4], index: 3, kind: input, shape index: {}]   ;;  %s2178_s4 = inlined_call_operand.vmem [shape: bf16[9,4,128], index: 4, kind: input, shape index: {}]   ;;  %s2179_s5 = inlined_call_operand.vmem [shape: f32[1,128], index: 5, kind: input, shape index: {}]   ;;  %s2180_s6 = inlined_call_operand.vmem [shape: bf16[2,72,128], index: 6, kind: output, shape index: {}]  }
   0x1   :  { %s1904_s23 = smov 0  }
   0x2 LB: > { %s28_s24 = sadd.s32 1, %s1859_s22  ;;  %p1549_p0 = scmp.ge.s32.totalorder %s1863_s23, 1  ;;  %s1863_s23 = sphi %s1904_s23, %s16_s23   ;;  %s1859_s22 = sphi %s1902_s22, %s2182_s22   ;;  %s1855_s21 = sphi %s1900_s21, %s2181_s21  }
   0x3   : > { %p30_p1 = scmp.ge.s32.totalorder %s28_s24, 2  ;;  %p273_p2 = scmp.lt.s32.totalorder %s1863_s23, 3 }
   0x5   : > { %s2184_s24 = smov (%p30_p1, %s28_s24), 0  ;;  %p274_p3 = pnand %p1549_p0, %p273_p2 }
   0x6   : > { %p328_p4 = scmp.lt.s32.totalorder (!%p274_p3), %s1855_s21, 1 }
   0x7   : > { %277 = sbr.rel (%p274_p3) target bundleno = 342 (0x156), region = 44 }
   0xc   : > { %v1555_v0 = vld [vmem:[%s2178_s4 + $0x2] sm:$0x3]  ;;  %vm424_vm0 = vcmask 1041408   ;;  %v1598_v2 = vld [vmem:[%s2178_s4 + $0x4] sm:$0x3]  ;;  %s2186_s21 = smov (!%p328_p4, %s1855_s21), 1 }
   0xd   : > { %v426_v1 = vsel %vm424_vm0, %v1555_v0, 0  ;;  %v373_v3 = vld [vmem:[%s2178_s4] sm:$0x3]  ;;  %v628_v4 = vsel %vm424_vm0, %v1598_v2, 0  ;;  %v1624_v6 = vld [vmem:[%s2178_s4 + $0x6] sm:$0x3] }
   0xe   : > { %1808 = vmatpush.bf16.msra.mxu1 %v426_v1  ;;  %1809 = vmatpush.bf16.msra.mxu2 %v426_v1  ;;  %v500_v5 = vsel %vm424_vm0, %v373_v3, 0  ;;  %v722_v7 = vsel %vm424_vm0, %v1624_v6, 0  ;;  %v1646_v8 = vld [vmem:[%s2178_s4 + $0x8] sm:$0x3]  ;;  %s1940_s11 = smul.u32 48, %s2186_s21  ;;  %vm408_vm1 = vcmask 31744  }
   0xf   : > { %1810 = vmatpush.bf16.msra.mxu3 %v426_v1  ;;  %435 = vmatpush.bf16.msra.mxu0 %v426_v1  ;;  %v816_v9 = vsel %vm424_vm0, %v1646_v8, 0  ;;  %v1694_v16 = vld [vmem:[%s2178_s4 + $0xc] sm:$0x3]  ;;  %v1716_v18 = vld [vmem:[%s2178_s4 + $0xe] sm:$0x3]  ;;  %vm1274_vm3 = vcmask 1046528  }
  0x10   : > { %s1947_s14 = scalar_lea.vmem %s2175_s1, %s1940_s11  ;;  %v1088_v17 = vsel %vm424_vm0, %v1694_v16, 0  ;;  %v1224_v19 = vsel %vm424_vm0, %v1716_v18, 0  ;;  %v1668_v20 = vld [vmem:[%s2178_s4 + $0xa] sm:$0x3]  ;;  %v1742_v21 = vld [vmem:[%s2178_s4 + $0x10] sm:$0x3]  ;;  %s1977_s29 = scalar_lea.vmem %s2174_s0, %s1940_s11 }
  0x11   : > { %v1755_v10 = vld [vmem:[%s1947_s14 + $0x8] sm:$0xff]  ;;  %v1756_v11 = vld [vmem:[%s1947_s14 + $0x10] sm:$0xff]  ;;  %v382_v12 = vld [vmem:[%s1947_s14 + $0x20] sm:$0xf]  ;;  %v952_v22 = vsel %vm424_vm0, %v1668_v20, 0  ;;  %v1300_v23 = vsel %vm424_vm0, %v1742_v21, 0  ;;  %s1983_s8 = scalar_lea.vmem %s2177_s3, %s1940_s11  ;;  %s1991_s12 = scalar_lea.vmem %s2176_s2, %s1940_s11 }
  0x12   : > { %637 = vmatpush.bf16.msrb.mxu2 %v628_v4  ;;  %509 = vmatpush.bf16.msrb.mxu1 %v500_v5  ;;  %v402_v13 = vunpack.c.l.b16 %v382_v12  ;;  %v1754_v14 = vld [vmem:[%s1947_s14] sm:$0xff]  ;;  %v1757_v24 = vld [vmem:[%s1947_s14 + $0x18] sm:$0xff]  ;;  %v1759_v29 = vld [vmem:[%s1977_s29 + $0x8] sm:$0xff]  ;;  %vm572_vm2 = vsmask.f32 7424 }
  0x13   : > { %731 = vmatpush.bf16.msrb.mxu3 %v722_v7  ;;  %825 = vmatpush.bf16.msrb.mxu0 %v816_v9  ;;  %v1750_v25 = vld [vmem:[%s1977_s29] sm:$0xff]  ;;  %v581_v33 = vshll.u32 %v1759_v29, 16  ;;  %v1751_v36 = vld [vmem:[%s1977_s29 + $0x8] sm:$0xff]  ;;  %v1760_v40 = vld [vmem:[%s1977_s29 + $0x10] sm:$0xff]  ;;  %v585_v41 = vshrl.u32 %v1759_v29, 16 }
  0x14   : > { %1573 = vmatmul.msk.bf16.vlgmr.msra.gmra.mxu1 %vm408_vm1, %v1755_v10  ;;  %1574 = vmatmul.msk.bf16.vlgmr.msra.gmra.mxu2 %vm408_vm1, %v1756_v11  ;;  %v407_v15 = vpack.c.b16 %v402_v13, %v402_v13  ;;  %v1758_v26 = vld [vmem:[%s1977_s29] sm:$0xff]  ;;  %v1768_v38 = vld [vmem:[%s1983_s8 + $0x8] sm:$0xff]  ;;  %v589_v42 = vshll.u32 %v1760_v40, 16  ;;  %v1752_v45 = vld [vmem:[%s1977_s29 + $0x10] sm:$0xff]  ;;  %v593_v50 = vshrl.u32 %v1760_v40, 16 }
  0x15   : > { %1572 = vmatmul.msk.bf16.vlgmr.msra.gmra.mxu0 %vm408_vm1, %v1754_v14  ;;  %v1767_v27 = vld [vmem:[%s1983_s8] sm:$0xff]  ;;  %v576_v30 = vshll.u32 %v1758_v26, 16  ;;  %v574_v31 = vshrl.u32 %v1758_v26, 16  ;;  %v583_v35 = vrot.slane %v581_v33, 1  ;;  %v1764_v39 = vld [vmem:[%s1991_s12 + $0x8] sm:$0xff]  ;;  %v1769_v47 = vld [vmem:[%s1983_s8 + $0x10] sm:$0xff] }
  0x16   : > { %1576 = vmatmul.msk.bf16.vlgmr.msra.gmra.mxu3 %vm408_vm1, %v407_v15  ;;  %1097 = vmatpush.bf16.msra.mxu2 %v1088_v17  ;;  %v1763_v28 = vld [vmem:[%s1991_s12] sm:$0xff]  ;;  %v591_v44 = vrot.slane %v589_v42, 1  ;;  %v1765_v48 = vld [vmem:[%s1991_s12 + $0x10] sm:$0xff]  ;;  %v1761_v49 = vld [vmem:[%s1977_s29 + $0x18] sm:$0xff] }
  0x17   : > { %1233 = vmatpush.bf16.msra.mxu3 %v1224_v19  ;;  %961 = vmatpush.bf16.msra.mxu1 %v952_v22  ;;  %v578_v32 = vrot.slane %v576_v30, 1  ;;  %v587_v43 = vor.u32 %v585_v41, %v583_v35  ;;  %v597_v51 = vshll.u32 %v1761_v49, 16  ;;  %v1753_v54 = vld [vmem:[%s1977_s29 + $0x18] sm:$0xff]  ;;  %v1617_v57 = vld [vmem:[%s1977_s29 + $0x20] sm:$0xf]  ;;  %v601_v62 = vshrl.u32 %v1761_v49, 16 }
  0x18   : > { %1309 = vmatpush.bf16.msra.mxu0 %v1300_v23  ;;  %v595_v52 = vor.u32 %v593_v50, %v591_v44  ;;  %v1770_v56 = vld [vmem:[%s1983_s8 + $0x18] sm:$0xff]  ;;  %v1762_v58 = vld [vmem:[%s1977_s29 + $0x20] sm:$0x10]  ;;  %v372_v61 = vld [vmem:[%s1977_s29 + $0x20] sm:$0xf] }
  0x19   : > { %v579_v34 = vor.u32 %v578_v32, %v574_v31  ;;  %v592_v46 = vsel %vm572_vm2, %v587_v43, %v591_v44  ;;  %v599_v53 = vrot.slane %v597_v51, 1  ;;  %v1766_v59 = vld [vmem:[%s1991_s12 + $0x18] sm:$0xff]  ;;  %v1618_v60 = vor.u32 %v1762_v58, %v1617_v57  ;;  %v774_v0 = vld [vmem:[%s1983_s8 + $0x20] sm:$0xf]  ;;  %v1851_v12 = vld [vmem:[%s1977_s29 + $0x4] sm:$0xe] }
  0x1a   : > { %v478_v1 = vunpack.c.l.b16 %v372_v61  ;;  %v680_v2 = vld [vmem:[%s1991_s12 + $0x20] sm:$0xf]  ;;  %v794_v5 = vunpack.c.l.b16 %v774_v0  ;;  %v1780_v13 = vld [vmem:[%s1947_s14 + $0x4] sm:$0xff]  ;;  %v1781_v18 = vld [vmem:[%s1947_s14 + $0xc] sm:$0xff] }
  0x1b   : > { %v584_v37 = vsel %vm572_vm2, %v579_v34, %v583_v35  ;;  %v600_v55 = vsel %vm572_vm2, %v595_v52, %v599_v53  ;;  %v605_v63 = vshll.u32 %v1618_v60, 16  ;;  %v603_v3 = vor.u32 %v601_v62, %v599_v53  ;;  %v1771_v9 = vld [vmem:[%s1991_s12] sm:$0xff]  ;;  %v1772_v14 = vld [vmem:[%s1991_s12 + $0x8] sm:$0xff]  ;;  %v1782_v42 = vld [vmem:[%s1947_s14 + $0x14] sm:$0xff] }
  0x1c   : > { %v700_v6 = vunpack.c.l.b16 %v680_v2  ;;  %v483_v7 = vpack.c.b16 %v478_v1, %v478_v1  ;;  %v799_v10 = vpack.c.b16 %v794_v5, %v794_v5  ;;  %v900_v15 = vshll.u32 %v1771_v9, 16  ;;  %v996_v16 = vld [vmem:[%s1977_s29 + $0x4] sm:$0xff]   ;;  %v2055_v49 = vld [vmem:[%s1977_s29 + $0x14] sm:$0xff]  ;;  %v1783_v62 = vld [vmem:[%s1947_s14 + $0x1c] sm:$0xff] }
  0x1d   : > { %v607_v4 = vrot.slane %v605_v63, 1  ;;  %v1850_v17 = vld [vmem:[%s1977_s29 + $0x4] sm:$0xf0]  ;;  %v1172_v19 = vshll.u32 %v1780_v13, 16  ;;  %v898_v20 = vshrl.u32 %v1771_v9, 16  ;;  %v905_v22 = vshll.u32 %v1772_v14, 16 }
  0x1e   : > { %v705_v11 = vpack.c.b16 %v700_v6, %v700_v6  ;;  %v902_v21 = vrot.slane %v900_v15, 1  ;;  %v1852_v23 = vor.u32 %v1851_v12, %v1850_v17  ;;  %v1036_v40 = vshll.u32 %v996_v16, 16  ;;  %v1774_v61 = vld [vmem:[%s1991_s12 + $0x18] sm:$0xff]  ;;  %v1775_v17 = vld [vmem:[%s1991_s12 + $0x20] sm:$0x10] }
  0x1f   : > { %v608_v8 = vsel %vm572_vm2, %v603_v3, %v607_v4  ;;  %v1174_v26 = vrot.slane %v1172_v19, 1  ;;  %v907_v30 = vrot.slane %v905_v22, 1  ;;  %v909_v41 = vshrl.u32 %v1772_v14, 16  ;;  %v2070_v5 = vld [vmem:[%s1977_s29 + $0x1c] sm:$0xff]  ;;  %v1735_v22 = vld [vmem:[%s1947_s14 + $0x24] sm:$0xf] }
  0x20   : > { %v903_v29 = vor.u32 %v902_v21, %v898_v20  ;;  %v1275_v31 = vrot.slane %v1852_v23, 1  ;;  %v1034_v44 = vshrl.u32 %v996_v16, 16  ;;  %v921_v0 = vshll.u32 %v1774_v61, 16  ;;  %v1687_v16 = vld [vmem:[%s1991_s12 + $0x20] sm:$0xf] }
  0x21   : > { %v911_v50 = vor.u32 %v909_v41, %v907_v30  ;;  %v1049_v2 = vshll.u32 %v2055_v49, 16  ;;  %v1189_v3 = vshrl.u32 %v1782_v42, 16  ;;  %v1688_v21 = vor.u32 %v1775_v17, %v1687_v16  ;;  %v1784_v23 = vld [vmem:[%s1947_s14 + $0x24] sm:$0x10]  ;;  %s1812_s14 = smul.u32 36, %s2186_s21 }
  0x23   : > { %v1051_v9 = vrot.slane %v1049_v2, 1  ;;  %s2145_s17 = scalar_lea.vmem %s2180_s6, %s1812_s14 }
  0x24   : > { %1575 = vmatmul.msk.bf16.gmra.mxu2 %vm408_vm1, %v1757_v24  ;;  %1593 = vmatmul.msk.bf16.vlgmr.msrb.gmra.mxu1 %vm408_vm1, %v1750_v25  ;;  %v609_v24 = vshrl.u32 %v1618_v60, 16  ;;  %v1170_v25 = vshrl.u32 %v1780_v13, 16 }
  0x25   : > { %1663 = vmatmul.msk.bf16.vlgmr.msrb.gmra.mxu0 %vm408_vm1, %v1767_v27  ;;  %v1177_v27 = vshll.u32 %v1781_v18, 16 }
  0x26   : > { %1641 = vmatmul.msk.bf16.vlgmr.msrb.gmra.mxu3 %vm408_vm1, %v1763_v28  ;;  %v1776_v28 = vld [vmem:[%s1977_s29 + $0xc] sm:$0xff]  ;;  %v611_v33 = vor.u32 %v609_v24, %v607_v4  ;;  %v1175_v34 = vor.u32 %v1174_v26, %v1170_v25  ;;  %v1193_v4 = vshll.u32 %v1783_v62, 16  ;;  %v925_v25 = vshrl.u32 %v1774_v61, 16 }
  0x27   : > { %v1276_v32 = vrot.slane %v1776_v28, 1  ;;  %v1179_v35 = vrot.slane %v1177_v27, 1  ;;  %v1045_v1 = vshrl.u32 %v1776_v28, 16  ;;  %v929_v26 = vshll.u32 %v1688_v21, 16 }
  0x28   : > { %v1195_v12 = vrot.slane %v1193_v4, 1  ;;  %v1736_v27 = vor.u32 %v1784_v23, %v1735_v22  ;;  %v933_v61 = vshrl.u32 %v1688_v21, 16 }
  0x34   : > { %1594 = vmatmul.msk.bf16.gmra.mxu1 %vm408_vm1, %v1751_v36  ;;  %1619 = vmatmul.msk.bf16.vlgmr.msrb.gmra.mxu2 %vm408_vm1, %v584_v37  ;;  %v908_v36 = vsel %vm572_vm2, %v903_v29, %v907_v30  ;;  %v1277_v37 = vsel %vm1274_vm3, %v1275_v31, %v1276_v32  ;;  %v1053_v29 = vshrl.u32 %v2055_v49, 16  ;;  %v1057_v30 = vshll.u32 %v2070_v5, 16  ;;  %v1709_v31 = vld [vmem:[%s1977_s29 + $0x24] sm:$0xf] }
  0x35   : > { %1664 = vmatmul.msk.bf16.gmra.mxu0 %vm408_vm1, %v1768_v38  ;;  %v1180_v38 = vsel %vm572_vm2, %v1175_v34, %v1179_v35 }
  0x36   : > { %1642 = vmatmul.msk.bf16.gmra.mxu3 %vm408_vm1, %v1764_v39  ;;  %v1773_v39 = vld [vmem:[%s1991_s12 + $0x10] sm:$0xff]  ;;  %v1059_v41 = vrot.slane %v1057_v30, 1 }
  0x37   : > { %v913_v43 = vshll.u32 %v1773_v39, 16  ;;  %v917_v63 = vshrl.u32 %v1773_v39, 16  ;;  %v931_v39 = vrot.slane %v929_v26, 1 }
  0x39   : > { %v915_v51 = vrot.slane %v913_v43, 1  ;;  %v935_v2 = vor.u32 %v933_v61, %v931_v39 }
  0x3b   : > { %v916_v57 = vsel %vm572_vm2, %v911_v50, %v915_v51  ;;  %v919_v6 = vor.u32 %v917_v63, %v915_v51 }
  0x44   : > { %1595 = vmatmul.msk.bf16.gmra.mxu1 %vm408_vm1, %v1752_v45  ;;  %1620 = vmatmul.msk.bf16.gmra.mxu2 %vm408_vm1, %v592_v46  ;;  %v1038_v45 = vrot.slane %v1036_v40, 1  ;;  %v1041_v46 = vshll.u32 %v1776_v28, 16  ;;  %v1055_v40 = vor.u32 %v1053_v29, %v1051_v9 }
  0x45   : > { %1665 = vmatmul.msk.bf16.gmra.mxu0 %vm408_vm1, %v1769_v47  ;;  %v1181_v47 = vshrl.u32 %v1781_v18, 16 }
  0x46   : > { %1643 = vmatmul.msk.bf16.gmra.mxu3 %vm408_vm1, %v1765_v48  ;;  %v1185_v48 = vshll.u32 %v1782_v42, 16  ;;  %v1039_v52 = vor.u32 %v1038_v45, %v1034_v44  ;;  %v1043_v53 = vrot.slane %v1041_v46, 1 }
  0x48   : > { %v1044_v58 = vsel %vm572_vm2, %v1039_v52, %v1043_v53 }
  0x54   : > { %1596 = vmatmul.msk.bf16.gmra.mxu1 %vm408_vm1, %v1753_v54  ;;  %1621 = vmatmul.msk.bf16.gmra.mxu2 %vm408_vm1, %v600_v55  ;;  %v1278_v54 = vrot.slane %v2055_v49, 1  ;;  %v1183_v55 = vor.u32 %v1181_v47, %v1179_v35  ;;  %v1197_v35 = vshrl.u32 %v1783_v62, 16 }
  0x55   : > { %1666 = vmatmul.msk.bf16.gmra.mxu0 %vm408_vm1, %v1770_v56  ;;  %v1187_v56 = vrot.slane %v1185_v48, 1  ;;  %v1060_v48 = vsel %vm572_vm2, %v1055_v40, %v1059_v41 }
  0x56   : > { %1644 = vmatmul.msk.bf16.gmra.mxu3 %vm408_vm1, %v1766_v59  ;;  %v1279_v59 = vsel %vm1274_vm3, %v1276_v32, %v1278_v54  ;;  %v1779_v32 = vld [vmem:[%s1977_s29 + $0x24] sm:$0x10]  ;;  %v1199_v44 = vor.u32 %v1197_v35, %v1195_v12 }
  0x57   : > { %v1188_v60 = vsel %vm572_vm2, %v1183_v55, %v1187_v56 }
  0x64   : > { %1597 = vmatmul.msk.bf16.gmra.mxu1 %vm408_vm1, %v483_v7  ;;  %1622 = vmatmul.msk.bf16.gmra.mxu2 %vm408_vm1, %v608_v8  ;;  %v923_v7 = vrot.slane %v921_v0, 1  ;;  %v1047_v8 = vor.u32 %v1045_v1, %v1043_v53  ;;  %v1205_v1 = vshrl.u32 %v1736_v27, 16 }
  0x65   : > { %1667 = vmatmul.msk.bf16.gmra.mxu0 %vm408_vm1, %v799_v10  ;;  %v1280_v10 = vrot.slane %v2070_v5, 1 }
  0x66   : > { %1645 = vmatmul.msk.bf16.gmra.mxu3 %vm408_vm1, %v705_v11  ;;  %v1191_v11 = vor.u32 %v1189_v3, %v1187_v56  ;;  %v924_v14 = vsel %vm572_vm2, %v919_v6, %v923_v7  ;;  %v1052_v15 = vsel %vm572_vm2, %v1047_v8, %v1051_v9  ;;  %v1061_v56 = vshrl.u32 %v2070_v5, 16 }
  0x67   : > { %v1281_v19 = vsel %vm1274_vm3, %v1278_v54, %v1280_v10 }
  0x68   : > { %v1196_v20 = vsel %vm572_vm2, %v1191_v11, %v1195_v12  ;;  %v1063_v62 = vor.u32 %v1061_v56, %v1059_v41 }
  0x74   : > { %1623 = vmatmul.msk.bf16.gmra.mxu2 %vm408_vm1, %v611_v33  ;;  %1689 = vmatmul.msk.bf16.vlgmr.msra.gmra.mxu1 %vm408_vm1, %v908_v36  ;;  %v1201_v36 = vshll.u32 %v1736_v27, 16 }
  0x75   : > { %1743 = vmatmul.msk.bf16.vlgmr.msra.gmra.mxu0 %vm408_vm1, %v1277_v37  ;;  %v1710_v37 = vor.u32 %v1779_v32, %v1709_v31 }
  0x76   : > { %1737 = vmatmul.msk.bf16.vlgmr.msra.gmra.mxu3 %vm408_vm1, %v1180_v38  ;;  %v927_v38 = vor.u32 %v925_v25, %v923_v7  ;;  %v1203_v45 = vrot.slane %v1201_v36, 1 }
  0x77   : > { %v1282_v42 = vrot.slane %v1710_v37, 1  ;;  %v1069_v17 = vshrl.u32 %v1710_v37, 16 }
  0x78   : > { %v932_v47 = vsel %vm572_vm2, %v927_v38, %v931_v39  ;;  %v1204_v53 = vsel %vm572_vm2, %v1199_v44, %v1203_v45  ;;  %v1207_v9 = vor.u32 %v1205_v1, %v1203_v45 }
  0x79   : > { %v1283_v52 = vsel %vm1274_vm3, %v1280_v10, %v1282_v42 }
  0x84   : > { %1690 = vmatmul.msk.bf16.gmra.mxu1 %vm408_vm1, %v916_v57  ;;  %1711 = vmatmul.msk.bf16.vlgmr.msra.gmra.mxu2 %vm408_vm1, %v1044_v58  ;;  %v1065_v57 = vshll.u32 %v1710_v37, 16 }
  0x85   : > { %1744 = vmatmul.msk.bf16.gmra.mxu0 %vm408_vm1, %v1279_v59 }
  0x86   : > { %1738 = vmatmul.msk.bf16.gmra.mxu3 %vm408_vm1, %v1188_v60  ;;  %v1067_v63 = vrot.slane %v1065_v57, 1 }
  0x88   : > { %v1068_v4 = vsel %vm572_vm2, %v1063_v62, %v1067_v63 }
  0x91   : > { %v2073_v13 = vpop.f32.mrf.mxu1 }
  0x92   : > { %v437_v18 = vpop.f32.mrf.mxu0 }
  0x94   : > { %1691 = vmatmul.msk.bf16.gmra.mxu1 %vm408_vm1, %v924_v14  ;;  %1712 = vmatmul.msk.bf16.gmra.mxu2 %vm408_vm1, %v1052_v15 }
  0x95   : > { %1745 = vmatmul.msk.bf16.gmra.mxu0 %vm408_vm1, %v1281_v19 }
  0x96   : > { %1739 = vmatmul.msk.bf16.gmra.mxu3 %vm408_vm1, %v1196_v20  ;;  %v1071_v20 = vor.u32 %v1069_v17, %v1067_v63 }
  0x97   : > { %v2086_v24 = vpop.f32.mrf.mxu2 }
  0x99   : > { %v444_v28 = vpop.f32.mrf.mxu1  ;;  %v2093_v33 = vpop.f32.mrf.mxu3 }
  0x9a   : > { %v439_v34 = vpop.f32.mrf.mxu0 }
  0x9f   : > { %v449_v43 = vpop.f32.mrf.mxu2 }
  0xa1   : > { %v511_v46 = vpop.f32.mrf.mxu1  ;;  %v459_v50 = vpop.f32.mrf.mxu3 }
  0xa2   : > { %v512_v49 = vadd.f32 %v511_v46, %v437_v18  ;;  %v827_v51 = vpop.f32.mrf.mxu0 }
  0xa4   : > { %1692 = vmatmul.msk.bf16.gmra.mxu1 %vm408_vm1, %v932_v47  ;;  %1713 = vmatmul.msk.bf16.gmra.mxu2 %vm408_vm1, %v1060_v48 }
  0xa5   : > { %1746 = vmatmul.msk.bf16.gmra.mxu0 %vm408_vm1, %v1283_v52 }
  0xa6   : > { %1740 = vmatmul.msk.bf16.gmra.mxu3 %vm408_vm1, %v1204_v53 }
  0xa7   : > { %v452_v54 = vpop.f32.mrf.mxu2 }
  0xa9   : > { %v513_v55 = vpop.f32.mrf.mxu1  ;;  %v733_v59 = vpop.f32.mrf.mxu3 }
  0xaa   : > { %v514_v58 = vadd.f32 %v513_v55, %v439_v34  ;;  %v829_v60 = vpop.f32.mrf.mxu0 }
  0xaf   : > { %v454_v0 = vpop.f32.mrf.mxu2 }
  0xb1   : > { %v516_v3 = vpop.f32.mrf.mxu1  ;;  %v735_v7 = vpop.f32.mrf.mxu3 }
  0xb2   : > { %v517_v6 = vadd.f32 %v516_v3, %v2073_v13  ;;  %v832_v8 = vpop.f32.mrf.mxu0 }
  0xb4   : > { %1693 = vmatmul.msk.bf16.gmra.mxu1 %vm408_vm1, %v935_v2  ;;  %1714 = vmatmul.msk.bf16.gmra.mxu2 %vm408_vm1, %v1068_v4 }
  0xb5   : > { %1747 = vmatmul.msk.bf16.gmra.mxu0 %vm408_vm1, %v1282_v42 }
  0xb6   : > { %1741 = vmatmul.msk.bf16.gmra.mxu3 %vm408_vm1, %v1207_v9 }
  0xb7   : > { %v639_v5 = vpop.f32.mrf.mxu2 }
  0xb8   : > { %v663_v10 = vadd.f32 %v639_v5, %v512_v49 }
  0xb9   : > { %v518_v11 = vpop.f32.mrf.mxu1  ;;  %v738_v15 = vpop.f32.mrf.mxu3 }
  0xba   : > { %v757_v12 = vadd.f32 %v733_v59, %v663_v10  ;;  %v519_v14 = vadd.f32 %v518_v11, %v444_v28  ;;  %v834_v16 = vpop.f32.mrf.mxu0 }
  0xbc   : > { %v2110_v13 = vadd.f32 %v827_v51, %v757_v12 }
  0xbf   : > { %v641_v18 = vpop.f32.mrf.mxu2 }
  0xc0   : > { %v664_v19 = vadd.f32 %v641_v18, %v514_v58 }
  0xc1   : > { %v521_v21 = vpop.f32.mrf.mxu1  ;;  %v740_v25 = vpop.f32.mrf.mxu3 }
  0xc2   : > { %v758_v22 = vadd.f32 %v735_v7, %v664_v19  ;;  %v522_v23 = vadd.f32 %v521_v21, %v2086_v24  ;;  %v837_v26 = vpop.f32.mrf.mxu0 }
  0xc4   : > { %1715 = vmatmul.msk.bf16.gmra.mxu2 %vm408_vm1, %v1071_v20  ;;  %v2114_v27 = vadd.f32 %v829_v60, %v758_v22 }
  0xc7   : > { %v644_v29 = vpop.f32.mrf.mxu2 }
  0xc8   : > { %v665_v28 = vadd.f32 %v644_v29, %v517_v6 }
  0xc9   : > { %v523_v30 = vpop.f32.mrf.mxu1  ;;  %v743_v34 = vpop.f32.mrf.mxu3 }
  0xca   : > { %v759_v31 = vadd.f32 %v738_v15, %v665_v28  ;;  %v524_v32 = vadd.f32 %v523_v30, %v449_v43  ;;  %v839_v35 = vpop.f32.mrf.mxu0 }
  0xcc   : > { %v2116_v36 = vadd.f32 %v832_v8, %v759_v31 }
  0xcf   : > { %v646_v37 = vpop.f32.mrf.mxu2 }
  0xd0   : > { %v666_v38 = vadd.f32 %v646_v37, %v519_v14 }
  0xd1   : > { %v526_v39 = vpop.f32.mrf.mxu1  ;;  %v745_v41 = vpop.f32.mrf.mxu3 }
  0xd2   : > { %v760_v40 = vadd.f32 %v740_v25, %v666_v38  ;;  %v527_v24 = vadd.f32 %v526_v39, %v452_v54  ;;  %v842_v42 = vpop.f32.mrf.mxu0 }
  0xd4   : > { %v2118_v44 = vadd.f32 %v834_v16, %v760_v40 }
  0xd7   : > { %v649_v45 = vpop.f32.mrf.mxu2 }
  0xd8   : > { %v667_v46 = vadd.f32 %v649_v45, %v522_v23 }
  0xd9   : > { %v528_v47 = vpop.f32.mrf.mxu1  ;;  %v748_v50 = vpop.f32.mrf.mxu3 }
  0xda   : > { %v761_v48 = vadd.f32 %v743_v34, %v667_v46  ;;  %v529_v49 = vadd.f32 %v528_v47, %v454_v0  ;;  %v844_v43 = vpop.f32.mrf.mxu0 }
  0xdc   : > { %v2120_v51 = vadd.f32 %v837_v26, %v761_v48 }
  0xdf   : > { %v651_v52 = vpop.f32.mrf.mxu2 }
  0xe0   : > { %v668_v53 = vadd.f32 %v651_v52, %v524_v32  ;;  %v2136_v32 = vld [vmem:[%s2179_s5] ss:$0 sm:$0xff] }
  0xe1   : > { %v531_v55 = vpop.f32.mrf.mxu1  ;;  %v750_v54 = vpop.f32.mrf.mxu3 }
  0xe2   : > { %v762_v56 = vadd.f32 %v745_v41, %v668_v53  ;;  %v532_v57 = vadd.f32 %v531_v55, %v2093_v33  ;;  %v847_v58 = vpop.f32.mrf.mxu0 }
  0xe4   : > { %v2123_v59 = vadd.f32 %v839_v35, %v762_v56 }
  0xe7   : > { %v654_v60 = vpop.f32.mrf.mxu2 }
  0xe8   : > { %v669_v61 = vadd.f32 %v654_v60, %v527_v24 }
  0xe9   : > { %v533_v62 = vpop.f32.mrf.mxu1  ;;  %v753_v1 = vpop.f32.mrf.mxu3 }
  0xea   : > { %v763_v63 = vadd.f32 %v748_v50, %v669_v61  ;;  %v849_v0 = vpop.f32.mrf.mxu0 }
  0xec   : > { %v2125_v2 = vadd.f32 %v842_v42, %v763_v63 }
  0xef   : > { %v656_v3 = vpop.f32.mrf.mxu2 }
  0xf0   : > { %v670_v4 = vadd.f32 %v656_v3, %v529_v49 }
  0xf1   : > { %v963_v6 = vpop.f32.mrf.mxu1  ;;  %v755_v8 = vpop.f32.mrf.mxu3 }
  0xf2   : > { %v764_v7 = vadd.f32 %v750_v54, %v670_v4  ;;  %v1311_v9 = vpop.f32.mrf.mxu0  ;;  %v987_v21 = vadd.f32 %v963_v6, %v2110_v13 }
  0xf4   : > { %v2127_v5 = vadd.f32 %v844_v43, %v764_v7 }
  0xf7   : > { %v659_v33 = vpop.f32.mrf.mxu2 }
  0xf8   : > { %v671_v10 = vadd.f32 %v659_v33, %v532_v57 }
  0xf9   : > { %v965_v11 = vpop.f32.mrf.mxu1  ;;  %v1235_v14 = vpop.f32.mrf.mxu3 }
  0xfa   : > { %v765_v12 = vadd.f32 %v753_v1, %v671_v10  ;;  %v1313_v15 = vpop.f32.mrf.mxu0  ;;  %v988_v30 = vadd.f32 %v965_v11, %v2114_v27 }
  0xfc   : > { %v2129_v16 = vadd.f32 %v847_v58, %v765_v12 }
  0xff   : > { %v661_v17 = vpop.f32.mrf.mxu2 }
 0x101   : > { %v968_v18 = vpop.f32.mrf.mxu1  ;;  %v1237_v19 = vpop.f32.mrf.mxu3 }
 0x102   : > { %v1316_v20 = vpop.f32.mrf.mxu0  ;;  %v989_v41 = vadd.f32 %v968_v18, %v2116_v36 }
 0x107   : > { %v1099_v22 = vpop.f32.mrf.mxu2 }
 0x108   : > { %v1123_v23 = vadd.f32 %v1099_v22, %v987_v21 }
 0x109   : > { %v970_v25 = vpop.f32.mrf.mxu1  ;;  %v1240_v29 = vpop.f32.mrf.mxu3 }
 0x10a   : > { %v1259_v26 = vadd.f32 %v1235_v14, %v1123_v23  ;;  %v1318_v28 = vpop.f32.mrf.mxu0  ;;  %v990_v55 = vadd.f32 %v970_v25, %v2118_v44 }
 0x10c   : > { %v1335_v31 = vadd.f32 %v1311_v9, %v1259_v26 }
 0x10e   : > { %v1348_v13 = vadd.f32 %v2136_v32, %v1335_v31 }
 0x10f   : > { %v1101_v34 = vpop.f32.mrf.mxu2 }
 0x110   : > { %v1124_v35 = vadd.f32 %v1101_v34, %v988_v30  ;;  %v1366_v42 = vmul.f32 0.01, %v1348_v13  ;;  %vm1357_vm4 = vcmp.ge.f32.partialorder %v1348_v13, 0.0 }
 0x111   : > { %v973_v37 = vpop.f32.mrf.mxu1  ;;  %v1242_v39 = vpop.f32.mrf.mxu3 }
 0x112   : > { %v1260_v38 = vadd.f32 %v1237_v19, %v1124_v35  ;;  %v1321_v40 = vpop.f32.mrf.mxu0  ;;  %v1375_v49 = vsel %vm1357_vm4, %v1348_v13, %v1366_v42  ;;  %v991_v0 = vadd.f32 %v973_v37, %v2120_v51 }
 0x114   : > { %v1336_v24 = vadd.f32 %v1313_v15, %v1260_v38 }
 0x116   : > { %v1349_v27 = vadd.f32 %v2136_v32, %v1336_v24 }
 0x117   : > { %v1104_v45 = vpop.f32.mrf.mxu2 }
 0x118   : > { %vm1358_vm5 = vcmp.ge.f32.partialorder %v1349_v27, 0.0  ;;  %v1367_v46 = vmul.f32 0.01, %v1349_v27  ;;  %v1125_v47 = vadd.f32 %v1104_v45, %v989_v41 }
 0x119   : > { %v975_v48 = vpop.f32.mrf.mxu1  ;;  %v1245_v36 = vpop.f32.mrf.mxu3 }
 0x11a   : > { %v1376_v50 = vsel %vm1358_vm5, %v1349_v27, %v1367_v46  ;;  %v1261_v43 = vadd.f32 %v1240_v29, %v1125_v47  ;;  %v1323_v52 = vpop.f32.mrf.mxu0  ;;  %v992_v15 = vadd.f32 %v975_v48, %v2123_v59 }
 0x11b   : > { %v1788_v53 = vpack.c.bf16 %v1376_v50, %v1375_v49 }
 0x11c   : > { %v1337_v56 = vadd.f32 %v1316_v20, %v1261_v43 }
 0x11d   : > { %1789 = vst [vmem:[%s2145_s17] sm:$0xff] %v1788_v53  }
 0x11e   : > { %v1350_v60 = vadd.f32 %v2136_v32, %v1337_v56 }
 0x11f   : > { %v1106_v57 = vpop.f32.mrf.mxu2 }
 0x120   : > { %v1126_v54 = vadd.f32 %v1106_v57, %v990_v55  ;;  %v1368_v3 = vmul.f32 0.01, %v1350_v60  ;;  %vm1359_vm6 = vcmp.ge.f32.partialorder %v1350_v60, 0.0 }
 0x121   : > { %v978_v58 = vpop.f32.mrf.mxu1  ;;  %v1247_v62 = vpop.f32.mrf.mxu3 }
 0x122   : > { %v1262_v61 = vadd.f32 %v1242_v39, %v1126_v54  ;;  %v1326_v63 = vpop.f32.mrf.mxu0  ;;  %v1377_v9 = vsel %vm1359_vm6, %v1350_v60, %v1368_v3  ;;  %v993_v26 = vadd.f32 %v978_v58, %v2125_v2 }
 0x124   : > { %v1338_v1 = vadd.f32 %v1318_v28, %v1262_v61 }
 0x126   : > { %v1351_v4 = vadd.f32 %v2136_v32, %v1338_v1 }
 0x127   : > { %v1109_v6 = vpop.f32.mrf.mxu2 }
 0x128   : > { %vm1360_vm7 = vcmp.ge.f32.partialorder %v1351_v4, 0.0  ;;  %v1369_v44 = vmul.f32 0.01, %v1351_v4  ;;  %v1127_v7 = vadd.f32 %v1109_v6, %v991_v0 }
 0x129   : > { %v980_v8 = vpop.f32.mrf.mxu1  ;;  %v1250_v11 = vpop.f32.mrf.mxu3 }
 0x12a   : > { %v1378_v33 = vsel %vm1360_vm7, %v1351_v4, %v1369_v44  ;;  %v1263_v10 = vadd.f32 %v1245_v36, %v1127_v7  ;;  %v1328_v12 = vpop.f32.mrf.mxu0  ;;  %v994_v24 = vadd.f32 %v980_v8, %v2127_v5 }
 0x12b   : > { %v1793_v14 = vpack.c.bf16 %v1378_v33, %v1377_v9 }
 0x12c   : > { %v1339_v17 = vadd.f32 %v1321_v40, %v1263_v10 }
 0x12d   : > { %1805 = vst [vmem:[%s2145_s17 + $0x8] sm:$0xff] %v1793_v14  }
 0x12e   : > { %v1352_v20 = vadd.f32 %v2136_v32, %v1339_v17 }
 0x12f   : > { %v1111_v51 = vpop.f32.mrf.mxu2 }
 0x130   : > { %v1128_v18 = vadd.f32 %v1111_v51, %v992_v15  ;;  %v1370_v29 = vmul.f32 0.01, %v1352_v20  ;;  %vm1361_vm8 = vcmp.ge.f32.partialorder %v1352_v20, 0.0 }
 0x131   : > { %v983_v19 = vpop.f32.mrf.mxu1  ;;  %v1252_v22 = vpop.f32.mrf.mxu3 }
 0x132   : > { %v1264_v21 = vadd.f32 %v1247_v62, %v1128_v18  ;;  %v1331_v23 = vpop.f32.mrf.mxu0  ;;  %v1379_v35 = vsel %vm1361_vm8, %v1352_v20, %v1370_v29  ;;  %v995_v48 = vadd.f32 %v983_v19, %v2129_v16 }
 0x134   : > { %v1340_v25 = vadd.f32 %v1323_v52, %v1264_v21 }
 0x136   : > { %v1353_v28 = vadd.f32 %v2136_v32, %v1340_v25 }
 0x137   : > { %v1114_v30 = vpop.f32.mrf.mxu2 }
 0x138   : > { %vm1362_vm9 = vcmp.ge.f32.partialorder %v1353_v28, 0.0  ;;  %v1371_v59 = vmul.f32 0.01, %v1353_v28  ;;  %v1129_v31 = vadd.f32 %v1114_v30, %v993_v26 }
 0x139   : > { %v985_v34 = vpop.f32.mrf.mxu1  ;;  %v1255_v38 = vpop.f32.mrf.mxu3 }
 0x13a   : > { %v1380_v37 = vsel %vm1362_vm9, %v1353_v28, %v1371_v59  ;;  %v1265_v13 = vadd.f32 %v1250_v11, %v1129_v31  ;;  %v1333_v39 = vpop.f32.mrf.mxu0 }
 0x13b   : > { %v1798_v40 = vpack.c.bf16 %v1380_v37, %v1379_v35 }
 0x13c   : > { %v1341_v41 = vadd.f32 %v1326_v63, %v1265_v13 }
 0x13d   : > { %1806 = vst [vmem:[%s2145_s17 + $0x10] sm:$0xff] %v1798_v40  }
 0x13e   : > { %v1354_v27 = vadd.f32 %v2136_v32, %v1341_v41 }
 0x13f   : > { %v1116_v2 = vpop.f32.mrf.mxu2 }
 0x140   : > { %v1130_v42 = vadd.f32 %v1116_v2, %v994_v24  ;;  %v1372_v49 = vmul.f32 0.01, %v1354_v27  ;;  %vm1363_vm10 = vcmp.ge.f32.partialorder %v1354_v27, 0.0 }
 0x141   : > { %v1257_v46 = vpop.f32.mrf.mxu3 }
 0x142   : > { %v1266_v45 = vadd.f32 %v1252_v22, %v1130_v42  ;;  %v1381_v52 = vsel %vm1363_vm10, %v1354_v27, %v1372_v49 }
 0x144   : > { %v1342_v47 = vadd.f32 %v1328_v12, %v1266_v45 }
 0x146   : > { %v1355_v50 = vadd.f32 %v2136_v32, %v1342_v47 }
 0x147   : > { %v1119_v43 = vpop.f32.mrf.mxu2 }
 0x148   : > { %vm1364_vm11 = vcmp.ge.f32.partialorder %v1355_v50, 0.0  ;;  %v1373_v36 = vmul.f32 0.01, %v1355_v50  ;;  %v1131_v5 = vadd.f32 %v1119_v43, %v995_v48 }
 0x14a   : > { %v1382_v53 = vsel %vm1364_vm11, %v1355_v50, %v1373_v36  ;;  %v1267_v55 = vadd.f32 %v1255_v38, %v1131_v5 }
 0x14b   : > { %v1803_v56 = vpack.c.bf16 %v1382_v53, %v1381_v52 }
 0x14c   : > { %v1343_v57 = vadd.f32 %v1331_v23, %v1267_v55 }
 0x14d   : > { %1807 = vst [vmem:[%s2145_s17 + $0x18] sm:$0xff] %v1803_v56  }
 0x14e   : > { %v1356_v54 = vadd.f32 %v2136_v32, %v1343_v57 }
 0x14f   : > { %v1121_v58 = vpop.f32.mrf.mxu2 }
 0x150   : > { %vm1365_vm12 = vcmp.ge.f32.partialorder %v1356_v54, 0.0  ;;  %v1374_v16 = vmul.f32 0.01, %v1356_v54 }
 0x152   : > { %v1383_v60 = vsel %vm1365_vm12, %v1356_v54, %v1374_v16 }
 0x153   : > { %v1392_v61 = vpack.c.bf16 %v1383_v60, %v1383_v60 }
 0x155   : > { %1401 = vst [vmem:[%s2145_s17 + $0x20] sm:$0xf] %v1392_v61 }
 0x156 PF: > { %s16_s23 = sadd.s32 1, %s1863_s23   ;;  %s2181_s21 = smov %s1859_s22 }
 0x157   : > { %p13_p5 = scmp.ge.s32.totalorder %s16_s23, 4   ;;  %s2182_s22 = smov %s2184_s24 }
 0x159   :  { %15 = sbr.rel (!%p13_p5) target bundleno = 2 (0x2), region = 97 }

// kernel: gradual_style_block_forward.7
= control target key start
LH: loop header
LB: loop body
LE: loop exit
PB: predicated region body
PF: predicated region fallthrough
CT: control target
= control target key end

     0   :  { %s1879_s21 = smov 0   ;;  %s1881_s22 = smov 0   ;;  %s2173_s0 = inlined_call_operand.vmem [shape: bf16[2,12,128], index: 0, kind: input, shape index: {}]   ;;  %s2174_s1 = inlined_call_operand.vmem [shape: bf16[2,12,128], index: 1, kind: input, shape index: {}]   ;;  %s2175_s2 = inlined_call_operand.vmem [shape: bf16[2,12,128], index: 2, kind: input, shape index: {}]   ;;  %s2176_s3 = inlined_call_operand.vmem [shape: bf16[2,12,128], index: 3, kind: input, shape index: {}]   ;;  %s2177_s4 = inlined_call_operand.vmem [shape: bf16[9,128,128], index: 4, kind: input, shape index: {}]   ;;  %s2178_s5 = inlined_call_operand.vmem [shape: f32[1,128], index: 5, kind: input, shape index: {}]   ;;  %s2179_s6 = inlined_call_operand.vmem [shape: bf16[2,6,128], index: 6, kind: output, shape index: {}]  }
   0x1   :  { %s1883_s23 = smov 0  }
   0x2 LB: > { %s28_s24 = sadd.s32 1, %s1838_s22  ;;  %p1286_p0 = scmp.ge.s32.totalorder %s1842_s23, 1  ;;  %s1842_s23 = sphi %s1883_s23, %s16_s23   ;;  %s1838_s22 = sphi %s1881_s22, %s2181_s22   ;;  %s1834_s21 = sphi %s1879_s21, %s2180_s21  }
   0x3   : > { %p30_p1 = scmp.ge.s32.totalorder %s28_s24, 2  ;;  %p273_p2 = scmp.lt.s32.totalorder %s1842_s23, 3 }
   0x5   : > { %s2183_s24 = smov (%p30_p1, %s28_s24), 0  ;;  %p274_p3 = pnand %p1286_p0, %p273_p2 }
   0x6   : > { %p327_p4 = scmp.lt.s32.totalorder (!%p274_p3), %s1834_s21, 1 }
   0x7   : > { %277 = sbr.rel (%p274_p3) target bundleno = 244 (0xf4), region = 44 }
   0xc   : > { %v1737_v0 = vld [vmem:[%s2177_s4 + $0x78] sm:$0xff]  ;;  %v1736_v4 = vld [vmem:[%s2177_s4 + $0x70] sm:$0xff]  ;;  %s2185_s21 = smov (!%p327_p4, %s1834_s21), 1  ;;  %v1735_v8 = vld [vmem:[%s2177_s4 + $0x68] sm:$0xff] }
   0xd   : > { %v1745_v1 = vld [vmem:[%s2177_s4 + $0xb8] sm:$0xff]  ;;  %444 = vmatpush.bf16.msra.mxu0 %v1737_v0  ;;  %v1744_v5 = vld [vmem:[%s2177_s4 + $0xb0] sm:$0xff]  ;;  %v1743_v9 = vld [vmem:[%s2177_s4 + $0xa8] sm:$0xff]  ;;  %s1936_s29 = sshll.u32 %s2185_s21, 3  ;;  %s1295_s13 = sshll.u32 %s2185_s21, 2 }
   0xe   : > { %v1753_v2 = vld [vmem:[%s2177_s4 + $0xf8] sm:$0xff]  ;;  %595 = vmatpush.bf16.msra.mxu2 %v1745_v1  ;;  %v1752_v6 = vld [vmem:[%s2177_s4 + $0xf0] sm:$0xff]  ;;  %v1751_v10 = vld [vmem:[%s2177_s4 + $0xe8] sm:$0xff]  ;;  %s1954_s16 = scalar_lea.vmem %s2173_s0, %s1936_s29  ;;  %s2015_s19 = scalar_lea.vmem %s2174_s1, %s1936_s29 }
   0xf   : > { %v1729_v3 = vld [vmem:[%s2177_s4 + $0x38] sm:$0xff]  ;;  %675 = vmatpush.bf16.msra.mxu3 %v1753_v2  ;;  %v1728_v7 = vld [vmem:[%s2177_s4 + $0x30] sm:$0xff]  ;;  %v1727_v11 = vld [vmem:[%s2177_s4 + $0x28] sm:$0xff]  ;;  %s2027_s7 = scalar_lea.vmem %s2175_s2, %s1936_s29  ;;  %s346_s12 = scalar_lea.vmem %s2176_s3, %s1936_s29 }
  0x10   : > { %505 = vmatpush.bf16.msra.mxu1 %v1729_v3  ;;  %v1734_v12 = vld [vmem:[%s2177_s4 + $0x60] sm:$0xff]  ;;  %v1733_v16 = vld [vmem:[%s2177_s4 + $0x58] sm:$0xff]  ;;  %v1732_v22 = vld [vmem:[%s2177_s4 + $0x50] sm:$0xff]  ;;  %s360_s17 = scalar_lea.vmem %s2179_s6, %s1295_s13 }
  0x11   : > { %445 = vmatpush.bf16.msra.mxu0 %v1736_v4  ;;  %v1742_v13 = vld [vmem:[%s2177_s4 + $0xa0] sm:$0xff]  ;;  %v1741_v17 = vld [vmem:[%s2177_s4 + $0x98] sm:$0xff]  ;;  %v1740_v23 = vld [vmem:[%s2177_s4 + $0x90] sm:$0xff] }
  0x12   : > { %596 = vmatpush.bf16.msra.mxu2 %v1744_v5  ;;  %v1750_v14 = vld [vmem:[%s2177_s4 + $0xe0] sm:$0xff]  ;;  %v1749_v18 = vld [vmem:[%s2177_s4 + $0xd8] sm:$0xff]  ;;  %v1748_v25 = vld [vmem:[%s2177_s4 + $0xd0] sm:$0xff] }
  0x13   : > { %676 = vmatpush.bf16.msra.mxu3 %v1752_v6  ;;  %v1726_v15 = vld [vmem:[%s2177_s4 + $0x20] sm:$0xff]  ;;  %v1725_v19 = vld [vmem:[%s2177_s4 + $0x18] sm:$0xff]  ;;  %v1724_v26 = vld [vmem:[%s2177_s4 + $0x10] sm:$0xff] }
  0x14   : > { %506 = vmatpush.bf16.msra.mxu1 %v1728_v7  ;;  %v518_v20 = vld [vmem:[%s1954_s16] sm:$0xf]  ;;  %v1731_v27 = vld [vmem:[%s2177_s4 + $0x48] sm:$0xff]  ;;  %v1761_v36 = vld [vmem:[%s2177_s4 + $0x138] sm:$0xff] }
  0x15   : > { %446 = vmatpush.bf16.msra.mxu0 %v1735_v8  ;;  %v537_v21 = vunpack.c.l.b16 %v518_v20  ;;  %v1739_v28 = vld [vmem:[%s2177_s4 + $0x88] sm:$0xff]  ;;  %v1730_v32 = vld [vmem:[%s2177_s4 + $0x40] sm:$0xff]  ;;  %v1777_v37 = vld [vmem:[%s2177_s4 + $0x1b8] sm:$0xff] }
  0x16   : > { %597 = vmatpush.bf16.msra.mxu2 %v1743_v9  ;;  %v1747_v30 = vld [vmem:[%s2177_s4 + $0xc8] sm:$0xff]  ;;  %v1738_v33 = vld [vmem:[%s2177_s4 + $0x80] sm:$0xff]  ;;  %v1786_v40 = vld [vmem:[%s2177_s4 + $0x1f8] sm:$0xff] }
  0x17   : > { %677 = vmatpush.bf16.msra.mxu3 %v1751_v10  ;;  %v538_v24 = vpack.c.b16 %v537_v21, %v537_v21  ;;  %v1723_v31 = vld [vmem:[%s2177_s4 + $0x8] sm:$0xff]  ;;  %v1746_v38 = vld [vmem:[%s2177_s4 + $0xc0] sm:$0xff]  ;;  %v1769_v41 = vld [vmem:[%s2177_s4 + $0x178] sm:$0xff] }
  0x18   : > { %507 = vmatpush.bf16.msra.mxu1 %v1727_v11  ;;  %v1722_v39 = vld [vmem:[%s2177_s4] sm:$0xff]  ;;  %v1760_v43 = vld [vmem:[%s2177_s4 + $0x130] sm:$0xff]  ;;  %v1759_v50 = vld [vmem:[%s2177_s4 + $0x128] sm:$0xff] }
  0x19   : > { %447 = vmatpush.bf16.msra.mxu0 %v1734_v12  ;;  %v542_v29 = vshll.u32 %v538_v24, 16  ;;  %v540_v34 = vshrl.u32 %v538_v24, 16  ;;  %v1776_v44 = vld [vmem:[%s2177_s4 + $0x1b0] sm:$0xff]  ;;  %v378_v45 = vld [vmem:[%s2015_s19] sm:$0x7]  ;;  %v1775_v51 = vld [vmem:[%s2177_s4 + $0x1a8] sm:$0xff] }
  0x1a   : > { %598 = vmatpush.bf16.msra.mxu2 %v1742_v13  ;;  %v1785_v46 = vld [vmem:[%s2177_s4 + $0x1f0] sm:$0xff]  ;;  %v609_v48 = vld [vmem:[%s2027_s7] sm:$0x7]  ;;  %v1784_v52 = vld [vmem:[%s2177_s4 + $0x1e8] sm:$0xff] }
  0x1b   : > { %678 = vmatpush.bf16.msra.mxu3 %v1750_v14  ;;  %v544_v35 = vrot.slane %v542_v29, 1  ;;  %v1768_v47 = vld [vmem:[%s2177_s4 + $0x170] sm:$0xff]  ;;  %v361_v49 = vld [vmem:[%s1954_s16] sm:$0x7]  ;;  %v1767_v53 = vld [vmem:[%s2177_s4 + $0x168] sm:$0xff] }
  0x1c   : > { %508 = vmatpush.bf16.msra.mxu1 %v1726_v15  ;;  %v1758_v54 = vld [vmem:[%s2177_s4 + $0x120] sm:$0xff]  ;;  %v1757_v63 = vld [vmem:[%s2177_s4 + $0x118] sm:$0xff]  ;;  %v1756_v7 = vld [vmem:[%s2177_s4 + $0x110] sm:$0xff] }
  0x1d   : > { %448 = vmatpush.bf16.msra.mxu0 %v1733_v16  ;;  %v545_v42 = vor.u32 %v544_v35, %v540_v34  ;;  %v1774_v55 = vld [vmem:[%s2177_s4 + $0x1a0] sm:$0xff]  ;;  %v1773_v0 = vld [vmem:[%s2177_s4 + $0x198] sm:$0xff]  ;;  %v1772_v8 = vld [vmem:[%s2177_s4 + $0x190] sm:$0xff] }
  0x1e   : > { %599 = vmatpush.bf16.msra.mxu2 %v1741_v17  ;;  %v860_v56 = vld [vmem:[%s1954_s16] sm:$0xe]  ;;  %v2064_v57 = vld [vmem:[%s1954_s16 + $0x4] sm:$0x1]  ;;  %v1782_v4 = vld [vmem:[%s2177_s4 + $0x1d8] sm:$0xff] }
  0x1f   : > { %679 = vmatpush.bf16.msra.mxu3 %v1749_v18  ;;  %v1783_v58 = vld [vmem:[%s2177_s4 + $0x1e0] sm:$0xff]  ;;  %v881_v61 = vunpack.c.l.b16 %v860_v56  ;;  %v882_v62 = vunpack.c.l.b16 %v2064_v57  ;;  %v1765_v5 = vld [vmem:[%s2177_s4 + $0x158] sm:$0xff]  ;;  %v1781_v11 = vld [vmem:[%s2177_s4 + $0x1d0] sm:$0xff] }
  0x20   : > { %509 = vmatpush.bf16.msra.mxu1 %v1725_v19  ;;  %v1766_v59 = vld [vmem:[%s2177_s4 + $0x160] sm:$0xff]  ;;  %v1764_v12 = vld [vmem:[%s2177_s4 + $0x150] sm:$0xff]  ;;  %v1755_v15 = vld [vmem:[%s2177_s4 + $0x108] sm:$0xff] }
  0x21   : > { %449 = vmatpush.bf16.msra.mxu0 %v1732_v22  ;;  %v769_v60 = vld [vmem:[%s2027_s7] sm:$0xf]  ;;  %v1778_v2 = vld [vmem:[%s2015_s19] sm:$0x10]  ;;  %v883_v6 = vpack.c.b16 %v882_v62, %v881_v61  ;;  %v1771_v16 = vld [vmem:[%s2177_s4 + $0x188] sm:$0xff] }
  0x22   : > { %600 = vmatpush.bf16.msra.mxu2 %v1740_v23  ;;  %v1634_v1 = vld [vmem:[%s2015_s19] sm:$0xe]  ;;  %v788_v3 = vunpack.c.l.b16 %v769_v60  ;;  %v1780_v20 = vld [vmem:[%s2177_s4 + $0x1c8] sm:$0xff]  ;;  %v1793_v35 = vld [vmem:[%s2177_s4 + $0x230] sm:$0xff] }
  0x23   : > { %680 = vmatpush.bf16.msra.mxu3 %v1748_v25  ;;  %v1635_v9 = vor.u32 %v1778_v2, %v1634_v1  ;;  %v885_v13 = vshrl.u32 %v883_v6, 16  ;;  %v888_v14 = vshll.u32 %v883_v6, 16  ;;  %v1763_v21 = vld [vmem:[%s2177_s4 + $0x148] sm:$0xff]  ;;  %v1754_v24 = vld [vmem:[%s2177_s4 + $0x100] sm:$0xff] }
  0x24   : > { %510 = vmatpush.bf16.msra.mxu1 %v1724_v26  ;;  %v789_v10 = vpack.c.b16 %v788_v3, %v788_v3  ;;  %v1770_v25 = vld [vmem:[%s2177_s4 + $0x180] sm:$0xff]  ;;  %v1794_v26 = vld [vmem:[%s2177_s4 + $0x238] sm:$0xff] }
  0x25   : > { %450 = vmatpush.bf16.msra.mxu0 %v1731_v27  ;;  %v980_v17 = vshrl.u32 %v1635_v9, 16  ;;  %v983_v18 = vshll.u32 %v1635_v9, 16  ;;  %v887_v22 = vrot.slane %v885_v13, 1  ;;  %v890_v23 = vrot.slane %v888_v14, 2  ;;  %v689_v34 = vld [vmem:[%s346_s12] sm:$0x7] }
  0x26   : > { %601 = vmatpush.bf16.msra.mxu2 %v1739_v28  ;;  %v793_v19 = vshll.u32 %v789_v10, 16  ;;  %v791_v29 = vshrl.u32 %v789_v10, 16 }
  0x27   : > { %681 = vmatpush.bf16.msra.mxu3 %v1747_v30  ;;  %v982_v27 = vrot.slane %v980_v17, 1  ;;  %v985_v28 = vrot.slane %v983_v18, 2 }
  0x28   : > { %511 = vmatpush.bf16.msra.mxu1 %v1723_v31  ;;  %v795_v30 = vrot.slane %v793_v19, 1  ;;  %v1779_v31 = vld [vmem:[%s2177_s4 + $0x1c0] sm:$0xff] }
  0x29   : > { %451 = vmatpush.bf16.msra.mxu0 %v1730_v32  ;;  %v1762_v32 = vld [vmem:[%s2177_s4 + $0x140] sm:$0xff] }
  0x2a   : > { %602 = vmatpush.bf16.msra.mxu2 %v1738_v33  ;;  %v891_v33 = vor.u32 %v890_v23, %v887_v22 }
  0x2b   : > { %682 = vmatpush.bf16.msra.mxu3 %v1746_v38  ;;  %v1792_v38 = vld [vmem:[%s2177_s4 + $0x228] sm:$0xff] }
  0x2c   : > { %512 = vmatpush.bf16.msra.mxu1 %v1722_v39  ;;  %452 = vmatmul.bf16.vlgmr.msra.gmra.mxu0 %v378_v45  ;;  %v1791_v39 = vld [vmem:[%s2177_s4 + $0x220] sm:$0xff] }
  0x2d   : > { %755 = vmatpush.bf16.msrb.mxu0 %v1761_v36  ;;  %603 = vmatmul.bf16.vlgmr.msra.gmra.mxu2 %v545_v42  ;;  %v986_v36 = vor.u32 %v985_v28, %v982_v27  ;;  %v1050_v42 = vld [vmem:[%s1954_s16] sm:$0xc] }
  0x2e   : > { %941 = vmatpush.bf16.msrb.mxu2 %v1777_v37  ;;  %683 = vmatmul.bf16.vlgmr.msra.gmra.mxu3 %v609_v48  ;;  %v796_v37 = vor.u32 %v795_v30, %v791_v29 }
  0x2f   : > { %1036 = vmatpush.bf16.msrb.mxu3 %v1786_v40  ;;  %513 = vmatmul.bf16.vlgmr.msra.gmra.mxu1 %v361_v49  ;;  %v1790_v40 = vld [vmem:[%s2177_s4 + $0x218] sm:$0xff] }
  0x30   : > { %846 = vmatpush.bf16.msrb.mxu1 %v1769_v41  ;;  %v1789_v41 = vld [vmem:[%s2177_s4 + $0x210] sm:$0xff] }
  0x31   : > { %756 = vmatpush.bf16.msrb.mxu0 %v1760_v43  ;;  %v1069_v43 = vunpack.c.l.b16 %v1050_v42 }
  0x32   : > { %942 = vmatpush.bf16.msrb.mxu2 %v1776_v44  ;;  %v1788_v44 = vld [vmem:[%s2177_s4 + $0x208] sm:$0xff] }
  0x33   : > { %1037 = vmatpush.bf16.msrb.mxu3 %v1785_v46  ;;  %v1070_v45 = vpack.c.b16 %v882_v62, %v1069_v43  ;;  %v1787_v46 = vld [vmem:[%s2177_s4 + $0x200] sm:$0xff] }
  0x34   : > { %847 = vmatpush.bf16.msrb.mxu1 %v1768_v47 }
  0x35   : > { %757 = vmatpush.bf16.msrb.mxu0 %v1759_v50  ;;  %v1071_v47 = vrot.slane %v1070_v45, 2 }
  0x36   : > { %943 = vmatpush.bf16.msrb.mxu2 %v1775_v51 }
  0x37   : > { %1038 = vmatpush.bf16.msrb.mxu3 %v1784_v52 }
  0x38   : > { %848 = vmatpush.bf16.msrb.mxu1 %v1767_v53 }
  0x39   : > { %758 = vmatpush.bf16.msrb.mxu0 %v1758_v54 }
  0x3a   : > { %944 = vmatpush.bf16.msrb.mxu2 %v1774_v55 }
  0x3b   : > { %1039 = vmatpush.bf16.msrb.mxu3 %v1783_v58 }
  0x3c   : > { %849 = vmatpush.bf16.msrb.mxu1 %v1766_v59 }
  0x3d   : > { %759 = vmatpush.bf16.msrb.mxu0 %v1757_v63 }
  0x3e   : > { %945 = vmatpush.bf16.msrb.mxu2 %v1773_v0 }
  0x3f   : > { %1040 = vmatpush.bf16.msrb.mxu3 %v1782_v4 }
  0x40   : > { %850 = vmatpush.bf16.msrb.mxu1 %v1765_v5 }
  0x41   : > { %760 = vmatpush.bf16.msrb.mxu0 %v1756_v7  ;;  %v1819_v7 = vld [vmem:[%s2178_s5] ss:$0 sm:$0xff] }
  0x42   : > { %946 = vmatpush.bf16.msrb.mxu2 %v1772_v8 }
  0x43   : > { %1041 = vmatpush.bf16.msrb.mxu3 %v1781_v11 }
  0x44   : > { %851 = vmatpush.bf16.msrb.mxu1 %v1764_v12 }
  0x45   : > { %761 = vmatpush.bf16.msrb.mxu0 %v1755_v15 }
  0x46   : > { %947 = vmatpush.bf16.msrb.mxu2 %v1771_v16 }
  0x47   : > { %1042 = vmatpush.bf16.msrb.mxu3 %v1780_v20 }
  0x48   : > { %852 = vmatpush.bf16.msrb.mxu1 %v1763_v21 }
  0x49   : > { %762 = vmatpush.bf16.msrb.mxu0 %v1754_v24 }
  0x4a   : > { %948 = vmatpush.bf16.msrb.mxu2 %v1770_v25 }
  0x4b   : > { %1043 = vmatpush.bf16.msrb.mxu3 %v1779_v31 }
  0x4c   : > { %853 = vmatpush.bf16.msrb.mxu1 %v1762_v32  ;;  %763 = vmatmul.bf16.vlgmr.msrb.gmra.mxu0 %v689_v34 }
  0x4d   : > { %1121 = vmatpush.bf16.msra.mxu0 %v1794_v26  ;;  %949 = vmatmul.bf16.vlgmr.msrb.gmra.mxu2 %v891_v33 }
  0x4e   : > { %1044 = vmatmul.bf16.vlgmr.msrb.gmra.mxu3 %v986_v36 }
  0x4f   : > { %854 = vmatmul.bf16.vlgmr.msrb.gmra.mxu1 %v796_v37 }
  0x51   : > { %1122 = vmatpush.bf16.msra.mxu0 %v1793_v35 }
  0x55   : > { %1123 = vmatpush.bf16.msra.mxu0 %v1792_v38 }
  0x59   : > { %1124 = vmatpush.bf16.msra.mxu0 %v1791_v39 }
  0x5d   : > { %1125 = vmatpush.bf16.msra.mxu0 %v1790_v40 }
  0x61   : > { %1126 = vmatpush.bf16.msra.mxu0 %v1789_v41 }
  0x65   : > { %1127 = vmatpush.bf16.msra.mxu0 %v1788_v44 }
  0x69   : > { %1128 = vmatpush.bf16.msra.mxu0 %v1787_v46 }
  0x6c   : > { %1129 = vmatmul.bf16.vlgmr.msra.gmra.mxu0 %v1071_v47 }
  0xa9   : > { %v453_v48 = vpop.f32.mrf.mxu0 }
  0xac   : > { %v514_v49 = vpop.f32.mrf.mxu1 }
  0xad   : > { %v515_v57 = vadd.f32 %v514_v49, %v453_v48 }
  0xb0   : > { %v604_v50 = vpop.f32.mrf.mxu2 }
  0xb1   : > { %v684_v51 = vpop.f32.mrf.mxu3  ;;  %v455_v52 = vpop.f32.mrf.mxu0  ;;  %v608_v60 = vadd.f32 %v604_v50, %v515_v57 }
  0xb3   : > { %v688_v0 = vadd.f32 %v684_v51, %v608_v60 }
  0xb4   : > { %v516_v53 = vpop.f32.mrf.mxu1 }
  0xb8   : > { %v606_v54 = vpop.f32.mrf.mxu2 }
  0xb9   : > { %v686_v55 = vpop.f32.mrf.mxu3 }
  0xc9   : > { %v764_v56 = vpop.f32.mrf.mxu0 }
  0xca   : > { %v768_v2 = vadd.f32 %v764_v56, %v688_v0 }
  0xcc   : > { %v855_v58 = vpop.f32.mrf.mxu1 }
  0xcd   : > { %v859_v4 = vadd.f32 %v855_v58, %v768_v2 }
  0xd0   : > { %v950_v59 = vpop.f32.mrf.mxu2 }
  0xd1   : > { %v1045_v61 = vpop.f32.mrf.mxu3  ;;  %v766_v62 = vpop.f32.mrf.mxu0  ;;  %v954_v5 = vadd.f32 %v950_v59, %v859_v4 }
  0xd3   : > { %v1049_v6 = vadd.f32 %v1045_v61, %v954_v5 }
  0xd4   : > { %v857_v63 = vpop.f32.mrf.mxu1 }
  0xd8   : > { %v952_v1 = vpop.f32.mrf.mxu2 }
  0xd9   : > { %v1047_v3 = vpop.f32.mrf.mxu3 }
  0xe9   : > { %v1130_v8 = vpop.f32.mrf.mxu0 }
  0xea   : > { %v1134_v9 = vadd.f32 %v1130_v8, %v1049_v6 }
  0xec   : > { %v1139_v10 = vadd.f32 %v1819_v7, %v1134_v9 }
  0xee   : > { %vm1140_vm0 = vcmp.ge.f32.partialorder %v1139_v10, 0.0  ;;  %v1141_v11 = vmul.f32 0.01, %v1139_v10 }
  0xf0   : > { %v1142_v12 = vsel %vm1140_vm0, %v1139_v10, %v1141_v11 }
  0xf1   : > { %v1143_v13 = vpack.c.bf16 %v1142_v12, %v1142_v12  ;;  %v1132_v14 = vpop.f32.mrf.mxu0 }
  0xf3   : > { %1144 = vst [vmem:[%s360_s17] sm:$0x7] %v1143_v13 }
  0xf4 PF: > { %s16_s23 = sadd.s32 1, %s1842_s23   ;;  %s2180_s21 = smov %s1838_s22 }
  0xf5   : > { %p13_p5 = scmp.ge.s32.totalorder %s16_s23, 4   ;;  %s2181_s22 = smov %s2183_s24 }
  0xf7   :  { %15 = sbr.rel (!%p13_p5) target bundleno = 2 (0x2), region = 97 }

// kernel: gradual_style_block_forward.8
= control target key start
LH: loop header
LB: loop body
LE: loop exit
PB: predicated region body
PF: predicated region fallthrough
CT: control target
= control target key end

     0   :  { %s1832_s21 = smov 0   ;;  %s1834_s22 = smov 0   ;;  %s2117_s0 = inlined_call_operand.vmem [shape: bf16[2,6,128], index: 0, kind: input, shape index: {}]   ;;  %s2118_s1 = inlined_call_operand.vmem [shape: bf16[2,6,128], index: 1, kind: input, shape index: {}]   ;;  %s2119_s2 = inlined_call_operand.vmem [shape: bf16[2,6,128], index: 2, kind: input, shape index: {}]   ;;  %s2120_s3 = inlined_call_operand.vmem [shape: bf16[2,6,128], index: 3, kind: input, shape index: {}]   ;;  %s2121_s4 = inlined_call_operand.vmem [shape: bf16[9,128,128], index: 4, kind: input, shape index: {}]   ;;  %s2122_s5 = inlined_call_operand.vmem [shape: f32[1,128], index: 5, kind: input, shape index: {}]   ;;  %s2123_s6 = inlined_call_operand.vmem [shape: bf16[2,2,128], index: 6, kind: output, shape index: {}]  }
   0x1   :  { %s1836_s23 = smov 0  }
   0x2 LB: > { %s28_s24 = sadd.s32 1, %s1791_s22  ;;  %p1253_p0 = scmp.ge.s32.totalorder %s1795_s23, 1  ;;  %s1795_s23 = sphi %s1836_s23, %s16_s23   ;;  %s1791_s22 = sphi %s1834_s22, %s2125_s22   ;;  %s1787_s21 = sphi %s1832_s21, %s2124_s21  }
   0x3   : > { %p30_p1 = scmp.ge.s32.totalorder %s28_s24, 2  ;;  %p269_p2 = scmp.lt.s32.totalorder %s1795_s23, 3 }
   0x5   : > { %s2127_s24 = smov (%p30_p1, %s28_s24), 0  ;;  %p270_p3 = pnand %p1253_p0, %p269_p2 }
   0x6   : > { %p318_p4 = scmp.lt.s32.totalorder (!%p270_p3), %s1787_s21, 1 }
   0x7   : > { %273 = sbr.rel (%p270_p3) target bundleno = 244 (0xf4), region = 44 }
   0xc   : > { %v1691_v0 = vld [vmem:[%s2121_s4 + $0x78] sm:$0xff]  ;;  %v1690_v4 = vld [vmem:[%s2121_s4 + $0x70] sm:$0xff]  ;;  %s2129_s21 = smov (!%p318_p4, %s1787_s21), 1  ;;  %v1689_v8 = vld [vmem:[%s2121_s4 + $0x68] sm:$0xff] }
   0xd   : > { %v1699_v1 = vld [vmem:[%s2121_s4 + $0xb8] sm:$0xff]  ;;  %430 = vmatpush.bf16.msra.mxu0 %v1691_v0  ;;  %v1698_v5 = vld [vmem:[%s2121_s4 + $0xb0] sm:$0xff]  ;;  %v1697_v9 = vld [vmem:[%s2121_s4 + $0xa8] sm:$0xff]  ;;  %s1889_s29 = sshll.u32 %s2129_s21, 2  ;;  %s346_s17 = scalar_lea.vmem %s2123_s6, %s2129_s21 }
   0xe   : > { %v1707_v2 = vld [vmem:[%s2121_s4 + $0xf8] sm:$0xff]  ;;  %581 = vmatpush.bf16.msra.mxu2 %v1699_v1  ;;  %v1706_v6 = vld [vmem:[%s2121_s4 + $0xf0] sm:$0xff]  ;;  %v1705_v10 = vld [vmem:[%s2121_s4 + $0xe8] sm:$0xff]  ;;  %s1907_s16 = scalar_lea.vmem %s2117_s0, %s1889_s29  ;;  %s1968_s19 = scalar_lea.vmem %s2118_s1, %s1889_s29 }
   0xf   : > { %v1683_v3 = vld [vmem:[%s2121_s4 + $0x38] sm:$0xff]  ;;  %661 = vmatpush.bf16.msra.mxu3 %v1707_v2  ;;  %v1682_v7 = vld [vmem:[%s2121_s4 + $0x30] sm:$0xff]  ;;  %v1681_v11 = vld [vmem:[%s2121_s4 + $0x28] sm:$0xff]  ;;  %s1980_s7 = scalar_lea.vmem %s2119_s2, %s1889_s29  ;;  %s333_s13 = scalar_lea.vmem %s2120_s3, %s1889_s29 }
  0x10   : > { %491 = vmatpush.bf16.msra.mxu1 %v1683_v3  ;;  %v1688_v12 = vld [vmem:[%s2121_s4 + $0x60] sm:$0xff]  ;;  %v1687_v16 = vld [vmem:[%s2121_s4 + $0x58] sm:$0xff]  ;;  %v1686_v22 = vld [vmem:[%s2121_s4 + $0x50] sm:$0xff] }
  0x11   : > { %431 = vmatpush.bf16.msra.mxu0 %v1690_v4  ;;  %v1696_v13 = vld [vmem:[%s2121_s4 + $0xa0] sm:$0xff]  ;;  %v1695_v17 = vld [vmem:[%s2121_s4 + $0x98] sm:$0xff]  ;;  %v1694_v23 = vld [vmem:[%s2121_s4 + $0x90] sm:$0xff] }
  0x12   : > { %582 = vmatpush.bf16.msra.mxu2 %v1698_v5  ;;  %v1704_v14 = vld [vmem:[%s2121_s4 + $0xe0] sm:$0xff]  ;;  %v1703_v18 = vld [vmem:[%s2121_s4 + $0xd8] sm:$0xff]  ;;  %v1702_v25 = vld [vmem:[%s2121_s4 + $0xd0] sm:$0xff] }
  0x13   : > { %662 = vmatpush.bf16.msra.mxu3 %v1706_v6  ;;  %v1680_v15 = vld [vmem:[%s2121_s4 + $0x20] sm:$0xff]  ;;  %v1679_v19 = vld [vmem:[%s2121_s4 + $0x18] sm:$0xff]  ;;  %v1678_v26 = vld [vmem:[%s2121_s4 + $0x10] sm:$0xff] }
  0x14   : > { %492 = vmatpush.bf16.msra.mxu1 %v1682_v7  ;;  %v504_v20 = vld [vmem:[%s1907_s16] sm:$0x3]  ;;  %v1685_v27 = vld [vmem:[%s2121_s4 + $0x48] sm:$0xff]  ;;  %v1715_v36 = vld [vmem:[%s2121_s4 + $0x138] sm:$0xff] }
  0x15   : > { %432 = vmatpush.bf16.msra.mxu0 %v1689_v8  ;;  %v523_v21 = vunpack.c.l.b16 %v504_v20  ;;  %v1693_v28 = vld [vmem:[%s2121_s4 + $0x88] sm:$0xff]  ;;  %v1684_v32 = vld [vmem:[%s2121_s4 + $0x40] sm:$0xff]  ;;  %v1731_v37 = vld [vmem:[%s2121_s4 + $0x1b8] sm:$0xff] }
  0x16   : > { %583 = vmatpush.bf16.msra.mxu2 %v1697_v9  ;;  %v1701_v30 = vld [vmem:[%s2121_s4 + $0xc8] sm:$0xff]  ;;  %v1692_v33 = vld [vmem:[%s2121_s4 + $0x80] sm:$0xff]  ;;  %v1739_v40 = vld [vmem:[%s2121_s4 + $0x1f8] sm:$0xff] }
  0x17   : > { %663 = vmatpush.bf16.msra.mxu3 %v1705_v10  ;;  %v524_v24 = vpack.c.b16 %v523_v21, %v523_v21  ;;  %v1677_v31 = vld [vmem:[%s2121_s4 + $0x8] sm:$0xff]  ;;  %v1700_v38 = vld [vmem:[%s2121_s4 + $0xc0] sm:$0xff]  ;;  %v1723_v41 = vld [vmem:[%s2121_s4 + $0x178] sm:$0xff] }
  0x18   : > { %493 = vmatpush.bf16.msra.mxu1 %v1681_v11  ;;  %v1676_v39 = vld [vmem:[%s2121_s4] sm:$0xff]  ;;  %v1714_v43 = vld [vmem:[%s2121_s4 + $0x130] sm:$0xff]  ;;  %v1713_v50 = vld [vmem:[%s2121_s4 + $0x128] sm:$0xff] }
  0x19   : > { %433 = vmatpush.bf16.msra.mxu0 %v1688_v12  ;;  %v528_v29 = vshll.u32 %v524_v24, 16  ;;  %v526_v34 = vshrl.u32 %v524_v24, 16  ;;  %v1730_v44 = vld [vmem:[%s2121_s4 + $0x1b0] sm:$0xff]  ;;  %v364_v45 = vld [vmem:[%s1968_s19] sm:$0x1]  ;;  %v1729_v51 = vld [vmem:[%s2121_s4 + $0x1a8] sm:$0xff] }
  0x1a   : > { %584 = vmatpush.bf16.msra.mxu2 %v1696_v13  ;;  %v1738_v46 = vld [vmem:[%s2121_s4 + $0x1f0] sm:$0xff]  ;;  %v595_v48 = vld [vmem:[%s1980_s7] sm:$0x1]  ;;  %v1737_v52 = vld [vmem:[%s2121_s4 + $0x1e8] sm:$0xff] }
  0x1b   : > { %664 = vmatpush.bf16.msra.mxu3 %v1704_v14  ;;  %v530_v35 = vrot.slane %v528_v29, 1  ;;  %v1722_v47 = vld [vmem:[%s2121_s4 + $0x170] sm:$0xff]  ;;  %v347_v49 = vld [vmem:[%s1907_s16] sm:$0x1]  ;;  %v1721_v53 = vld [vmem:[%s2121_s4 + $0x168] sm:$0xff] }
  0x1c   : > { %494 = vmatpush.bf16.msra.mxu1 %v1680_v15  ;;  %v1712_v54 = vld [vmem:[%s2121_s4 + $0x120] sm:$0xff]  ;;  %v1711_v59 = vld [vmem:[%s2121_s4 + $0x118] sm:$0xff]  ;;  %v1710_v0 = vld [vmem:[%s2121_s4 + $0x110] sm:$0xff] }
  0x1d   : > { %434 = vmatpush.bf16.msra.mxu0 %v1687_v16  ;;  %v531_v42 = vor.u32 %v530_v35, %v526_v34  ;;  %v1728_v55 = vld [vmem:[%s2121_s4 + $0x1a0] sm:$0xff]  ;;  %v1727_v60 = vld [vmem:[%s2121_s4 + $0x198] sm:$0xff]  ;;  %v1726_v1 = vld [vmem:[%s2121_s4 + $0x190] sm:$0xff] }
  0x1e   : > { %585 = vmatpush.bf16.msra.mxu2 %v1695_v17  ;;  %v1736_v56 = vld [vmem:[%s2121_s4 + $0x1e0] sm:$0xff]  ;;  %v1735_v62 = vld [vmem:[%s2121_s4 + $0x1d8] sm:$0xff]  ;;  %v1734_v5 = vld [vmem:[%s2121_s4 + $0x1d0] sm:$0xff] }
  0x1f   : > { %665 = vmatpush.bf16.msra.mxu3 %v1703_v18  ;;  %v1720_v57 = vld [vmem:[%s2121_s4 + $0x160] sm:$0xff]  ;;  %v1719_v63 = vld [vmem:[%s2121_s4 + $0x158] sm:$0xff]  ;;  %v1718_v6 = vld [vmem:[%s2121_s4 + $0x150] sm:$0xff] }
  0x20   : > { %495 = vmatpush.bf16.msra.mxu1 %v1679_v19  ;;  %v755_v58 = vld [vmem:[%s1980_s7] sm:$0x3]  ;;  %v1709_v8 = vld [vmem:[%s2121_s4 + $0x108] sm:$0xff]  ;;  %v1747_v18 = vld [vmem:[%s2121_s4 + $0x238] sm:$0xff] }
  0x21   : > { %435 = vmatpush.bf16.msra.mxu0 %v1686_v22  ;;  %v774_v61 = vunpack.c.l.b16 %v755_v58  ;;  %v846_v2 = vld [vmem:[%s1907_s16] sm:$0x2]  ;;  %v1725_v9 = vld [vmem:[%s2121_s4 + $0x188] sm:$0xff]  ;;  %v675_v24 = vld [vmem:[%s333_s13] sm:$0x1] }
  0x22   : > { %586 = vmatpush.bf16.msra.mxu2 %v1694_v23  ;;  %v931_v3 = vld [vmem:[%s1968_s19] sm:$0x2]  ;;  %v865_v7 = vunpack.c.l.b16 %v846_v2  ;;  %v1733_v12 = vld [vmem:[%s2121_s4 + $0x1c8] sm:$0xff]  ;;  %v1742_v34 = vld [vmem:[%s2121_s4 + $0x210] sm:$0xff] }
  0x23   : > { %666 = vmatpush.bf16.msra.mxu3 %v1702_v25  ;;  %v775_v4 = vpack.c.b16 %v774_v61, %v774_v61  ;;  %v950_v10 = vunpack.c.l.b16 %v931_v3  ;;  %v1717_v13 = vld [vmem:[%s2121_s4 + $0x148] sm:$0xff]  ;;  %v1708_v15 = vld [vmem:[%s2121_s4 + $0x100] sm:$0xff] }
  0x24   : > { %496 = vmatpush.bf16.msra.mxu1 %v1678_v26  ;;  %v866_v14 = vpack.c.b16 %v865_v7, %v865_v7  ;;  %v1724_v16 = vld [vmem:[%s2121_s4 + $0x180] sm:$0xff]  ;;  %v1746_v26 = vld [vmem:[%s2121_s4 + $0x230] sm:$0xff] }
  0x25   : > { %436 = vmatpush.bf16.msra.mxu0 %v1685_v27  ;;  %v779_v11 = vshll.u32 %v775_v4, 16  ;;  %v951_v17 = vpack.c.b16 %v950_v10, %v950_v10  ;;  %v777_v19 = vshrl.u32 %v775_v4, 16  ;;  %v1732_v21 = vld [vmem:[%s2121_s4 + $0x1c0] sm:$0xff] }
  0x26   : > { %587 = vmatpush.bf16.msra.mxu2 %v1693_v28  ;;  %v1716_v22 = vld [vmem:[%s2121_s4 + $0x140] sm:$0xff]  ;;  %v867_v23 = vrot.slane %v866_v14, 1  ;;  %v1745_v28 = vld [vmem:[%s2121_s4 + $0x228] sm:$0xff] }
  0x27   : > { %667 = vmatpush.bf16.msra.mxu3 %v1701_v30  ;;  %v781_v20 = vrot.slane %v779_v11, 1  ;;  %v952_v25 = vrot.slane %v951_v17, 1  ;;  %v1744_v29 = vld [vmem:[%s2121_s4 + $0x220] sm:$0xff] }
  0x28   : > { %497 = vmatpush.bf16.msra.mxu1 %v1677_v31  ;;  %v1016_v30 = vld [vmem:[%s1907_s16] sm:$0x6] }
  0x29   : > { %437 = vmatpush.bf16.msra.mxu0 %v1684_v32  ;;  %v782_v27 = vor.u32 %v781_v20, %v777_v19  ;;  %v1035_v31 = vunpack.c.l.b16 %v1016_v30  ;;  %v1743_v32 = vld [vmem:[%s2121_s4 + $0x218] sm:$0xff] }
  0x2a   : > { %588 = vmatpush.bf16.msra.mxu2 %v1692_v33 }
  0x2b   : > { %668 = vmatpush.bf16.msra.mxu3 %v1700_v38  ;;  %v1036_v33 = vpack.c.b16 %v1035_v31, %v1035_v31 }
  0x2c   : > { %498 = vmatpush.bf16.msra.mxu1 %v1676_v39  ;;  %438 = vmatmul.bf16.vlgmr.msra.gmra.mxu0 %v364_v45 }
  0x2d   : > { %741 = vmatpush.bf16.msrb.mxu0 %v1715_v36  ;;  %589 = vmatmul.bf16.vlgmr.msra.gmra.mxu2 %v531_v42  ;;  %v1038_v35 = vshrl.u32 %v1036_v33, 16  ;;  %v1041_v36 = vshll.u32 %v1036_v33, 16 }
  0x2e   : > { %917 = vmatpush.bf16.msrb.mxu2 %v1731_v37  ;;  %669 = vmatmul.bf16.vlgmr.msra.gmra.mxu3 %v595_v48  ;;  %v1741_v37 = vld [vmem:[%s2121_s4 + $0x208] sm:$0xff] }
  0x2f   : > { %1002 = vmatpush.bf16.msrb.mxu3 %v1739_v40  ;;  %499 = vmatmul.bf16.vlgmr.msra.gmra.mxu1 %v347_v49  ;;  %v1040_v38 = vrot.slane %v1038_v35, 1  ;;  %v1043_v39 = vrot.slane %v1041_v36, 2  ;;  %v1740_v40 = vld [vmem:[%s2121_s4 + $0x200] sm:$0xff] }
  0x30   : > { %832 = vmatpush.bf16.msrb.mxu1 %v1723_v41 }
  0x31   : > { %742 = vmatpush.bf16.msrb.mxu0 %v1714_v43  ;;  %v1044_v41 = vor.u32 %v1043_v39, %v1040_v38 }
  0x32   : > { %918 = vmatpush.bf16.msrb.mxu2 %v1730_v44 }
  0x33   : > { %1003 = vmatpush.bf16.msrb.mxu3 %v1738_v46 }
  0x34   : > { %833 = vmatpush.bf16.msrb.mxu1 %v1722_v47 }
  0x35   : > { %743 = vmatpush.bf16.msrb.mxu0 %v1713_v50 }
  0x36   : > { %919 = vmatpush.bf16.msrb.mxu2 %v1729_v51 }
  0x37   : > { %1004 = vmatpush.bf16.msrb.mxu3 %v1737_v52 }
  0x38   : > { %834 = vmatpush.bf16.msrb.mxu1 %v1721_v53 }
  0x39   : > { %744 = vmatpush.bf16.msrb.mxu0 %v1712_v54 }
  0x3a   : > { %920 = vmatpush.bf16.msrb.mxu2 %v1728_v55 }
  0x3b   : > { %1005 = vmatpush.bf16.msrb.mxu3 %v1736_v56 }
  0x3c   : > { %835 = vmatpush.bf16.msrb.mxu1 %v1720_v57 }
  0x3d   : > { %745 = vmatpush.bf16.msrb.mxu0 %v1711_v59 }
  0x3e   : > { %921 = vmatpush.bf16.msrb.mxu2 %v1727_v60 }
  0x3f   : > { %1006 = vmatpush.bf16.msrb.mxu3 %v1735_v62 }
  0x40   : > { %836 = vmatpush.bf16.msrb.mxu1 %v1719_v63 }
  0x41   : > { %746 = vmatpush.bf16.msrb.mxu0 %v1710_v0 }
  0x42   : > { %922 = vmatpush.bf16.msrb.mxu2 %v1726_v1  ;;  %v1772_v1 = vld [vmem:[%s2122_s5] ss:$0 sm:$0xff] }
  0x43   : > { %1007 = vmatpush.bf16.msrb.mxu3 %v1734_v5 }
  0x44   : > { %837 = vmatpush.bf16.msrb.mxu1 %v1718_v6 }
  0x45   : > { %747 = vmatpush.bf16.msrb.mxu0 %v1709_v8 }
  0x46   : > { %923 = vmatpush.bf16.msrb.mxu2 %v1725_v9 }
  0x47   : > { %1008 = vmatpush.bf16.msrb.mxu3 %v1733_v12 }
  0x48   : > { %838 = vmatpush.bf16.msrb.mxu1 %v1717_v13 }
  0x49   : > { %748 = vmatpush.bf16.msrb.mxu0 %v1708_v15 }
  0x4a   : > { %924 = vmatpush.bf16.msrb.mxu2 %v1724_v16 }
  0x4b   : > { %1009 = vmatpush.bf16.msrb.mxu3 %v1732_v21 }
  0x4c   : > { %839 = vmatpush.bf16.msrb.mxu1 %v1716_v22  ;;  %749 = vmatmul.bf16.vlgmr.msrb.gmra.mxu0 %v675_v24 }
  0x4d   : > { %1094 = vmatpush.bf16.msra.mxu0 %v1747_v18  ;;  %925 = vmatmul.bf16.vlgmr.msrb.gmra.mxu2 %v867_v23 }
  0x4e   : > { %1010 = vmatmul.bf16.vlgmr.msrb.gmra.mxu3 %v952_v25 }
  0x4f   : > { %840 = vmatmul.bf16.vlgmr.msrb.gmra.mxu1 %v782_v27 }
  0x51   : > { %1095 = vmatpush.bf16.msra.mxu0 %v1746_v26 }
  0x55   : > { %1096 = vmatpush.bf16.msra.mxu0 %v1745_v28 }
  0x59   : > { %1097 = vmatpush.bf16.msra.mxu0 %v1744_v29 }
  0x5d   : > { %1098 = vmatpush.bf16.msra.mxu0 %v1743_v32 }
  0x61   : > { %1099 = vmatpush.bf16.msra.mxu0 %v1742_v34 }
  0x65   : > { %1100 = vmatpush.bf16.msra.mxu0 %v1741_v37 }
  0x69   : > { %1101 = vmatpush.bf16.msra.mxu0 %v1740_v40 }
  0x6c   : > { %1102 = vmatmul.bf16.vlgmr.msra.gmra.mxu0 %v1044_v41 }
  0xa9   : > { %v439_v42 = vpop.f32.mrf.mxu0 }
  0xac   : > { %v500_v43 = vpop.f32.mrf.mxu1 }
  0xad   : > { %v501_v52 = vadd.f32 %v500_v43, %v439_v42 }
  0xb0   : > { %v590_v44 = vpop.f32.mrf.mxu2 }
  0xb1   : > { %v670_v45 = vpop.f32.mrf.mxu3  ;;  %v441_v46 = vpop.f32.mrf.mxu0  ;;  %v594_v54 = vadd.f32 %v590_v44, %v501_v52 }
  0xb3   : > { %v674_v58 = vadd.f32 %v670_v45, %v594_v54 }
  0xb4   : > { %v502_v47 = vpop.f32.mrf.mxu1 }
  0xb8   : > { %v592_v48 = vpop.f32.mrf.mxu2 }
  0xb9   : > { %v672_v49 = vpop.f32.mrf.mxu3 }
  0xc9   : > { %v750_v50 = vpop.f32.mrf.mxu0 }
  0xca   : > { %v754_v60 = vadd.f32 %v750_v50, %v674_v58 }
  0xcc   : > { %v841_v51 = vpop.f32.mrf.mxu1 }
  0xcd   : > { %v845_v62 = vadd.f32 %v841_v51, %v754_v60 }
  0xd0   : > { %v926_v53 = vpop.f32.mrf.mxu2 }
  0xd1   : > { %v1011_v55 = vpop.f32.mrf.mxu3  ;;  %v752_v56 = vpop.f32.mrf.mxu0  ;;  %v930_v63 = vadd.f32 %v926_v53, %v845_v62 }
  0xd3   : > { %v1015_v0 = vadd.f32 %v1011_v55, %v930_v63 }
  0xd4   : > { %v843_v57 = vpop.f32.mrf.mxu1 }
  0xd8   : > { %v928_v59 = vpop.f32.mrf.mxu2 }
  0xd9   : > { %v1013_v61 = vpop.f32.mrf.mxu3 }
  0xe9   : > { %v1103_v2 = vpop.f32.mrf.mxu0 }
  0xea   : > { %v1107_v3 = vadd.f32 %v1103_v2, %v1015_v0 }
  0xec   : > { %v1112_v4 = vadd.f32 %v1772_v1, %v1107_v3 }
  0xee   : > { %vm1113_vm0 = vcmp.ge.f32.partialorder %v1112_v4, 0.0  ;;  %v1114_v5 = vmul.f32 0.01, %v1112_v4 }
  0xf0   : > { %v1115_v6 = vsel %vm1113_vm0, %v1112_v4, %v1114_v5 }
  0xf1   : > { %v1116_v7 = vpack.c.bf16 %v1115_v6, %v1115_v6  ;;  %v1105_v8 = vpop.f32.mrf.mxu0 }
  0xf3   : > { %1117 = vst [vmem:[%s346_s17] sm:$0x1] %v1116_v7 }
  0xf4 PF: > { %s16_s23 = sadd.s32 1, %s1795_s23   ;;  %s2124_s21 = smov %s1791_s22 }
  0xf5   : > { %p13_p5 = scmp.ge.s32.totalorder %s16_s23, 4   ;;  %s2125_s22 = smov %s2127_s24 }
  0xf7   :  { %15 = sbr.rel (!%p13_p5) target bundleno = 2 (0x2), region = 97 }

// kernel: gradual_style_block_forward.9
= control target key start
LH: loop header
LB: loop body
LE: loop exit
PB: predicated region body
PF: predicated region fallthrough
CT: control target
= control target key end

     0   :  { %s255_s0 = inlined_call_operand.vmem [shape: bf16[2,1,128], index: 0, kind: input, shape index: {}]   ;;  %s256_s1 = inlined_call_operand.vmem [shape: bf16[128,128], index: 1, kind: input, shape index: {}]   ;;  %s257_s2 = inlined_call_operand.vmem [shape: f32[1,128], index: 2, kind: input, shape index: {}]   ;;  %s258_s3 = inlined_call_operand.hbm [shape: f32[2,128], index: 3, kind: output, shape index: {}]  }
   0x1   :  { %v169_v0 = vld [vmem:[%s256_s1 + $0x38] sm:$0xff]  ;;  %v168_v1 = vld [vmem:[%s256_s1 + $0x30] sm:$0xff] }
   0x2   :  { %100 = vmatpush.bf16.msra.mxu0 %v169_v0 }
   0x3   :  { %8 = vsyncpa [#allocation3], 0  ;;  %v167_v2 = vld [vmem:[%s256_s1 + $0x28] sm:$0xff]  ;;  %v16_v3 = vld [vmem:[%s255_s0 + $0x1] sm:$0x1]  ;;  %vm48_vm0 = vcmask 1041409  }
   0x4   :  { %v166_v4 = vld [vmem:[%s256_s1 + $0x20] sm:$0xff]  ;;  %v18_v5 = vunpack.c.l.bf16 %v16_v3  ;;  %v165_v7 = vld [vmem:[%s256_s1 + $0x18] sm:$0xff]  ;;  %v164_v10 = vld [vmem:[%s256_s1 + $0x10] sm:$0xff]  ;;  %s198_s6 = smov [#allocation2]   ;;  %s121_s10 = sshll.u32 %s258_s3, 4  ;;  %s122_s10 = int_to_ptr.hbm [resolvable:$true] %s121_s10 }
   0x5   :  { %v15_v6 = vld [vmem:[%s255_s0] sm:$0x1]  ;;  %v163_v13 = vld [vmem:[%s256_s1 + $0x8] sm:$0xff]  ;;  %s119_s7 = sshll.u32 %s198_s6, 4  ;;  %s120_s7 = int_to_ptr.vmem [resolvable:$true] %s119_s7 }
   0x6   :  { %101 = vmatpush.bf16.msra.mxu0 %v168_v1  ;;  %v17_v8 = vunpack.c.l.bf16 %v15_v6  ;;  %v22_v9 = vpack.c.bf16 %v18_v5, %v18_v5  ;;  %v162_v16 = vld [vmem:[%s256_s1] sm:$0xff] }
   0x7   :  { %v171_v19 = vld [vmem:[%s257_s2] ss:$0 sm:$0xff] }
   0x8   :  { %v21_v11 = vpack.c.bf16 %v17_v8, %v17_v8  ;;  %v46_v12 = vunpack.c.l.b16 %v22_v9 }
   0xa   :  { %102 = vmatpush.bf16.msra.mxu0 %v167_v2  ;;  %v45_v14 = vunpack.c.l.b16 %v21_v11  ;;  %v47_v15 = vrot.slane %v46_v12, 7 }
   0xc   :  { %v49_v17 = vsel %vm48_vm0, %v47_v15, %v45_v14 }
   0xd   :  { %v50_v18 = vpack.c.b16 %v49_v17, %v49_v17 }
   0xe   :  { %103 = vmatpush.bf16.msra.mxu0 %v166_v4 }
  0x12   :  { %104 = vmatpush.bf16.msra.mxu0 %v165_v7 }
  0x16   :  { %105 = vmatpush.bf16.msra.mxu0 %v164_v10 }
  0x1a   :  { %106 = vmatpush.bf16.msra.mxu0 %v163_v13 }
  0x1e   :  { %107 = vmatpush.bf16.msra.mxu0 %v162_v16 }
  0x21   :  { %108 = vmatmul.bf16.vlgmr.msra.gmra.mxu0 %v50_v18 }
  0x9e   :  { %v109_v20 = vpop.f32.mrf.mxu0 }
  0x9f   :  { %v110_v21 = vadd.f32 %v171_v19, %v109_v20 }
  0xa1   :  { %113 = vst [vmem:[#allocation2] sm:$0x3] %v110_v21 }
  0xa2   :  { %124 = dma.vmem_to_hbm [thread:$0]  %s120_s7, 32, %s122_s10, [#allocation3]  }
  0xa6   :  { %v111_v22 = vpop.f32.mrf.mxu0 }
  0xa7   :  { %196 = dma.done.wait [#allocation3], 32  }
  0xa8   :  { %197 = vsyncadd [#allocation3], 4294967264 }
  0xa9   :  { %129 = vsyncpa [#allocation3], 1 }

</bundles_post_ra>
